<compile_context>
chip_gen: v5e
topology: v5e:2x2
jax: 0.10.0
libtpu: 0.0.40
codegen_flags: <defaults>
</compile_context>

<pallas_src>
import numpy as np
import jax
import jax.numpy as jnp
from jax import lax
from jax.experimental import pallas as pl
from jax.experimental.pallas import tpu as pltpu

EPS = 1e-5  # torch.nn.GroupNorm default eps


def _gn(x, gamma, beta):
    # GroupNorm with a single group (ng=1) over the feature dim, per row.
    # One-pass variance: E[x^2] - mean^2 (one cross-lane reduce fewer per call).
    m = jnp.mean(x, axis=-1, keepdims=True)
    m2 = jnp.mean(x * x, axis=-1, keepdims=True)
    var = jnp.maximum(m2 - m * m, 0.0)
    return (x - m) * lax.rsqrt(var + EPS) * gamma + beta


def att_kernel(
    hi_ref,            # (1, tE)   int32   edge -> target-agent row (-1 = pad)
    dist_ref,          # (tE, 2)   f32     agt_ctrs[hi] - ctx_ctrs[wi]
    agts_hi_ref,       # (tE, n_agt) bf16  agts[hi]
    ctx_wi_ref,        # (tE, n_ctx) bf16  ctx[wi]
    agts_ref,          # (tN, n_agt) f32   target agents (also the residual)
    w_d1, b_d1,                      # nn.Linear(2, n_ctx)          (f32, VPU)
    w_d2, g_d2, be_d2,               # Linear(n_ctx, n_ctx, GN)     (w bf16)
    w_q, g_q, be_q,                  # Linear(n_agt, n_ctx, GN)     (w bf16)
    w_c1, g_c1, be_c1,               # Linear(3*n_ctx, n_agt, GN)   fused K
    w_c2,                            # nn.Linear(n_agt, n_agt, bias=False)
    w_a,                             # self.agt: nn.Linear(n_agt, n_agt, bias=False)
    g_n, be_n,                       # self.norm: GroupNorm(1, n_agt)
    w_l, g_l, be_l,                  # self.linear: Linear(..., act=False)
    out_ref,                         # (tN, n_agt) f32
    acc_ref,                         # (tN, n_agt) f32 VMEM scratch (persistent)
):
    f32 = jnp.float32
    bf16 = jnp.bfloat16
    ei = pl.program_id(1)

    # ---- agt branch: init accumulator once per N-tile ----
    @pl.when(ei == 0)
    def _init():
        acc_ref[...] = jnp.dot(agts_ref[...].astype(bf16), w_a[...],
                               preferred_element_type=f32)

    # ---- dist branch: Linear(2, n_ctx) as two VPU broadcast FMAs (no MXU) ----
    dist = dist_ref[...]
    d = dist[:, 0:1] * w_d1[0:1, :] + dist[:, 1:2] * w_d1[1:2, :] + b_d1[...]
    d = jnp.maximum(d, 0.0)
    d = jnp.dot(d.astype(bf16), w_d2[...], preferred_element_type=f32)
    d = jnp.maximum(_gn(d, g_d2[...], be_d2[...]), 0.0)

    # ---- query branch: Linear(n_agt, n_ctx) + GN + ReLU ----
    q = jnp.dot(agts_hi_ref[...], w_q[...], preferred_element_type=f32)
    q = jnp.maximum(_gn(q, g_q[...], be_q[...]), 0.0)

    # ---- ctx branch: cat([dist, query, ctx]) @ Wc1 as ONE K=3*n_ctx dot ----
    cat = jnp.concatenate([d, q, ctx_wi_ref[...].astype(f32)], axis=-1)
    c = jnp.dot(cat.astype(bf16), w_c1[...], preferred_element_type=f32)
    c = jnp.maximum(_gn(c, g_c1[...], be_c1[...]), 0.0)
    c = jnp.dot(c.astype(bf16), w_c2[...], preferred_element_type=f32)  # (tE, n_agt)

    # ---- index_add_(0, hi, c) as a band one-hot matmul on the MXU ----
    # Padded edges carry hi = -1 -> all-zero column -> no contribution.
    # TODO(synk): for very large N, sort edges by hi on the host so each E-tile
    # only touches one N band (avoids redundant edge math across N-tiles).
    tN = acc_ref.shape[0]
    tE = hi_ref.shape[1]
    n_base = pl.program_id(0) * tN
    row_ids = lax.broadcasted_iota(jnp.int32, (tN, tE), 0) + n_base
    onehot = (row_ids == hi_ref[...]).astype(bf16)                    # (tN, tE)
    acc_ref[...] += jnp.dot(onehot, c.astype(bf16), preferred_element_type=f32)

    # ---- tail: norm + relu + linear(act=False) + residual, once per N-tile ----
    @pl.when(ei == pl.num_programs(1) - 1)
    def _finalize():
        a = jnp.maximum(_gn(acc_ref[...], g_n[...], be_n[...]), 0.0)
        a = jnp.dot(a.astype(bf16), w_l[...], preferred_element_type=f32)
        a = _gn(a, g_l[...], be_l[...])
        out_ref[...] = a + agts_ref[...]


def init_params(key, n_agt, n_ctx):
    ks = jax.random.split(key, 8)
    s = 0.1
    return {
        # weights stored as (in, out) so the kernel computes x @ W
        "w_d1": jax.random.normal(ks[0], (2, n_ctx), jnp.float32) * s,
        "b_d1": jax.random.normal(ks[1], (1, n_ctx), jnp.float32) * s,
        "w_d2": jax.random.normal(ks[2], (n_ctx, n_ctx), jnp.float32) * s,
        "g_d2": jnp.ones((1, n_ctx), jnp.float32),
        "be_d2": jnp.zeros((1, n_ctx), jnp.float32),
        "w_q": jax.random.normal(ks[3], (n_agt, n_ctx), jnp.float32) * s,
        "g_q": jnp.ones((1, n_ctx), jnp.float32),
        "be_q": jnp.zeros((1, n_ctx), jnp.float32),
        "w_c1": jax.random.normal(ks[4], (3 * n_ctx, n_agt), jnp.float32) * s,
        "g_c1": jnp.ones((1, n_agt), jnp.float32),
        "be_c1": jnp.zeros((1, n_agt), jnp.float32),
        "w_c2": jax.random.normal(ks[5], (n_agt, n_agt), jnp.float32) * s,
        "w_a": jax.random.normal(ks[6], (n_agt, n_agt), jnp.float32) * s,
        "g_n": jnp.ones((1, n_agt), jnp.float32),
        "be_n": jnp.zeros((1, n_agt), jnp.float32),
        "w_l": jax.random.normal(ks[7], (n_agt, n_agt), jnp.float32) * s,
        "g_l": jnp.ones((1, n_agt), jnp.float32),
        "be_l": jnp.zeros((1, n_agt), jnp.float32),
    }


def att_forward(params, agts, agt_ctrs_list, ctx, ctx_ctrs_list, dist_th,
                tE=128, max_tN=128):
    """Pallas-backed forward of Att. agts:(N,n_agt), ctx:(M,n_ctx)."""
    # --- edge discovery (torch.nonzero equivalent) on the host, NumPy glue ---
    hi_list, wi_list = [], []
    hc, wc = 0, 0
    for ac, cc in zip(agt_ctrs_list, ctx_ctrs_list):
        ac = np.asarray(ac); cc = np.asarray(cc)
        d = np.sqrt(((ac[:, None, :] - cc[None, :, :]) ** 2).sum(-1))
        r, c = np.nonzero(d <= dist_th)
        hi_list.append(r + hc)
        wi_list.append(c + wc)
        hc += len(ac); wc += len(cc)
    hi = np.concatenate(hi_list).astype(np.int32)
    wi = np.concatenate(wi_list).astype(np.int32)
    E = len(hi)
    # TODO(synk): len(ctx)==0 / E==0 fast path of the PyTorch module not handled.
    assert E > 0, "synthetic example must produce at least one edge"

    agt_ctrs = jnp.concatenate([jnp.asarray(a, jnp.float32) for a in agt_ctrs_list], 0)
    ctx_ctrs = jnp.concatenate([jnp.asarray(c, jnp.float32) for c in ctx_ctrs_list], 0)

    # --- gathers (plain-JAX glue) ---
    dist_e = agt_ctrs[hi] - ctx_ctrs[wi]          # (E, 2)
    agts_hi = agts[hi]                            # (E, n_agt)
    ctx_wi = ctx[wi]                              # (E, n_ctx)

    N, n_agt = agts.shape
    n_ctx = ctx.shape[1]
    bf = jnp.bfloat16

    # --- bucket/pad E to a multiple of tE (bounded recompiles, aligned tiles) ---
    E_pad = tE * ((E + tE - 1) // tE)
    pad_e = E_pad - E
    hi_pad = np.concatenate([hi, np.full((pad_e,), -1, np.int32)]).astype(np.int32)
    hi2d = jnp.asarray(hi_pad)[None, :]                                   # (1, E_pad)
    dist_p = jnp.pad(dist_e, ((0, pad_e), (0, 0)))                        # f32
    agts_hi_p = jnp.pad(agts_hi, ((0, pad_e), (0, 0))).astype(bf)         # bf16
    ctx_wi_p = jnp.pad(ctx_wi, ((0, pad_e), (0, 0))).astype(bf)           # bf16

    # --- pad/tile N (parallel axis -> v7x megacore when N is large) ---
    N8 = ((N + 7) // 8) * 8
    tN = min(max_tN, N8)
    N_pad = ((N + tN - 1) // tN) * tN
    agts_p = jnp.pad(agts, ((0, N_pad - N), (0, 0)))                      # f32

    grid = (N_pad // tN, E_pad // tE)

    # matmul weights in bf16; GN/bias params (VPU work) stay f32
    prm = [
        params["w_d1"], params["b_d1"],
        params["w_d2"].astype(bf), params["g_d2"], params["be_d2"],
        params["w_q"].astype(bf), params["g_q"], params["be_q"],
        params["w_c1"].astype(bf), params["g_c1"], params["be_c1"],
        params["w_c2"].astype(bf),
        params["w_a"].astype(bf),
        params["g_n"], params["be_n"],
        params["w_l"].astype(bf), params["g_l"], params["be_l"],
    ]

    in_specs = [
        pl.BlockSpec((1, tE), lambda ni, ei: (0, ei)),        # hi
        pl.BlockSpec((tE, 2), lambda ni, ei: (ei, 0)),        # dist
        pl.BlockSpec((tE, n_agt), lambda ni, ei: (ei, 0)),    # agts[hi]
        pl.BlockSpec((tE, n_ctx), lambda ni, ei: (ei, 0)),    # ctx[wi]
        pl.BlockSpec((tN, n_agt), lambda ni, ei: (ni, 0)),    # agts / residual
    ] + [pl.BlockSpec(w.shape, lambda ni, ei: (0, 0)) for w in prm]

    out = pl.pallas_call(
        att_kernel,
        out_shape=jax.ShapeDtypeStruct((N_pad, n_agt), jnp.float32),
        grid_spec=pltpu.PrefetchScalarGridSpec(
            num_scalar_prefetch=0,
            grid=grid,
            in_specs=in_specs,
            out_specs=pl.BlockSpec((tN, n_agt), lambda ni, ei: (ni, 0)),
            scratch_shapes=[pltpu.VMEM((tN, n_agt), jnp.float32)],
        ),
        compiler_params=pltpu.CompilerParams(
            dimension_semantics=("parallel", "arbitrary"),
            vmem_limit_bytes=32 * 1024 * 1024,   # explicit; fits v7x 64 MiB VMEM
        ),
    )(hi2d, dist_p, agts_hi_p, ctx_wi_p, agts_p, *prm)

    return out[:N], (hi, dist_e, agts_hi, ctx_wi)


# ---------------------- pure-JAX reference (for checking) ----------------------
def _gn_ref(x, g, b):
    mu = x.mean(-1, keepdims=True)
    var = ((x - mu) ** 2).mean(-1, keepdims=True)
    return (x - mu) / jnp.sqrt(var + EPS) * g + b


def ref_forward(p, agts, dist_e, agts_hi, ctx_wi, hi):
    d = jax.nn.relu(dist_e @ p["w_d1"] + p["b_d1"])
    d = jax.nn.relu(_gn_ref(d @ p["w_d2"], p["g_d2"], p["be_d2"]))
    q = jax.nn.relu(_gn_ref(agts_hi @ p["w_q"], p["g_q"], p["be_q"]))
    c = jnp.concatenate([d, q, ctx_wi], axis=-1) @ p["w_c1"]
    c = jax.nn.relu(_gn_ref(c, p["g_c1"], p["be_c1"]))
    c = c @ p["w_c2"]
    a = agts @ p["w_a"]
    a = a.at[jnp.asarray(hi)].add(c)
    a = jax.nn.relu(_gn_ref(a, p["g_n"], p["be_n"]))
    a = _gn_ref(a @ p["w_l"], p["g_l"], p["be_l"])
    return a + agts


if __name__ == "__main__":
    n_agt, n_ctx = 32, 32
    key = jax.random.PRNGKey(0)
    k_par, k_agt, k_ctx, k_ac, k_cc = jax.random.split(key, 5)

    params = init_params(k_par, n_agt, n_ctx)

    # batch of 2 graphs: 5+3 target agents, 6+4 context nodes
    agt_counts, ctx_counts = [5, 3], [6, 4]
    N, M = sum(agt_counts), sum(ctx_counts)

    agts = jax.random.normal(k_agt, (N, n_agt), jnp.float32)
    ctx = jax.random.normal(k_ctx, (M, n_ctx), jnp.float32)

    agt_ctrs_all = jax.random.uniform(k_ac, (N, 2), jnp.float32, 0.0, 10.0)
    ctx_ctrs_all = jax.random.uniform(k_cc, (M, 2), jnp.float32, 0.0, 10.0)
    agt_ctrs_list = [agt_ctrs_all[:5], agt_ctrs_all[5:]]
    ctx_ctrs_list = [ctx_ctrs_all[:6], ctx_ctrs_all[6:]]

    dist_th = 6.0
    out, (hi, dist_e, agts_hi, ctx_wi) = att_forward(
        params, agts, agt_ctrs_list, ctx, ctx_ctrs_list, dist_th)
    out = jax.block_until_ready(out)

    ref = jax.block_until_ready(ref_forward(params, agts, dist_e, agts_hi, ctx_wi, hi))
    np.testing.assert_allclose(np.asarray(out), np.asarray(ref), rtol=5e-2, atol=5e-2)

    print("KERNEL_OK")
</pallas_src>

<mosaic_0001>
module attributes {stable_mosaic.version = 11 : i64} {
  func.func @att_kernel(%arg0: i32, %arg1: i32, %arg2: memref<1x128xi32, #tpu.memory_space<vmem>>, %arg3: memref<128x2xf32, #tpu.memory_space<vmem>>, %arg4: memref<128x32xbf16, #tpu.memory_space<vmem>>, %arg5: memref<128x32xbf16, #tpu.memory_space<vmem>>, %arg6: memref<8x32xf32, #tpu.memory_space<vmem>>, %arg7: memref<2x32xf32, #tpu.memory_space<vmem>>, %arg8: memref<1x32xf32, #tpu.memory_space<vmem>>, %arg9: memref<32x32xbf16, #tpu.memory_space<vmem>>, %arg10: memref<1x32xf32, #tpu.memory_space<vmem>>, %arg11: memref<1x32xf32, #tpu.memory_space<vmem>>, %arg12: memref<32x32xbf16, #tpu.memory_space<vmem>>, %arg13: memref<1x32xf32, #tpu.memory_space<vmem>>, %arg14: memref<1x32xf32, #tpu.memory_space<vmem>>, %arg15: memref<96x32xbf16, #tpu.memory_space<vmem>>, %arg16: memref<1x32xf32, #tpu.memory_space<vmem>>, %arg17: memref<1x32xf32, #tpu.memory_space<vmem>>, %arg18: memref<32x32xbf16, #tpu.memory_space<vmem>>, %arg19: memref<32x32xbf16, #tpu.memory_space<vmem>>, %arg20: memref<1x32xf32, #tpu.memory_space<vmem>>, %arg21: memref<1x32xf32, #tpu.memory_space<vmem>>, %arg22: memref<32x32xbf16, #tpu.memory_space<vmem>>, %arg23: memref<1x32xf32, #tpu.memory_space<vmem>>, %arg24: memref<1x32xf32, #tpu.memory_space<vmem>>, %arg25: memref<8x32xf32, #tpu.memory_space<vmem>>, %arg26: memref<8x32xf32, #tpu.memory_space<vmem>>) attributes {dimension_semantics = [#tpu.dimension_semantics<parallel>, #tpu.dimension_semantics<arbitrary>], iteration_bounds = array<i64: 1, 1>, scalar_prefetch = 0 : i64, scratch_operands = 1 : i64, tpu.core_type = #tpu.core_type<tc>, window_params = [{transform_indices = @transform_0, window_bounds = array<i64: 1, 128>}, {transform_indices = @transform_1, window_bounds = array<i64: 128, 2>}, {transform_indices = @transform_2, window_bounds = array<i64: 128, 32>}, {transform_indices = @transform_3, window_bounds = array<i64: 128, 32>}, {transform_indices = @transform_4, window_bounds = array<i64: 8, 32>}, {pipeline_mode = #tpu.pipeline_mode<synchronous>, transform_indices = @transform_5, window_bounds = array<i64: 2, 32>}, {pipeline_mode = #tpu.pipeline_mode<synchronous>, transform_indices = @transform_6, window_bounds = array<i64: 1, 32>}, {pipeline_mode = #tpu.pipeline_mode<synchronous>, transform_indices = @transform_7, window_bounds = array<i64: 32, 32>}, {pipeline_mode = #tpu.pipeline_mode<synchronous>, transform_indices = @transform_8, window_bounds = array<i64: 1, 32>}, {pipeline_mode = #tpu.pipeline_mode<synchronous>, transform_indices = @transform_9, window_bounds = array<i64: 1, 32>}, {pipeline_mode = #tpu.pipeline_mode<synchronous>, transform_indices = @transform_10, window_bounds = array<i64: 32, 32>}, {pipeline_mode = #tpu.pipeline_mode<synchronous>, transform_indices = @transform_11, window_bounds = array<i64: 1, 32>}, {pipeline_mode = #tpu.pipeline_mode<synchronous>, transform_indices = @transform_12, window_bounds = array<i64: 1, 32>}, {pipeline_mode = #tpu.pipeline_mode<synchronous>, transform_indices = @transform_13, window_bounds = array<i64: 96, 32>}, {pipeline_mode = #tpu.pipeline_mode<synchronous>, transform_indices = @transform_14, window_bounds = array<i64: 1, 32>}, {pipeline_mode = #tpu.pipeline_mode<synchronous>, transform_indices = @transform_15, window_bounds = array<i64: 1, 32>}, {pipeline_mode = #tpu.pipeline_mode<synchronous>, transform_indices = @transform_16, window_bounds = array<i64: 32, 32>}, {pipeline_mode = #tpu.pipeline_mode<synchronous>, transform_indices = @transform_17, window_bounds = array<i64: 32, 32>}, {pipeline_mode = #tpu.pipeline_mode<synchronous>, transform_indices = @transform_18, window_bounds = array<i64: 1, 32>}, {pipeline_mode = #tpu.pipeline_mode<synchronous>, transform_indices = @transform_19, window_bounds = array<i64: 1, 32>}, {pipeline_mode = #tpu.pipeline_mode<synchronous>, transform_indices = @transform_20, window_bounds = array<i64: 32, 32>}, {pipeline_mode = #tpu.pipeline_mode<synchronous>, transform_indices = @transform_21, window_bounds = array<i64: 1, 32>}, {pipeline_mode = #tpu.pipeline_mode<synchronous>, transform_indices = @transform_22, window_bounds = array<i64: 1, 32>}, {transform_indices = @transform_23, window_bounds = array<i64: 8, 32>}]} {
    %c0_i32 = arith.constant 0 : i32
    %0 = arith.cmpi eq, %arg1, %c0_i32 : i32
    %1 = arith.extui %0 : i1 to i32
    %c0_i32_0 = arith.constant 0 : i32
    %2 = arith.cmpi ne, %1, %c0_i32_0 : i32
    scf.if %2 {
      %c0_65 = arith.constant 0 : index
      %c0_66 = arith.constant 0 : index
      %137 = vector.load %arg6[%c0_65, %c0_66] : memref<8x32xf32, #tpu.memory_space<vmem>>, vector<8x32xf32>
      %138 = arith.truncf %137 : vector<8x32xf32> to vector<8x32xbf16>
      %c0_67 = arith.constant 0 : index
      %c0_68 = arith.constant 0 : index
      %139 = vector.load %arg19[%c0_67, %c0_68] : memref<32x32xbf16, #tpu.memory_space<vmem>>, vector<32x32xbf16>
      %cst_69 = arith.constant dense<0.000000e+00> : vector<8x32xf32>
      %140 = tpu.matmul %138, %139, %cst_69 {dimension_numbers = #tpu.dot_dimension_numbers<[1], [0], [0], [1], [0, 0, 1, 1], [], []>} : vector<8x32xbf16>, vector<32x32xbf16>, vector<8x32xf32> -> vector<8x32xf32>
      %c0_70 = arith.constant 0 : index
      %c0_71 = arith.constant 0 : index
      %141 = vector.load %arg26[%c0_70, %c0_71] : memref<8x32xf32, #tpu.memory_space<vmem>>, vector<8x32xf32>
      tpu.vector_store %arg26[%c0_70, %c0_71], %140 {strides = array<i32>} : memref<8x32xf32, #tpu.memory_space<vmem>>, vector<8x32xf32>,
    } else {
    }
    %c0 = arith.constant 0 : index
    %c0_1 = arith.constant 0 : index
    %3 = vector.load %arg3[%c0, %c0_1] : memref<128x2xf32, #tpu.memory_space<vmem>>, vector<128x2xf32>
    %4 = vector.extract_strided_slice %3 {offsets = [0, 0], sizes = [128, 1], strides = [1, 1]} : vector<128x2xf32> to vector<128x1xf32>
    %c0_2 = arith.constant 0 : index
    %c0_3 = arith.constant 0 : index
    %5 = vector.load %arg7[%c0_2, %c0_3] : memref<2x32xf32, #tpu.memory_space<vmem>>, vector<1x32xf32>
    %6 = vector.broadcast %4 : vector<128x1xf32> to vector<128x32xf32>
    %7 = vector.broadcast %5 : vector<1x32xf32> to vector<128x32xf32>
    %8 = arith.mulf %6, %7 : vector<128x32xf32>
    %9 = vector.extract_strided_slice %3 {offsets = [0, 1], sizes = [128, 1], strides = [1, 1]} : vector<128x2xf32> to vector<128x1xf32>
    %c1 = arith.constant 1 : index
    %c0_4 = arith.constant 0 : index
    %10 = vector.load %arg7[%c1, %c0_4] : memref<2x32xf32, #tpu.memory_space<vmem>>, vector<1x32xf32>
    %11 = vector.broadcast %9 : vector<128x1xf32> to vector<128x32xf32>
    %12 = vector.broadcast %10 : vector<1x32xf32> to vector<128x32xf32>
    %13 = arith.mulf %11, %12 : vector<128x32xf32>
    %14 = arith.addf %8, %13 : vector<128x32xf32>
    %c0_5 = arith.constant 0 : index
    %c0_6 = arith.constant 0 : index
    %15 = vector.load %arg8[%c0_5, %c0_6] : memref<1x32xf32, #tpu.memory_space<vmem>>, vector<1x32xf32>
    %16 = vector.broadcast %15 : vector<1x32xf32> to vector<128x32xf32>
    %17 = arith.addf %14, %16 : vector<128x32xf32>
    %cst = arith.constant 0.000000e+00 : f32
    %18 = vector.broadcast %cst : f32 to vector<128x32xf32>
    %19 = arith.maximumf %17, %18 : vector<128x32xf32>
    %20 = arith.truncf %19 : vector<128x32xf32> to vector<128x32xbf16>
    %c0_7 = arith.constant 0 : index
    %c0_8 = arith.constant 0 : index
    %21 = vector.load %arg9[%c0_7, %c0_8] : memref<32x32xbf16, #tpu.memory_space<vmem>>, vector<32x32xbf16>
    %cst_9 = arith.constant dense<0.000000e+00> : vector<128x32xf32>
    %22 = tpu.matmul %20, %21, %cst_9 {dimension_numbers = #tpu.dot_dimension_numbers<[1], [0], [0], [1], [0, 0, 1, 1], [], []>} : vector<128x32xbf16>, vector<32x32xbf16>, vector<128x32xf32> -> vector<128x32xf32>
    %c0_10 = arith.constant 0 : index
    %c0_11 = arith.constant 0 : index
    %23 = vector.load %arg10[%c0_10, %c0_11] : memref<1x32xf32, #tpu.memory_space<vmem>>, vector<1x32xf32>
    %c0_12 = arith.constant 0 : index
    %c0_13 = arith.constant 0 : index
    %24 = vector.load %arg11[%c0_12, %c0_13] : memref<1x32xf32, #tpu.memory_space<vmem>>, vector<1x32xf32>
    %cst_14 = arith.constant dense<0.000000e+00> : vector<128xf32>
    %25 = vector.multi_reduction <add>, %22, %cst_14 [1] : vector<128x32xf32> to vector<128xf32>
    %26 = vector.shape_cast %25 : vector<128xf32> to vector<128x1xf32>
    %cst_15 = arith.constant 3.200000e+01 : f32
    %27 = vector.broadcast %cst_15 : f32 to vector<128x1xf32>
    %28 = arith.divf %26, %27 : vector<128x1xf32>
    %29 = arith.mulf %22, %22 : vector<128x32xf32>
    %cst_16 = arith.constant dense<0.000000e+00> : vector<128xf32>
    %30 = vector.multi_reduction <add>, %29, %cst_16 [1] : vector<128x32xf32> to vector<128xf32>
    %31 = vector.shape_cast %30 : vector<128xf32> to vector<128x1xf32>
    %cst_17 = arith.constant 3.200000e+01 : f32
    %32 = vector.broadcast %cst_17 : f32 to vector<128x1xf32>
    %33 = arith.divf %31, %32 : vector<128x1xf32>
    %34 = arith.mulf %28, %28 : vector<128x1xf32>
    %35 = arith.subf %33, %34 : vector<128x1xf32>
    %cst_18 = arith.constant 0.000000e+00 : f32
    %36 = vector.broadcast %cst_18 : f32 to vector<128x1xf32>
    %37 = arith.maximumf %35, %36 : vector<128x1xf32>
    %38 = vector.broadcast %28 : vector<128x1xf32> to vector<128x32xf32>
    %39 = arith.subf %22, %38 : vector<128x32xf32>
    %cst_19 = arith.constant 9.99999974E-6 : f32
    %40 = vector.broadcast %cst_19 : f32 to vector<128x1xf32>
    %41 = arith.addf %37, %40 : vector<128x1xf32>
    %42 = math.rsqrt %41 : vector<128x1xf32>
    %43 = vector.broadcast %42 : vector<128x1xf32> to vector<128x32xf32>
    %44 = arith.mulf %39, %43 : vector<128x32xf32>
    %45 = vector.broadcast %23 : vector<1x32xf32> to vector<128x32xf32>
    %46 = arith.mulf %44, %45 : vector<128x32xf32>
    %47 = vector.broadcast %24 : vector<1x32xf32> to vector<128x32xf32>
    %48 = arith.addf %46, %47 : vector<128x32xf32>
    %cst_20 = arith.constant 0.000000e+00 : f32
    %49 = vector.broadcast %cst_20 : f32 to vector<128x32xf32>
    %50 = arith.maximumf %48, %49 : vector<128x32xf32>
    %c0_21 = arith.constant 0 : index
    %c0_22 = arith.constant 0 : index
    %51 = vector.load %arg4[%c0_21, %c0_22] : memref<128x32xbf16, #tpu.memory_space<vmem>>, vector<128x32xbf16>
    %c0_23 = arith.constant 0 : index
    %c0_24 = arith.constant 0 : index
    %52 = vector.load %arg12[%c0_23, %c0_24] : memref<32x32xbf16, #tpu.memory_space<vmem>>, vector<32x32xbf16>
    %cst_25 = arith.constant dense<0.000000e+00> : vector<128x32xf32>
    %53 = tpu.matmul %51, %52, %cst_25 {dimension_numbers = #tpu.dot_dimension_numbers<[1], [0], [0], [1], [0, 0, 1, 1], [], []>} : vector<128x32xbf16>, vector<32x32xbf16>, vector<128x32xf32> -> vector<128x32xf32>
    %c0_26 = arith.constant 0 : index
    %c0_27 = arith.constant 0 : index
    %54 = vector.load %arg13[%c0_26, %c0_27] : memref<1x32xf32, #tpu.memory_space<vmem>>, vector<1x32xf32>
    %c0_28 = arith.constant 0 : index
    %c0_29 = arith.constant 0 : index
    %55 = vector.load %arg14[%c0_28, %c0_29] : memref<1x32xf32, #tpu.memory_space<vmem>>, vector<1x32xf32>
    %cst_30 = arith.constant dense<0.000000e+00> : vector<128xf32>
    %56 = vector.multi_reduction <add>, %53, %cst_30 [1] : vector<128x32xf32> to vector<128xf32>
    %57 = vector.shape_cast %56 : vector<128xf32> to vector<128x1xf32>
    %cst_31 = arith.constant 3.200000e+01 : f32
    %58 = vector.broadcast %cst_31 : f32 to vector<128x1xf32>
    %59 = arith.divf %57, %58 : vector<128x1xf32>
    %60 = arith.mulf %53, %53 : vector<128x32xf32>
    %cst_32 = arith.constant dense<0.000000e+00> : vector<128xf32>
    %61 = vector.multi_reduction <add>, %60, %cst_32 [1] : vector<128x32xf32> to vector<128xf32>
    %62 = vector.shape_cast %61 : vector<128xf32> to vector<128x1xf32>
    %cst_33 = arith.constant 3.200000e+01 : f32
    %63 = vector.broadcast %cst_33 : f32 to vector<128x1xf32>
    %64 = arith.divf %62, %63 : vector<128x1xf32>
    %65 = arith.mulf %59, %59 : vector<128x1xf32>
    %66 = arith.subf %64, %65 : vector<128x1xf32>
    %cst_34 = arith.constant 0.000000e+00 : f32
    %67 = vector.broadcast %cst_34 : f32 to vector<128x1xf32>
    %68 = arith.maximumf %66, %67 : vector<128x1xf32>
    %69 = vector.broadcast %59 : vector<128x1xf32> to vector<128x32xf32>
    %70 = arith.subf %53, %69 : vector<128x32xf32>
    %cst_35 = arith.constant 9.99999974E-6 : f32
    %71 = vector.broadcast %cst_35 : f32 to vector<128x1xf32>
    %72 = arith.addf %68, %71 : vector<128x1xf32>
    %73 = math.rsqrt %72 : vector<128x1xf32>
    %74 = vector.broadcast %73 : vector<128x1xf32> to vector<128x32xf32>
    %75 = arith.mulf %70, %74 : vector<128x32xf32>
    %76 = vector.broadcast %54 : vector<1x32xf32> to vector<128x32xf32>
    %77 = arith.mulf %75, %76 : vector<128x32xf32>
    %78 = vector.broadcast %55 : vector<1x32xf32> to vector<128x32xf32>
    %79 = arith.addf %77, %78 : vector<128x32xf32>
    %cst_36 = arith.constant 0.000000e+00 : f32
    %80 = vector.broadcast %cst_36 : f32 to vector<128x32xf32>
    %81 = arith.maximumf %79, %80 : vector<128x32xf32>
    %c0_37 = arith.constant 0 : index
    %c0_38 = arith.constant 0 : index
    %82 = vector.load %arg5[%c0_37, %c0_38] : memref<128x32xbf16, #tpu.memory_space<vmem>>, vector<128x32xbf16>
    %83 = arith.extf %82 : vector<128x32xbf16> to vector<128x32xf32>
    %84 = tpu.concatenate %50, %81, %83 in 1 : vector<128x32xf32>, vector<128x32xf32>, vector<128x32xf32> -> vector<128x96xf32>
    %85 = arith.truncf %84 : vector<128x96xf32> to vector<128x96xbf16>
    %c0_39 = arith.constant 0 : index
    %c0_40 = arith.constant 0 : index
    %86 = vector.load %arg15[%c0_39, %c0_40] : memref<96x32xbf16, #tpu.memory_space<vmem>>, vector<96x32xbf16>
    %cst_41 = arith.constant dense<0.000000e+00> : vector<128x32xf32>
    %87 = tpu.matmul %85, %86, %cst_41 {dimension_numbers = #tpu.dot_dimension_numbers<[1], [0], [0], [1], [0, 0, 1, 1], [], []>} : vector<128x96xbf16>, vector<96x32xbf16>, vector<128x32xf32> -> vector<128x32xf32>
    %c0_42 = arith.constant 0 : index
    %c0_43 = arith.constant 0 : index
    %88 = vector.load %arg16[%c0_42, %c0_43] : memref<1x32xf32, #tpu.memory_space<vmem>>, vector<1x32xf32>
    %c0_44 = arith.constant 0 : index
    %c0_45 = arith.constant 0 : index
    %89 = vector.load %arg17[%c0_44, %c0_45] : memref<1x32xf32, #tpu.memory_space<vmem>>, vector<1x32xf32>
    %cst_46 = arith.constant dense<0.000000e+00> : vector<128xf32>
    %90 = vector.multi_reduction <add>, %87, %cst_46 [1] : vector<128x32xf32> to vector<128xf32>
    %91 = vector.shape_cast %90 : vector<128xf32> to vector<128x1xf32>
    %cst_47 = arith.constant 3.200000e+01 : f32
    %92 = vector.broadcast %cst_47 : f32 to vector<128x1xf32>
    %93 = arith.divf %91, %92 : vector<128x1xf32>
    %94 = arith.mulf %87, %87 : vector<128x32xf32>
    %cst_48 = arith.constant dense<0.000000e+00> : vector<128xf32>
    %95 = vector.multi_reduction <add>, %94, %cst_48 [1] : vector<128x32xf32> to vector<128xf32>
    %96 = vector.shape_cast %95 : vector<128xf32> to vector<128x1xf32>
    %cst_49 = arith.constant 3.200000e+01 : f32
    %97 = vector.broadcast %cst_49 : f32 to vector<128x1xf32>
    %98 = arith.divf %96, %97 : vector<128x1xf32>
    %99 = arith.mulf %93, %93 : vector<128x1xf32>
    %100 = arith.subf %98, %99 : vector<128x1xf32>
    %cst_50 = arith.constant 0.000000e+00 : f32
    %101 = vector.broadcast %cst_50 : f32 to vector<128x1xf32>
    %102 = arith.maximumf %100, %101 : vector<128x1xf32>
    %103 = vector.broadcast %93 : vector<128x1xf32> to vector<128x32xf32>
    %104 = arith.subf %87, %103 : vector<128x32xf32>
    %cst_51 = arith.constant 9.99999974E-6 : f32
    %105 = vector.broadcast %cst_51 : f32 to vector<128x1xf32>
    %106 = arith.addf %102, %105 : vector<128x1xf32>
    %107 = math.rsqrt %106 : vector<128x1xf32>
    %108 = vector.broadcast %107 : vector<128x1xf32> to vector<128x32xf32>
    %109 = arith.mulf %104, %108 : vector<128x32xf32>
    %110 = vector.broadcast %88 : vector<1x32xf32> to vector<128x32xf32>
    %111 = arith.mulf %109, %110 : vector<128x32xf32>
    %112 = vector.broadcast %89 : vector<1x32xf32> to vector<128x32xf32>
    %113 = arith.addf %111, %112 : vector<128x32xf32>
    %cst_52 = arith.constant 0.000000e+00 : f32
    %114 = vector.broadcast %cst_52 : f32 to vector<128x32xf32>
    %115 = arith.maximumf %113, %114 : vector<128x32xf32>
    %116 = arith.truncf %115 : vector<128x32xf32> to vector<128x32xbf16>
    %c0_53 = arith.constant 0 : index
    %c0_54 = arith.constant 0 : index
    %117 = vector.load %arg18[%c0_53, %c0_54] : memref<32x32xbf16, #tpu.memory_space<vmem>>, vector<32x32xbf16>
    %cst_55 = arith.constant dense<0.000000e+00> : vector<128x32xf32>
    %118 = tpu.matmul %116, %117, %cst_55 {dimension_numbers = #tpu.dot_dimension_numbers<[1], [0], [0], [1], [0, 0, 1, 1], [], []>} : vector<128x32xbf16>, vector<32x32xbf16>, vector<128x32xf32> -> vector<128x32xf32>
    %c8_i32 = arith.constant 8 : i32
    %119 = arith.muli %arg0, %c8_i32 : i32
    %120 = tpu.iota {dimensions = array<i32: 0>} : vector<8x128xi32>
    %121 = vector.broadcast %119 : i32 to vector<8x128xi32>
    %122 = arith.addi %120, %121 : vector<8x128xi32>
    %c0_56 = arith.constant 0 : index
    %c0_57 = arith.constant 0 : index
    %123 = vector.load %arg2[%c0_56, %c0_57] : memref<1x128xi32, #tpu.memory_space<vmem>>, vector<1x128xi32>
    %124 = vector.broadcast %123 : vector<1x128xi32> to vector<8x128xi32>
    %125 = arith.cmpi eq, %122, %124 : vector<8x128xi32>
    %126 = arith.extui %125 : vector<8x128xi1> to vector<8x128xi32>
    %127 = arith.sitofp %126 : vector<8x128xi32> to vector<8x128xf32>
    %128 = arith.truncf %127 : vector<8x128xf32> to vector<8x128xbf16>
    %c0_58 = arith.constant 0 : index
    %c0_59 = arith.constant 0 : index
    %129 = vector.load %arg26[%c0_58, %c0_59] : memref<8x32xf32, #tpu.memory_space<vmem>>, vector<8x32xf32>
    %130 = arith.truncf %118 : vector<128x32xf32> to vector<128x32xbf16>
    %cst_60 = arith.constant dense<0.000000e+00> : vector<8x32xf32>
    %131 = tpu.matmul %128, %130, %cst_60 {dimension_numbers = #tpu.dot_dimension_numbers<[1], [0], [0], [1], [0, 0, 1, 1], [], []>} : vector<8x128xbf16>, vector<128x32xbf16>, vector<8x32xf32> -> vector<8x32xf32>
    %132 = arith.addf %129, %131 : vector<8x32xf32>
    %c0_61 = arith.constant 0 : index
    %c0_62 = arith.constant 0 : index
    %133 = vector.load %arg26[%c0_61, %c0_62] : memref<8x32xf32, #tpu.memory_space<vmem>>, vector<8x32xf32>
    tpu.vector_store %arg26[%c0_61, %c0_62], %132 {strides = array<i32>} : memref<8x32xf32, #tpu.memory_space<vmem>>, vector<8x32xf32>,
    %c0_i32_63 = arith.constant 0 : i32
    %134 = arith.cmpi eq, %arg1, %c0_i32_63 : i32
    %135 = arith.extui %134 : i1 to i32
    %c0_i32_64 = arith.constant 0 : i32
    %136 = arith.cmpi ne, %135, %c0_i32_64 : i32
    scf.if %136 {
      %c0_65 = arith.constant 0 : index
      %c0_66 = arith.constant 0 : index
      %137 = vector.load %arg26[%c0_65, %c0_66] : memref<8x32xf32, #tpu.memory_space<vmem>>, vector<8x32xf32>
      %c0_67 = arith.constant 0 : index
      %c0_68 = arith.constant 0 : index
      %138 = vector.load %arg20[%c0_67, %c0_68] : memref<1x32xf32, #tpu.memory_space<vmem>>, vector<1x32xf32>
      %c0_69 = arith.constant 0 : index
      %c0_70 = arith.constant 0 : index
      %139 = vector.load %arg21[%c0_69, %c0_70] : memref<1x32xf32, #tpu.memory_space<vmem>>, vector<1x32xf32>
      %cst_71 = arith.constant dense<0.000000e+00> : vector<8xf32>
      %140 = vector.multi_reduction <add>, %137, %cst_71 [1] : vector<8x32xf32> to vector<8xf32>
      %141 = vector.shape_cast %140 : vector<8xf32> to vector<8x1xf32>
      %cst_72 = arith.constant 3.200000e+01 : f32
      %142 = vector.broadcast %cst_72 : f32 to vector<8x1xf32>
      %143 = arith.divf %141, %142 : vector<8x1xf32>
      %144 = arith.mulf %137, %137 : vector<8x32xf32>
      %cst_73 = arith.constant dense<0.000000e+00> : vector<8xf32>
      %145 = vector.multi_reduction <add>, %144, %cst_73 [1] : vector<8x32xf32> to vector<8xf32>
      %146 = vector.shape_cast %145 : vector<8xf32> to vector<8x1xf32>
      %cst_74 = arith.constant 3.200000e+01 : f32
      %147 = vector.broadcast %cst_74 : f32 to vector<8x1xf32>
      %148 = arith.divf %146, %147 : vector<8x1xf32>
      %149 = arith.mulf %143, %143 : vector<8x1xf32>
      %150 = arith.subf %148, %149 : vector<8x1xf32>
      %cst_75 = arith.constant 0.000000e+00 : f32
      %151 = vector.broadcast %cst_75 : f32 to vector<8x1xf32>
      %152 = arith.maximumf %150, %151 : vector<8x1xf32>
      %153 = vector.broadcast %143 : vector<8x1xf32> to vector<8x32xf32>
      %154 = arith.subf %137, %153 : vector<8x32xf32>
      %cst_76 = arith.constant 9.99999974E-6 : f32
      %155 = vector.broadcast %cst_76 : f32 to vector<8x1xf32>
      %156 = arith.addf %152, %155 : vector<8x1xf32>
      %157 = math.rsqrt %156 : vector<8x1xf32>
      %158 = vector.broadcast %157 : vector<8x1xf32> to vector<8x32xf32>
      %159 = arith.mulf %154, %158 : vector<8x32xf32>
      %160 = vector.broadcast %138 : vector<1x32xf32> to vector<8x32xf32>
      %161 = arith.mulf %159, %160 : vector<8x32xf32>
      %162 = vector.broadcast %139 : vector<1x32xf32> to vector<8x32xf32>
      %163 = arith.addf %161, %162 : vector<8x32xf32>
      %cst_77 = arith.constant 0.000000e+00 : f32
      %164 = vector.broadcast %cst_77 : f32 to vector<8x32xf32>
      %165 = arith.maximumf %163, %164 : vector<8x32xf32>
      %166 = arith.truncf %165 : vector<8x32xf32> to vector<8x32xbf16>
      %c0_78 = arith.constant 0 : index
      %c0_79 = arith.constant 0 : index
      %167 = vector.load %arg22[%c0_78, %c0_79] : memref<32x32xbf16, #tpu.memory_space<vmem>>, vector<32x32xbf16>
      %cst_80 = arith.constant dense<0.000000e+00> : vector<8x32xf32>
      %168 = tpu.matmul %166, %167, %cst_80 {dimension_numbers = #tpu.dot_dimension_numbers<[1], [0], [0], [1], [0, 0, 1, 1], [], []>} : vector<8x32xbf16>, vector<32x32xbf16>, vector<8x32xf32> -> vector<8x32xf32>
      %c0_81 = arith.constant 0 : index
      %c0_82 = arith.constant 0 : index
      %169 = vector.load %arg23[%c0_81, %c0_82] : memref<1x32xf32, #tpu.memory_space<vmem>>, vector<1x32xf32>
      %c0_83 = arith.constant 0 : index
      %c0_84 = arith.constant 0 : index
      %170 = vector.load %arg24[%c0_83, %c0_84] : memref<1x32xf32, #tpu.memory_space<vmem>>, vector<1x32xf32>
      %cst_85 = arith.constant dense<0.000000e+00> : vector<8xf32>
      %171 = vector.multi_reduction <add>, %168, %cst_85 [1] : vector<8x32xf32> to vector<8xf32>
      %172 = vector.shape_cast %171 : vector<8xf32> to vector<8x1xf32>
      %cst_86 = arith.constant 3.200000e+01 : f32
      %173 = vector.broadcast %cst_86 : f32 to vector<8x1xf32>
      %174 = arith.divf %172, %173 : vector<8x1xf32>
      %175 = arith.mulf %168, %168 : vector<8x32xf32>
      %cst_87 = arith.constant dense<0.000000e+00> : vector<8xf32>
      %176 = vector.multi_reduction <add>, %175, %cst_87 [1] : vector<8x32xf32> to vector<8xf32>
      %177 = vector.shape_cast %176 : vector<8xf32> to vector<8x1xf32>
      %cst_88 = arith.constant 3.200000e+01 : f32
      %178 = vector.broadcast %cst_88 : f32 to vector<8x1xf32>
      %179 = arith.divf %177, %178 : vector<8x1xf32>
      %180 = arith.mulf %174, %174 : vector<8x1xf32>
      %181 = arith.subf %179, %180 : vector<8x1xf32>
      %cst_89 = arith.constant 0.000000e+00 : f32
      %182 = vector.broadcast %cst_89 : f32 to vector<8x1xf32>
      %183 = arith.maximumf %181, %182 : vector<8x1xf32>
      %184 = vector.broadcast %174 : vector<8x1xf32> to vector<8x32xf32>
      %185 = arith.subf %168, %184 : vector<8x32xf32>
      %cst_90 = arith.constant 9.99999974E-6 : f32
      %186 = vector.broadcast %cst_90 : f32 to vector<8x1xf32>
      %187 = arith.addf %183, %186 : vector<8x1xf32>
      %188 = math.rsqrt %187 : vector<8x1xf32>
      %189 = vector.broadcast %188 : vector<8x1xf32> to vector<8x32xf32>
      %190 = arith.mulf %185, %189 : vector<8x32xf32>
      %191 = vector.broadcast %169 : vector<1x32xf32> to vector<8x32xf32>
      %192 = arith.mulf %190, %191 : vector<8x32xf32>
      %193 = vector.broadcast %170 : vector<1x32xf32> to vector<8x32xf32>
      %194 = arith.addf %192, %193 : vector<8x32xf32>
      %c0_91 = arith.constant 0 : index
      %c0_92 = arith.constant 0 : index
      %195 = vector.load %arg6[%c0_91, %c0_92] : memref<8x32xf32, #tpu.memory_space<vmem>>, vector<8x32xf32>
      %196 = arith.addf %194, %195 : vector<8x32xf32>
      %c0_93 = arith.constant 0 : index
      %c0_94 = arith.constant 0 : index
      %197 = vector.load %arg25[%c0_93, %c0_94] : memref<8x32xf32, #tpu.memory_space<vmem>>, vector<8x32xf32>
      tpu.vector_store %arg25[%c0_93, %c0_94], %196 {strides = array<i32>} : memref<8x32xf32, #tpu.memory_space<vmem>>, vector<8x32xf32>,
    } else {
    }
    return
  }
  func.func @transform_0(%arg0: i32, %arg1: i32) -> (i32, i32) {
    %c0_i32 = arith.constant 0 : i32
    %c0_i32_0 = arith.constant 0 : i32
    return %c0_i32, %arg1 : i32, i32
  }
  func.func @transform_1(%arg0: i32, %arg1: i32) -> (i32, i32) {
    %c0_i32 = arith.constant 0 : i32
    %c0_i32_0 = arith.constant 0 : i32
    return %arg1, %c0_i32 : i32, i32
  }
  func.func @transform_2(%arg0: i32, %arg1: i32) -> (i32, i32) {
    %c0_i32 = arith.constant 0 : i32
    %c0_i32_0 = arith.constant 0 : i32
    return %arg1, %c0_i32 : i32, i32
  }
  func.func @transform_3(%arg0: i32, %arg1: i32) -> (i32, i32) {
    %c0_i32 = arith.constant 0 : i32
    %c0_i32_0 = arith.constant 0 : i32
    return %arg1, %c0_i32 : i32, i32
  }
  func.func @transform_4(%arg0: i32, %arg1: i32) -> (i32, i32) {
    %c0_i32 = arith.constant 0 : i32
    %c0_i32_0 = arith.constant 0 : i32
    return %arg0, %c0_i32 : i32, i32
  }
  func.func @transform_5(%arg0: i32, %arg1: i32) -> (i32, i32) {
    %c0_i32 = arith.constant 0 : i32
    %c0_i32_0 = arith.constant 0 : i32
    %c0_i32_1 = arith.constant 0 : i32
    return %c0_i32, %c0_i32_0 : i32, i32
  }
  func.func @transform_6(%arg0: i32, %arg1: i32) -> (i32, i32) {
    %c0_i32 = arith.constant 0 : i32
    %c0_i32_0 = arith.constant 0 : i32
    %c0_i32_1 = arith.constant 0 : i32
    return %c0_i32, %c0_i32_0 : i32, i32
  }
  func.func @transform_7(%arg0: i32, %arg1: i32) -> (i32, i32) {
    %c0_i32 = arith.constant 0 : i32
    %c0_i32_0 = arith.constant 0 : i32
    %c0_i32_1 = arith.constant 0 : i32
    return %c0_i32, %c0_i32_0 : i32, i32
  }
  func.func @transform_8(%arg0: i32, %arg1: i32) -> (i32, i32) {
    %c0_i32 = arith.constant 0 : i32
    %c0_i32_0 = arith.constant 0 : i32
    %c0_i32_1 = arith.constant 0 : i32
    return %c0_i32, %c0_i32_0 : i32, i32
  }
  func.func @transform_9(%arg0: i32, %arg1: i32) -> (i32, i32) {
    %c0_i32 = arith.constant 0 : i32
    %c0_i32_0 = arith.constant 0 : i32
    %c0_i32_1 = arith.constant 0 : i32
    return %c0_i32, %c0_i32_0 : i32, i32
  }
  func.func @transform_10(%arg0: i32, %arg1: i32) -> (i32, i32) {
    %c0_i32 = arith.constant 0 : i32
    %c0_i32_0 = arith.constant 0 : i32
    %c0_i32_1 = arith.constant 0 : i32
    return %c0_i32, %c0_i32_0 : i32, i32
  }
  func.func @transform_11(%arg0: i32, %arg1: i32) -> (i32, i32) {
    %c0_i32 = arith.constant 0 : i32
    %c0_i32_0 = arith.constant 0 : i32
    %c0_i32_1 = arith.constant 0 : i32
    return %c0_i32, %c0_i32_0 : i32, i32
  }
  func.func @transform_12(%arg0: i32, %arg1: i32) -> (i32, i32) {
    %c0_i32 = arith.constant 0 : i32
    %c0_i32_0 = arith.constant 0 : i32
    %c0_i32_1 = arith.constant 0 : i32
    return %c0_i32, %c0_i32_0 : i32, i32
  }
  func.func @transform_13(%arg0: i32, %arg1: i32) -> (i32, i32) {
    %c0_i32 = arith.constant 0 : i32
    %c0_i32_0 = arith.constant 0 : i32
    %c0_i32_1 = arith.constant 0 : i32
    return %c0_i32, %c0_i32_0 : i32, i32
  }
  func.func @transform_14(%arg0: i32, %arg1: i32) -> (i32, i32) {
    %c0_i32 = arith.constant 0 : i32
    %c0_i32_0 = arith.constant 0 : i32
    %c0_i32_1 = arith.constant 0 : i32
    return %c0_i32, %c0_i32_0 : i32, i32
  }
  func.func @transform_15(%arg0: i32, %arg1: i32) -> (i32, i32) {
    %c0_i32 = arith.constant 0 : i32
    %c0_i32_0 = arith.constant 0 : i32
    %c0_i32_1 = arith.constant 0 : i32
    return %c0_i32, %c0_i32_0 : i32, i32
  }
  func.func @transform_16(%arg0: i32, %arg1: i32) -> (i32, i32) {
    %c0_i32 = arith.constant 0 : i32
    %c0_i32_0 = arith.constant 0 : i32
    %c0_i32_1 = arith.constant 0 : i32
    return %c0_i32, %c0_i32_0 : i32, i32
  }
  func.func @transform_17(%arg0: i32, %arg1: i32) -> (i32, i32) {
    %c0_i32 = arith.constant 0 : i32
    %c0_i32_0 = arith.constant 0 : i32
    %c0_i32_1 = arith.constant 0 : i32
    return %c0_i32, %c0_i32_0 : i32, i32
  }
  func.func @transform_18(%arg0: i32, %arg1: i32) -> (i32, i32) {
    %c0_i32 = arith.constant 0 : i32
    %c0_i32_0 = arith.constant 0 : i32
    %c0_i32_1 = arith.constant 0 : i32
    return %c0_i32, %c0_i32_0 : i32, i32
  }
  func.func @transform_19(%arg0: i32, %arg1: i32) -> (i32, i32) {
    %c0_i32 = arith.constant 0 : i32
    %c0_i32_0 = arith.constant 0 : i32
    %c0_i32_1 = arith.constant 0 : i32
    return %c0_i32, %c0_i32_0 : i32, i32
  }
  func.func @transform_20(%arg0: i32, %arg1: i32) -> (i32, i32) {
    %c0_i32 = arith.constant 0 : i32
    %c0_i32_0 = arith.constant 0 : i32
    %c0_i32_1 = arith.constant 0 : i32
    return %c0_i32, %c0_i32_0 : i32, i32
  }
  func.func @transform_21(%arg0: i32, %arg1: i32) -> (i32, i32) {
    %c0_i32 = arith.constant 0 : i32
    %c0_i32_0 = arith.constant 0 : i32
    %c0_i32_1 = arith.constant 0 : i32
    return %c0_i32, %c0_i32_0 : i32, i32
  }
  func.func @transform_22(%arg0: i32, %arg1: i32) -> (i32, i32) {
    %c0_i32 = arith.constant 0 : i32
    %c0_i32_0 = arith.constant 0 : i32
    %c0_i32_1 = arith.constant 0 : i32
    return %c0_i32, %c0_i32_0 : i32, i32
  }
  func.func @transform_23(%arg0: i32, %arg1: i32) -> (i32, i32) {
    %c0_i32 = arith.constant 0 : i32
    %c0_i32_0 = arith.constant 0 : i32
    return %arg0, %c0_i32 : i32, i32
  }
}

</mosaic_0001>

<bundles_post_ra>
// kernel: tpu_custom_call.1
= control target key start
LH: loop header
LB: loop body
LE: loop exit
PB: predicated region body
PF: predicated region fallthrough
CT: control target
= control target key end

     0   :  { %s4685_s0 = inlined_call_operand.vmem [shape: s32[1,128], index: 0, kind: input, shape index: {}]   ;;  %s4686_s1 = inlined_call_operand.vmem [shape: f32[128,2], index: 1, kind: input, shape index: {}]   ;;  %s4687_s2 = inlined_call_operand.vmem [shape: bf16[128,32], index: 2, kind: input, shape index: {}]   ;;  %s4688_s3 = inlined_call_operand.vmem [shape: bf16[128,32], index: 3, kind: input, shape index: {}]   ;;  %s4689_s4 = inlined_call_operand.vmem [shape: f32[8,32], index: 4, kind: input, shape index: {}]   ;;  %s4690_s5 = inlined_call_operand.vmem [shape: f32[2,32], index: 5, kind: input, shape index: {}]   ;;  %s4691_s6 = inlined_call_operand.vmem [shape: f32[1,32], index: 6, kind: input, shape index: {}]   ;;  %s4692_s7 = inlined_call_operand.vmem [shape: bf16[32,32], index: 7, kind: input, shape index: {}]   ;;  %s4693_s8 = inlined_call_operand.vmem [shape: f32[1,32], index: 8, kind: input, shape index: {}]   ;;  %s4694_s9 = inlined_call_operand.vmem [shape: f32[1,32], index: 9, kind: input, shape index: {}]   ;;  %s4695_s10 = inlined_call_operand.vmem [shape: bf16[32,32], index: 10, kind: input, shape index: {}]   ;;  %s4696_s11 = inlined_call_operand.vmem [shape: f32[1,32], index: 11, kind: input, shape index: {}]   ;;  %s4697_s12 = inlined_call_operand.vmem [shape: f32[1,32], index: 12, kind: input, shape index: {}]   ;;  %s4698_s13 = inlined_call_operand.vmem [shape: bf16[96,32], index: 13, kind: input, shape index: {}]   ;;  %s4699_s14 = inlined_call_operand.vmem [shape: f32[1,32], index: 14, kind: input, shape index: {}]   ;;  %s4700_s15 = inlined_call_operand.vmem [shape: f32[1,32], index: 15, kind: input, shape index: {}]   ;;  %s4701_s16 = inlined_call_operand.vmem [shape: bf16[32,32], index: 16, kind: input, shape index: {}]   ;;  %s4702_s17 = inlined_call_operand.vmem [shape: bf16[32,32], index: 17, kind: input, shape index: {}]   ;;  %s4703_s18 = inlined_call_operand.vmem [shape: f32[1,32], index: 18, kind: input, shape index: {}]   ;;  %s4704_s19 = inlined_call_operand.vmem [shape: f32[1,32], index: 19, kind: input, shape index: {}]   ;;  %s4705_s20 = inlined_call_operand.vmem [shape: bf16[32,32], index: 20, kind: input, shape index: {}]   ;;  %s4706_s21 = inlined_call_operand.vmem [shape: f32[1,32], index: 21, kind: input, shape index: {}]   ;;  %s4707_s22 = inlined_call_operand.vmem [shape: f32[1,32], index: 22, kind: input, shape index: {}]   ;;  %s4708_s23 = inlined_call_operand.hbm [shape: f32[8,32], index: 23, kind: output, shape index: {}]  }
   0x1   :  { %4721 = sst [smem:[#allocation12_spill]] %s4685_s0 }
   0x2   :  { %4722 = sst [smem:[#allocation13_spill]] %s4686_s1 }
   0x3   :  { %4723 = sst [smem:[#allocation14_spill]] %s4687_s2 }
   0x4   :  { %4724 = sst [smem:[#allocation15_spill]] %s4688_s3 }
   0x5   :  { %4725 = sst [smem:[#allocation16_spill]] %s4689_s4 }
   0x6   :  { %4726 = sst [smem:[#allocation17_spill]] %s4690_s5 }
   0x7   :  { %4727 = sst [smem:[#allocation18_spill]] %s4691_s6 }
   0x8   :  { %4728 = sst [smem:[#allocation19_spill]] %s4692_s7 }
   0x9   :  { %s4729_s24 = sld [smem:[#allocation13_spill]]  ;;  %v2710_v2 = vld [vmem:[%s4695_s10 + $0x8] sm:$0xff]  ;;  %v3010_v3 = vmov 1   ;;  %v3011_v4 = vmov 0   ;;  %v2709_v5 = vld [vmem:[%s4695_s10] sm:$0xff] }
   0xa   :  { %2768 = vset.pattern.permute.xlu1 %v3010_v3  ;;  %2769 = vset.pattern.permute.xlu2 %v3011_v4  ;;  %s4730_s4 = sld [smem:[#allocation14_spill]] }
   0xb   :  { %2767 = vset.pattern.permute.xlu0 %v3011_v4  ;;  %1027 = vmatpush.bf16.msra.mxu2 %v2710_v2 }
   0xf   :  { %v118_v0 = vld [vmem:[%s4729_s24 + $0x10] sm:$0xff]  ;;  %v116_v1 = vld [vmem:[%s4729_s24] sm:$0xff]  ;;  %v119_v6 = vld [vmem:[%s4729_s24 + $0x18] sm:$0xff]  ;;  %1028 = vmatpush.bf16.msra.mxu2 %v2709_v5 }
  0x10   :  { %145 = vperm.xlu2 %2769, %v118_v0   ;;  %232 = vperm.xlu1 %2768, %v116_v1   ;;  %v117_v7 = vld [vmem:[%s4729_s24 + $0x8] sm:$0xff]  ;;  %v2701_v8 = vld [vmem:[%s4730_s4] sm:$0xff] }
  0x11   :  { %135 = vperm.xlu0 %2767, %v116_v1  }
  0x12   :  { %28 = vsyncpa [#allocation4], 0  ;;  %vm98_vm0 = vcmask 261120   ;;  %v120_v9 = vld [vmem:[%s4729_s24 + $0x20] sm:$0xff]  ;;  %v125_v10 = vld [vmem:[%s4729_s24 + $0x48] sm:$0xff]  ;;  %s4731_s27 = sld [smem:[#allocation19_spill]] }
  0x13   :  { %2629 = vmatmul.msk.bf16.vlgmr.msra.gmra.mxu2 %vm98_vm0, %v2701_v8  ;;  %v2702_v11 = vld [vmem:[%s4730_s4 + $0x8] sm:$0xff]  ;;  %v122_v13 = vld [vmem:[%s4729_s24 + $0x30] sm:$0xff]  ;;  %v123_v14 = vld [vmem:[%s4729_s24 + $0x38] sm:$0xff]  ;;  %s4732_s10 = sld [smem:[#allocation17_spill]]  ;;  %s3012_s7 = smov 64  }
  0x14   :  { %v121_v12 = vld [vmem:[%s4729_s24 + $0x28] sm:$0xff]  ;;  %v2703_v15 = vld [vmem:[%s4730_s4 + $0x10] sm:$0xff]  ;;  %v124_v16 = vld [vmem:[%s4729_s24 + $0x40] sm:$0xff]  ;;  %s4733_s26 = sld [smem:[#allocation18_spill]]  ;;  %s3014_s25 = smov 32  }
  0x15   :  { %v126_v17 = vld [vmem:[%s4729_s24 + $0x50] sm:$0xff]  ;;  %v2704_v18 = vld [vmem:[%s4730_s4 + $0x18] sm:$0xff]  ;;  %v129_v19 = vld [vmem:[%s4729_s24 + $0x68] sm:$0xff]  ;;  %s3016_s2 = smov [#allocation3]  }
  0x16   :  { %v127_v20 = vld [vmem:[%s4729_s24 + $0x58] sm:$0xff]  ;;  %v130_v21 = vld [vmem:[%s4729_s24 + $0x70] sm:$0xff]  ;;  %v128_v22 = vld [vmem:[%s4729_s24 + $0x60] sm:$0xff]  ;;  %s2553_s6 = sshll.u32 %s3016_s2, 4  ;;  %s2554_s6 = int_to_ptr.vmem [resolvable:$true] %s2553_s6 }
  0x17   :  { %v2705_v23 = vld [vmem:[%s4730_s4 + $0x20] sm:$0xff]  ;;  %v2706_v24 = vld [vmem:[%s4730_s4 + $0x28] sm:$0xff]  ;;  %v131_v25 = vld [vmem:[%s4729_s24 + $0x78] sm:$0xff] }
  0x18   :  { %150 = vperm.xlu2 %2769, %v119_v6   ;;  %236 = vperm.xlu1 %2768, %v117_v7   ;;  %v2700_v26 = vld [vmem:[%s4731_s27 + $0x8] sm:$0xff]  ;;  %v2699_v27 = vld [vmem:[%s4731_s27] sm:$0xff]  ;;  %v2707_v28 = vld [vmem:[%s4730_s4 + $0x30] sm:$0xff]  ;;  %s4734_s27 = sld [smem:[#allocation15_spill]] }
  0x19   :  { %140 = vperm.xlu0 %2767, %v117_v7   ;;  %419 = vmatpush.bf16.msra.mxu1 %v2700_v26  ;;  %v3244_v29 = vld [vmem:[%s4732_s10] ss:$0 sm:$0xff]  ;;  %v3249_v30 = vld [vmem:[%s4732_s10 + $0x1] ss:$0 sm:$0xff] }
  0x1a   :  { %v3256_v36 = vld [vmem:[%s4733_s26] ss:$0 sm:$0xff] }
  0x1d   :  { %420 = vmatpush.bf16.msra.mxu1 %v2699_v27 }
  0x20   :  { %155 = vperm.xlu2 %2769, %v120_v9   ;;  %244 = vperm.xlu1 %2768, %v119_v6  }
  0x21   :  { %180 = vperm.xlu0 %2767, %v125_v10  }
  0x23   :  { %2630 = vmatmul.msk.bf16.gmra.mxu2 %vm98_vm0, %v2702_v11 }
  0x28   :  { %2771 = vset.pattern.permute.xlu2 %v3010_v3  ;;  %2770 = vset.pattern.permute.xlu1 %v3011_v4 }
  0x29   :  { %2774 = vset.pattern.permute.xlu0 %v3010_v3  ;;  %248 = vperm.xlu2 %2771, %v120_v9  }
  0x2a   :  { %160 = vperm.xlu1 %2770, %v121_v12   ;;  %240 = vperm.xlu0 %2774, %v118_v0  }
  0x31   :  { %2772 = vset.pattern.permute.xlu2 %v3011_v4 }
  0x32   :  { %165 = vperm.xlu1 %2770, %v122_v13   ;;  %252 = vperm.xlu0 %2774, %v121_v12  }
  0x33   :  { %170 = vperm.xlu2 %2772, %v123_v14   ;;  %2631 = vmatmul.msk.bf16.gmra.mxu2 %vm98_vm0, %v2703_v15 }
  0x3a   :  { %2773 = vset.pattern.permute.xlu1 %v3010_v3  ;;  %256 = vperm.xlu0 %2774, %v122_v13  }
  0x3b   :  { %175 = vperm.xlu2 %2772, %v124_v16   ;;  %260 = vperm.xlu1 %2773, %v123_v14  }
  0x42   :  { %272 = vperm.xlu0 %2774, %v126_v17  }
  0x43   :  { %2775 = vset.pattern.permute.xlu2 %v3010_v3  ;;  %264 = vperm.xlu1 %2773, %v124_v16  }
  0x44   :  { %268 = vperm.xlu2 %2775, %v125_v10   ;;  %2632 = vmatmul.msk.bf16.gmra.mxu2 %vm98_vm0, %v2704_v18 }
  0x4a   :  { %284 = vperm.xlu0 %2774, %v129_v19  }
  0x4b   :  { %2776 = vset.pattern.permute.xlu1 %v3011_v4 }
  0x4c   :  { %185 = vperm.xlu1 %2776, %v126_v17   ;;  %2777 = vset.pattern.permute.xlu2 %v3011_v4 }
  0x4d   :  { %190 = vperm.xlu2 %2777, %v127_v20  }
  0x52   :  { %288 = vperm.xlu0 %2774, %v130_v21  }
  0x54   :  { %2778 = vset.pattern.permute.xlu1 %v3010_v3  ;;  %2633 = vmatmul.msk.bf16.gmra.mxu2 %vm98_vm0, %v2705_v23 }
  0x55   :  { %276 = vperm.xlu1 %2778, %v127_v20   ;;  %195 = vperm.xlu2 %2777, %v128_v22  }
  0x5d   :  { %2779 = vset.pattern.permute.xlu1 %v3011_v4  ;;  %2780 = vset.pattern.permute.xlu2 %v3010_v3 }
  0x5e   :  { %200 = vperm.xlu1 %2779, %v129_v19   ;;  %280 = vperm.xlu2 %2780, %v128_v22  }
  0x64   :  { %2634 = vmatmul.msk.bf16.gmra.mxu2 %vm98_vm0, %v2706_v24 }
  0x66   :  { %205 = vperm.xlu1 %2779, %v130_v21   ;;  %2781 = vset.pattern.permute.xlu2 %v3011_v4 }
  0x67   :  { %210 = vperm.xlu2 %2781, %v131_v25  }
  0x6a   :  { %v146_v35 = vpop.permute.xlu2 %145 }
  0x6b   :  { %v216_v57 = vmul.f32 %v3244_v29, %v146_v35 }
  0x6e   :  { %2782 = vset.pattern.permute.xlu1 %v3010_v3 }
  0x6f   :  { %292 = vperm.xlu1 %2782, %v131_v25  }
  0x72   :  { %v151_v45 = vpop.permute.xlu2 %150 }
  0x73   :  { %v217_v51 = vmul.f32 %v3244_v29, %v151_v45 }
  0x74   :  { %2635 = vmatmul.msk.bf16.gmra.mxu2 %vm98_vm0, %v2707_v28 }
  0x7a   :  { %v156_v53 = vpop.permute.xlu2 %155 }
  0x7b   :  { %v218_v12 = vmul.f32 %v3244_v29, %v156_v53 }
  0x82   :  { %v233_v31 = vpop.permute.xlu1 %232 }
  0x83   :  { %v136_v32 = vpop.permute.xlu0 %135  ;;  %v296_v33 = vmul.f32 %v3249_v30, %v233_v31  ;;  %v249_v10 = vpop.permute.xlu2 %248 }
  0x84   :  { %v214_v34 = vmul.f32 %v3244_v29, %v136_v32  ;;  %v300_v13 = vmul.f32 %v3249_v30, %v249_v10 }
  0x86   :  { %v312_v37 = vadd.f32 %v296_v33, %v214_v34  ;;  %v316_v17 = vadd.f32 %v300_v13, %v218_v12 }
  0x88   :  { %v332_v42 = vadd.f32 %v3256_v36, %v312_v37  ;;  %v336_v22 = vadd.f32 %v3256_v36, %v316_v17 }
  0x8a   :  { %v237_v38 = vpop.permute.xlu1 %236  ;;  %v348_v46 = vmax.f32 %v332_v42, 0.0  ;;  %v352_v28 = vmax.f32 %v336_v22, 0.0 }
  0x8b   :  { %v141_v39 = vpop.permute.xlu0 %140  ;;  %v297_v40 = vmul.f32 %v3249_v30, %v237_v38 }
  0x8c   :  { %v215_v41 = vmul.f32 %v3244_v29, %v141_v39 }
  0x8d   :  { %v171_v24 = vpop.permute.xlu2 %170 }
  0x8e   :  { %v313_v43 = vadd.f32 %v297_v40, %v215_v41  ;;  %v221_v31 = vmul.f32 %v3244_v29, %v171_v24 }
  0x90   :  { %v333_v44 = vadd.f32 %v3256_v36, %v313_v43 }
  0x92   :  { %v349_v47 = vmax.f32 %v333_v44, 0.0  ;;  %v245_v50 = vpop.permute.xlu1 %244 }
  0x93   :  { %v3262_v48 = vpop.permute.xlu0 %180  ;;  %v299_v52 = vmul.f32 %v3249_v30, %v245_v50 }
  0x94   :  { %v364_v49 = vpack.c.bf16 %v349_v47, %v348_v46 }
  0x95   :  { %v315_v54 = vadd.f32 %v299_v52, %v217_v51  ;;  %v176_v43 = vpop.permute.xlu2 %175  ;;  %v2722_v51 = vld [vmem:[%s4734_s27] sm:$0xff]  }
  0x96   :  { %2581 = vmatmul.msk.bf16.vlgmr.msra.gmra.mxu1 %vm98_vm0, %v364_v49  ;;  %v3267_v56 = vpop.f32.mrf.mxu2 }
  0x97   :  { %v1072_v59 = vsel %vm98_vm0, %v3267_v56, 0.0  ;;  %v1136_v60 = vmul.f32 %v3267_v56, %v3267_v56  ;;  %v335_v62 = vadd.f32 %v3256_v36, %v315_v54 }
  0x98   :  { %1073 = vadd.xlane.f32.xlu2 %v1072_v59 }
  0x99   :  { %v1152_v0 = vsel %vm98_vm0, %v1136_v60, 0.0  ;;  %v351_v2 = vmax.f32 %v335_v62, 0.0 }
  0x9a   :  { %1153 = vadd.xlane.f32.xlu1 %v1152_v0 }
  0x9c   :  { %v241_v55 = vpop.permute.xlu0 %240  ;;  %v161_v61 = vpop.permute.xlu1 %160 }
  0x9d   :  { %v298_v58 = vmul.f32 %v3249_v30, %v241_v55  ;;  %v219_v6 = vmul.f32 %v3244_v29, %v161_v61  ;;  %v2723_v55 = vunpack.c.l.bf16 %v2722_v51 }
  0x9e   :  { %v3278_v5 = vpop.f32.mrf.mxu2  ;;  %v269_v59 = vpop.permute.xlu2 %268 }
  0x9f   :  { %v314_v63 = vadd.f32 %v298_v58, %v216_v57  ;;  %v1075_v8 = vsel %vm98_vm0, %v3278_v5, 0.0  ;;  %v1137_v11 = vmul.f32 %v3278_v5, %v3278_v5  ;;  %v2724_v57 = vunpack.c.h.bf16 %v2722_v51  ;;  %v2708_v51 = vld [vmem:[%s4730_s4 + $0x38] sm:$0xff]  ;;  %s4765_s4 = sld [smem:[#allocation16_spill]] }
  0xa0   :  { %1076 = vadd.xlane.f32.xlu0 %v1075_v8  ;;  %v222_v58 = vmul.f32 %v3244_v29, %v176_v43  ;;  %2636 = vmatmul.msk.bf16.gmra.mxu2 %vm98_vm0, %v2708_v51 }
  0xa1   :  { %v334_v1 = vadd.f32 %v3256_v36, %v314_v63  ;;  %v1155_v15 = vsel %vm98_vm0, %v1137_v11, 0.0  ;;  %v2783_v63 = vpack.i.bf16 %v2724_v57, %v2723_v55 }
  0xa2   :  { %1156 = vadd.xlane.f32.xlu2 %v1155_v15 }
  0xa3   :  { %v350_v3 = vmax.f32 %v334_v1, 0.0  ;;  %v305_v1 = vmul.f32 %v3249_v30, %v269_v59 }
  0xa4   :  { %v253_v4 = vpop.permute.xlu0 %252  ;;  %v166_v14 = vpop.permute.xlu1 %165 }
  0xa5   :  { %v301_v7 = vmul.f32 %v3249_v30, %v253_v4  ;;  %v365_v9 = vpack.c.bf16 %v351_v2, %v350_v3  ;;  %v220_v32 = vmul.f32 %v3244_v29, %v166_v14  ;;  %v223_v4 = vmul.f32 %v3244_v29, %v3262_v48 }
  0xa6   :  { %v3290_v18 = vpop.f32.mrf.mxu2 }
  0xa7   :  { %2582 = vmatmul.msk.bf16.gmra.mxu1 %vm98_vm0, %v365_v9  ;;  %v317_v16 = vadd.f32 %v301_v7, %v219_v6  ;;  %v1138_v20 = vmul.f32 %v3290_v18, %v3290_v18  ;;  %v1078_v21 = vsel %vm98_vm0, %v3290_v18, 0.0  ;;  %v321_v7 = vadd.f32 %v305_v1, %v223_v4  ;;  %v191_v11 = vpop.permute.xlu2 %190 }
  0xa8   :  { %v225_v48 = vmul.f32 %v3244_v29, %v191_v11 }
  0xa9   :  { %v337_v19 = vadd.f32 %v3256_v36, %v317_v16  ;;  %v1158_v23 = vsel %vm98_vm0, %v1138_v20, 0.0  ;;  %v341_v12 = vadd.f32 %v3256_v36, %v321_v7 }
  0xaa   :  { %1159 = vadd.xlane.f32.xlu1 %v1158_v23  ;;  %1079 = vadd.xlane.f32.xlu2 %v1078_v21 }
  0xab   :  { %v353_v25 = vmax.f32 %v337_v19, 0.0  ;;  %v357_v15 = vmax.f32 %v341_v12, 0.0 }
  0xac   :  { %v257_v26 = vpop.permute.xlu0 %256 }
  0xad   :  { %v261_v27 = vpop.permute.xlu1 %260  ;;  %v302_v33 = vmul.f32 %v3249_v30, %v257_v26  ;;  %v366_v38 = vpack.c.bf16 %v353_v25, %v352_v28 }
  0xae   :  { %v3302_v34 = vpop.f32.mrf.mxu2  ;;  %v303_v35 = vmul.f32 %v3249_v30, %v261_v27 }
  0xaf   :  { %v1081_v37 = vsel %vm98_vm0, %v3302_v34, 0.0  ;;  %v1139_v39 = vmul.f32 %v3302_v34, %v3302_v34  ;;  %v318_v41 = vadd.f32 %v302_v33, %v220_v32  ;;  %v196_v25 = vpop.permute.xlu2 %195 }
  0xb0   :  { %1082 = vadd.xlane.f32.xlu0 %v1081_v37  ;;  %v319_v42 = vadd.f32 %v303_v35, %v221_v31  ;;  %v226_v43 = vmul.f32 %v3244_v29, %v196_v25 }
  0xb1   :  { %v1161_v40 = vsel %vm98_vm0, %v1139_v39, 0.0  ;;  %v338_v45 = vadd.f32 %v3256_v36, %v318_v41 }
  0xb2   :  { %1162 = vadd.xlane.f32.xlu2 %v1161_v40  ;;  %v339_v46 = vadd.f32 %v3256_v36, %v319_v42 }
  0xb3   :  { %v354_v53 = vmax.f32 %v338_v45, 0.0 }
  0xb4   :  { %v355_v54 = vmax.f32 %v339_v46, 0.0  ;;  %v273_v22 = vpop.permute.xlu0 %272 }
  0xb5   :  { %v265_v50 = vpop.permute.xlu1 %264  ;;  %v306_v26 = vmul.f32 %v3249_v30, %v273_v22 }
  0xb6   :  { %v3311_v44 = vpop.f32.mrf.mxu2  ;;  %v304_v61 = vmul.f32 %v3249_v30, %v265_v50  ;;  %v367_v62 = vpack.c.bf16 %v355_v54, %v354_v53 }
  0xb7   :  { %2583 = vmatmul.msk.bf16.gmra.mxu1 %vm98_vm0, %v366_v38  ;;  %v1084_v47 = vsel %vm98_vm0, %v3311_v44, 0.0  ;;  %v1140_v49 = vmul.f32 %v3311_v44, %v3311_v44 }
  0xb8   :  { %1085 = vadd.xlane.f32.xlu0 %v1084_v47  ;;  %v320_v6 = vadd.f32 %v304_v61, %v222_v58  ;;  %v281_v40 = vpop.permute.xlu2 %280 }
  0xb9   :  { %v1164_v52 = vsel %vm98_vm0, %v1140_v49, 0.0  ;;  %v308_v46 = vmul.f32 %v3249_v30, %v281_v40 }
  0xba   :  { %1165 = vadd.xlane.f32.xlu2 %v1164_v52  ;;  %v340_v9 = vadd.f32 %v3256_v36, %v320_v6 }
  0xbb   :  { %v324_v54 = vadd.f32 %v308_v46, %v226_v43 }
  0xbc   :  { %v356_v13 = vmax.f32 %v340_v9, 0.0  ;;  %v285_v42 = vpop.permute.xlu0 %284 }
  0xbd   :  { %v309_v52 = vmul.f32 %v3249_v30, %v285_v42  ;;  %v344_v58 = vadd.f32 %v3256_v36, %v324_v54 }
  0xbe   :  { %v3324_v60 = vpop.f32.mrf.mxu2  ;;  %v186_v3 = vpop.permute.xlu1 %185  ;;  %v368_v20 = vpack.c.bf16 %v357_v15, %v356_v13 }
  0xbf   :  { %v1141_v0 = vmul.f32 %v3324_v60, %v3324_v60  ;;  %v224_v23 = vmul.f32 %v3244_v29, %v186_v3  ;;  %v1087_v4 = vsel %vm98_vm0, %v3324_v60, 0.0 }
  0xc1   :  { %v1167_v2 = vsel %vm98_vm0, %v1141_v0, 0.0  ;;  %v322_v28 = vadd.f32 %v306_v26, %v224_v23  ;;  %v360_v0 = vmax.f32 %v344_v58, 0.0 }
  0xc2   :  { %1168 = vadd.xlane.f32.xlu0 %v1167_v2  ;;  %v211_v2 = vpop.permute.xlu2 %210 }
  0xc3   :  { %2784 = vrot.lane.b32.xlu1 %v2783_v63, %s3012_s7  ;;  %v342_v37 = vadd.f32 %v3256_v36, %v322_v28  ;;  %v229_v7 = vmul.f32 %v3244_v29, %v211_v2 }
  0xc4   :  { %v289_v12 = vpop.permute.xlu0 %288 }
  0xc5   :  { %v358_v41 = vmax.f32 %v342_v37, 0.0 }
  0xc7   :  { %2584 = vmatmul.msk.bf16.gmra.mxu1 %vm98_vm0, %v367_v62  ;;  %v3335_v8 = vpop.f32.mrf.mxu2  ;;  %v277_v14 = vpop.permute.xlu1 %276 }
  0xc8   :  { %v1090_v10 = vsel %vm98_vm0, %v3335_v8, 0.0  ;;  %v307_v17 = vmul.f32 %v3249_v30, %v277_v14  ;;  %v1142_v13 = vmul.f32 %v3335_v8, %v3335_v8 }
  0xc9   :  { %1091 = vadd.xlane.f32.xlu2 %v1090_v10 }
  0xca   :  { %v323_v27 = vadd.f32 %v307_v17, %v225_v48  ;;  %v310_v48 = vmul.f32 %v3249_v30, %v289_v12 }
  0xcc   :  { %v343_v32 = vadd.f32 %v3256_v36, %v323_v27 }
  0xce   :  { %v359_v39 = vmax.f32 %v343_v32, 0.0 }
  0xcf   :  { %v3342_v16 = vpop.f32.mrf.mxu2 }
  0xd0   :  { %v1093_v19 = vsel %vm98_vm0, %v3342_v16, 0.0  ;;  %v1143_v21 = vmul.f32 %v3342_v16, %v3342_v16  ;;  %v201_v35 = vpop.permute.xlu1 %200  ;;  %v369_v50 = vpack.c.bf16 %v359_v39, %v358_v41 }
  0xd1   :  { %1094 = vadd.xlane.f32.xlu0 %v1093_v19  ;;  %v227_v47 = vmul.f32 %v3244_v29, %v201_v35  ;;  %v2753_v19 = vld [vmem:[%s4734_s27 + $0x8] sm:$0xff]  }
  0xd2   :  { %v1173_v24 = vsel %vm98_vm0, %v1143_v21, 0.0  ;;  %v3013_v21 = vmov 32.0   ;;  %v2727_v23 = vunpack.c.l.bf16 %v2753_v19 }
  0xd3   :  { %1174 = vadd.xlane.f32.xlu2 %v1173_v24  ;;  %v325_v55 = vadd.f32 %v309_v52, %v227_v47  ;;  %2877 = vrcp.f32 %v3013_v21  ;;  %v2728_v24 = vunpack.c.h.bf16 %v2753_v19 }
  0xd5   :  { %v345_v59 = vadd.f32 %v3256_v36, %v325_v55  ;;  %v2788_v27 = vpack.i.bf16 %v2728_v24, %v2727_v23 }
  0xd7   :  { %2585 = vmatmul.msk.bf16.gmra.mxu1 %vm98_vm0, %v368_v20  ;;  %v3353_v31 = vpop.f32.mrf.mxu2  ;;  %v361_v1 = vmax.f32 %v345_v59, 0.0  ;;  %v1170_v20 = vsel %vm98_vm0, %v1142_v13, 0.0 }
  0xd8   :  { %v1144_v33 = vmul.f32 %v3353_v31, %v3353_v31  ;;  %v206_v53 = vpop.permute.xlu1 %205  ;;  %v1096_v32 = vsel %vm98_vm0, %v3353_v31, 0.0 }
  0xd9   :  { %v370_v11 = vpack.c.bf16 %v361_v1, %v360_v0  ;;  %v228_v14 = vmul.f32 %v3244_v29, %v206_v53  ;;  %v2878_v26 = vpop.eup %2877 }
  0xda   :  { %v1176_v38 = vsel %vm98_vm0, %v1144_v33, 0.0  ;;  %v513_v35 = vmul.f32 32.0, %v2878_v26  ;;  %vm517_vm1 = vweird.f32 %v2878_v26 }
  0xdb   :  { %1177 = vadd.xlane.f32.xlu0 %v1176_v38  ;;  %v326_v22 = vadd.f32 %v310_v48, %v228_v14 }
  0xdc   :  { %v514_v39 = vsub.f32 1.0, %v513_v35 }
  0xde   :  { %v515_v40 = vmul.f32 %v2878_v26, %v514_v39 }
  0xdf   :  { %v3361_v45 = vpop.f32.mrf.mxu2 }
  0xe0   :  { %v1099_v49 = vsel %vm98_vm0, %v3361_v45, 0.0  ;;  %v1145_v38 = vmul.f32 %v3361_v45, %v3361_v45  ;;  %v516_v42 = vadd.f32 %v2878_v26, %v515_v40 }
  0xe1   :  { %1100 = vadd.xlane.f32.xlu2 %v1099_v49  ;;  %v293_v3 = vpop.permute.xlu1 %292 }
  0xe2   :  { %v311_v9 = vmul.f32 %v3249_v30, %v293_v3  ;;  %v346_v30 = vadd.f32 %v3256_v36, %v326_v22  ;;  %v3417_v47 = vsel %vm517_vm1, %v2878_v26, %v516_v42 }
  0xe4   :  { %v327_v17 = vadd.f32 %v311_v9, %v229_v7  ;;  %v362_v33 = vmax.f32 %v346_v30, 0.0 }
  0xe6   :  { %v347_v25 = vadd.f32 %v3256_v36, %v327_v17  ;;  %v1179_v36 = vsel %vm98_vm0, %v1145_v38, 0.0 }
  0xe7   :  { %2586 = vmatmul.msk.bf16.gmra.mxu1 %vm98_vm0, %v369_v50  ;;  %v3373_v57 = vpop.f32.mrf.mxu2 }
  0xe8   :  { %v1102_v61 = vsel %vm98_vm0, %v3373_v57, 0.0  ;;  %v1146_v62 = vmul.f32 %v3373_v57, %v3373_v57  ;;  %v363_v28 = vmax.f32 %v347_v25, 0.0 }
  0xe9   :  { %1103 = vadd.xlane.f32.xlu2 %v1102_v61 }
  0xea   :  { %v1182_v63 = vsel %vm98_vm0, %v1146_v62, 0.0  ;;  %v371_v37 = vpack.c.bf16 %v363_v28, %v362_v33 }
  0xeb   :  { %1183 = vadd.xlane.f32.xlu0 %v1182_v63 }
  0xed   :  { %1088 = vadd.xlane.f32.xlu1 %v1087_v4 }
  0xef   :  { %v3384_v6 = vpop.f32.mrf.mxu2 }
  0xf0   :  { %v1105_v10 = vsel %vm98_vm0, %v3384_v6, 0.0  ;;  %v1147_v15 = vmul.f32 %v3384_v6, %v3384_v6 }
  0xf1   :  { %1106 = vadd.xlane.f32.xlu2 %v1105_v10 }
  0xf2   :  { %v1185_v29 = vsel %vm98_vm0, %v1147_v15, 0.0 }
  0xf5   :  { %1171 = vadd.xlane.f32.xlu1 %v1170_v20 }
  0xf7   :  { %2587 = vmatmul.msk.bf16.gmra.mxu1 %vm98_vm0, %v370_v11  ;;  %v3411_v41 = vpop.f32.mrf.mxu2 }
  0xf8   :  { %4735 = vst [vmem:[#allocation6_spill] sm:$0xff] %v3411_v41  ;;  %v1108_v43 = vsel %vm98_vm0, %v3411_v41, 0.0 }
  0xf9   :  { %1186 = vadd.xlane.f32.xlu2 %v1185_v29 }
  0xfd   :  { %1097 = vadd.xlane.f32.xlu1 %v1096_v32 }
  0xff   :  { %2789 = vrot.lane.b32.xlu0 %v2788_v27, %s3012_s7  ;;  %v3419_v50 = vpop.f32.mrf.mxu2 }
 0x100   :  { %4736 = vst [vmem:[#allocation7_spill] sm:$0xff] %v3419_v50  ;;  %v1111_v53 = vsel %vm98_vm0, %v3419_v50, 0.0 }
 0x105   :  { %1180 = vadd.xlane.f32.xlu1 %v1179_v36 }
 0x107   :  { %2588 = vmatmul.msk.bf16.gmra.mxu1 %vm98_vm0, %v371_v37 }
 0x10b   :  { %v1074_v49 = vpop.xlane.xlu2 %1073 }
 0x10c   :  { %v3422_v51 = vmul.f32 %v1074_v49, %v3417_v47 }
 0x10d   :  { %1109 = vadd.xlane.f32.xlu1 %v1108_v43  ;;  %v1154_v52 = vpop.xlane.xlu1 %1153 }
 0x10e   :  { %v1216_v55 = vmul.f32 %v3422_v51, %v3422_v51  ;;  %v1200_v58 = vmul.f32 %v1154_v52, %v3417_v47 }
 0x110   :  { %v1232_v2 = vsub.f32 %v1200_v58, %v1216_v55 }
 0x112   :  { %v1248_v7 = vmax.f32 %v1232_v2, 0.0 }
 0x113   :  { %v3415_v46 = vpop.f32.mrf.mxu1  ;;  %v1077_v54 = vpop.xlane.xlu0 %1076 }
 0x114   :  { %v3430_v59 = vmul.f32 %v1077_v54, %v3417_v47  ;;  %v464_v9 = vsel %vm98_vm0, %v3415_v46, 0.0  ;;  %v3445_v13 = vadd.f32 1e-05, %v1248_v7  ;;  %v535_v19 = vmul.f32 %v3415_v46, %v3415_v46 }
 0x115   :  { %1112 = vadd.xlane.f32.xlu1 %v1111_v53  ;;  %v1157_v0 = vpop.xlane.xlu2 %1156 }
 0x116   :  { %v1217_v63 = vmul.f32 %v3430_v59, %v3430_v59  ;;  %v1201_v1 = vmul.f32 %v1157_v0, %v3417_v47  ;;  %v551_v25 = vsel %vm98_vm0, %v535_v19, 0.0  ;;  %vm1302_vm3 = vweird.f32 %v3445_v13 }
 0x118   :  { %v1233_v3 = vsub.f32 %v1201_v1, %v1217_v63 }
 0x11a   :  { %v1249_v4 = vmax.f32 %v1233_v3, 0.0 }
 0x11b   :  { %v3432_v61 = vpop.f32.mrf.mxu1 }
 0x11c   :  { %v467_v62 = vsel %vm98_vm0, %v3432_v61, 0.0  ;;  %v3441_v10 = vadd.f32 1e-05, %v1249_v4  ;;  %v536_v15 = vmul.f32 %v3432_v61, %v3432_v61 }
 0x11d   :  { %468 = vadd.xlane.f32.xlu2 %v467_v62  ;;  %465 = vadd.xlane.f32.xlu1 %v464_v9  ;;  %v1080_v11 = vpop.xlane.xlu2 %1079  ;;  %v1160_v24 = vpop.xlane.xlu1 %1159 }
 0x11e   :  { %2879 = vrsqrt.f32 %v3441_v10  ;;  %v554_v21 = vsel %vm98_vm0, %v536_v15, 0.0  ;;  %v3461_v22 = vmul.f32 %v1080_v11, %v3417_v47  ;;  %v1202_v33 = vmul.f32 %v1160_v24, %v3417_v47 }
 0x11f   :  { %2881 = vrsqrt.f32 %v3445_v13  ;;  %vm1312_vm5 = vweird.f32 %v3441_v10 }
 0x120   :  { %v1218_v32 = vmul.f32 %v3461_v22, %v3461_v22 }
 0x122   :  { %v1234_v36 = vsub.f32 %v1202_v33, %v1218_v32  ;;  %v1265_v32 = vsub.f32 %v3278_v5, %v3430_v59 }
 0x123   :  { %v1083_v17 = vpop.xlane.xlu0 %1082 }
 0x124   :  { %v3443_v12 = vpop.f32.mrf.mxu1  ;;  %v3457_v20 = vmul.f32 %v1083_v17, %v3417_v47  ;;  %v3466_v30 = vpop.eup %2879  ;;  %v1250_v55 = vmax.f32 %v1234_v36, 0.0 }
 0x125   :  { %v537_v14 = vmul.f32 %v3443_v12, %v3443_v12  ;;  %555 = vadd.xlane.f32.xlu1 %v554_v21  ;;  %v1163_v29 = vpop.xlane.xlu2 %1162  ;;  %v3471_v28 = vpop.eup %2881  ;;  %v1307_v35 = vmul.f32 %v3466_v30, %v3441_v10  ;;  %v470_v43 = vsel %vm98_vm0, %v3443_v12, 0.0  ;;  %vm1313_vm2 = vweird.f32 %v3466_v30 }
 0x126   :  { %v1219_v26 = vmul.f32 %v3457_v20, %v3457_v20  ;;  %v1203_v27 = vmul.f32 %v1163_v29, %v3417_v47  ;;  %v1297_v39 = vmul.f32 %v3471_v28, %v3445_v13  ;;  %v3497_v2 = vadd.f32 1e-05, %v1250_v55  ;;  %vm3515_vm6 = vmor %vm1312_vm5, %vm1313_vm2  ;;  %v3566_v55 = vld [vmem:[%s4697_s12] ss:$0 sm:$0xff] }
 0x127   :  { %v557_v48 = vsel %vm98_vm0, %v537_v14, 0.0  ;;  %v1308_v42 = vmul.f32 %v3466_v30, %v1307_v35  ;;  %vm1303_vm4 = vweird.f32 %v3471_v28 }
 0x128   :  { %558 = vadd.xlane.f32.xlu2 %v557_v48  ;;  %v1235_v37 = vsub.f32 %v1203_v27, %v1219_v26  ;;  %v1298_v54 = vmul.f32 %v3471_v28, %v1297_v39  ;;  %vm1304_vm7 = vmor %vm1302_vm3, %vm1303_vm4  ;;  %vm1322_vm9 = vweird.f32 %v3497_v2 }
 0x129   :  { %552 = vadd.xlane.f32.xlu0 %v551_v25  ;;  %v1309_v58 = vmul.f32 0.5, %v1308_v42  ;;  %v3552_v42 = vld [vmem:[%s4696_s11] ss:$0 sm:$0xff] }
 0x12a   :  { %v1251_v52 = vmax.f32 %v1235_v37, 0.0  ;;  %v1299_v1 = vmul.f32 0.5, %v1298_v54 }
 0x12b   :  { %v1310_v4 = vsub.f32 1.5, %v1309_v58  ;;  %v1086_v14 = vpop.xlane.xlu0 %1085 }
 0x12c   :  { %v3463_v23 = vpop.f32.mrf.mxu1  ;;  %v3494_v63 = vadd.f32 1e-05, %v1251_v52  ;;  %v1300_v11 = vsub.f32 1.5, %v1299_v1  ;;  %v3547_v59 = vmul.f32 %v1086_v14, %v3417_v47 }
 0x12d   :  { %v473_v38 = vsel %vm98_vm0, %v3463_v23, 0.0  ;;  %v538_v62 = vmul.f32 %v3463_v23, %v3463_v23  ;;  %v1311_v48 = vmul.f32 %v3466_v30, %v1310_v4  ;;  %v1166_v17 = vpop.xlane.xlu2 %1165 }
 0x12e   :  { %474 = vadd.xlane.f32.xlu1 %v473_v38  ;;  %2883 = vrsqrt.f32 %v3494_v63  ;;  %v1301_v19 = vmul.f32 %v3471_v28, %v1300_v11  ;;  %v1264_v38 = vsub.f32 %v3267_v56, %v3422_v51  ;;  %v1220_v52 = vmul.f32 %v3547_v59, %v3547_v59 }
 0x12f   :  { %v560_v7 = vsel %vm98_vm0, %v538_v62, 0.0  ;;  %2885 = vrsqrt.f32 %v3497_v2  ;;  %v1315_v25 = vsel %vm3515_vm6, %v3466_v30, %v1311_v48  ;;  %vm1332_vm11 = vweird.f32 %v3494_v63 }
 0x130   :  { %v1305_v33 = vsel %vm1304_vm7, %v3471_v28, %v1301_v19  ;;  %v1457_v39 = vmul.f32 %v1315_v25, %v1265_v32 }
 0x131   :  { %471 = vadd.xlane.f32.xlu0 %v470_v43  ;;  %v1456_v28 = vmul.f32 %v1305_v33, %v1264_v38 }
 0x132   :  { %v1476_v56 = vmul.f32 %v3552_v42, %v1457_v39 }
 0x133   :  { %v1475_v54 = vmul.f32 %v3552_v42, %v1456_v28 }
 0x134   :  { %v3482_v40 = vpop.f32.mrf.mxu1  ;;  %v3513_v21 = vpop.eup %2883 }
 0x135   :  { %v476_v49 = vsel %vm98_vm0, %v3482_v40, 0.0  ;;  %v539_v53 = vmul.f32 %v3482_v40, %v3482_v40  ;;  %v3530_v27 = vpop.eup %2885  ;;  %v1327_v30 = vmul.f32 %v3513_v21, %v3494_v63  ;;  %v3537_v35 = vpop.xlane.xlu0 %1168  ;;  %v1494_v11 = vadd.f32 %v3566_v55, %v1475_v54 }
 0x136   :  { %477 = vadd.xlane.f32.xlu2 %v476_v49  ;;  %v1317_v36 = vmul.f32 %v3530_v27, %v3497_v2  ;;  %vm1333_vm8 = vweird.f32 %v3513_v21  ;;  %vm1323_vm10 = vweird.f32 %v3530_v27 }
 0x137   :  { %v563_v0 = vsel %vm98_vm0, %v539_v53, 0.0  ;;  %v1328_v43 = vmul.f32 %v3513_v21, %v1327_v30  ;;  %v1204_v53 = vmul.f32 %v1166_v17, %v3417_v47  ;;  %vm1334_vm12 = vmor %vm1332_vm11, %vm1333_vm8 }
 0x138   :  { %564 = vadd.xlane.f32.xlu1 %v563_v0  ;;  %v1318_v51 = vmul.f32 %v3530_v27, %v1317_v36  ;;  %v1495_v0 = vadd.f32 %v3566_v55, %v1476_v56  ;;  %vm1324_vm13 = vmor %vm1322_vm9, %vm1323_vm10  ;;  %v1267_v36 = vsub.f32 %v3302_v34, %v3457_v20  ;;  %v3606_v56 = vpop.permute.xlu1 %2784 }
 0x139   :  { %561 = vadd.xlane.f32.xlu0 %v560_v7  ;;  %v1329_v58 = vmul.f32 0.5, %v1328_v43  ;;  %v1266_v43 = vsub.f32 %v3290_v18, %v3461_v22 }
 0x13a   :  { %v1319_v1 = vmul.f32 0.5, %v1318_v51  ;;  %v1511_v17 = vmax.f32 %v1495_v0, 0.0 }
 0x13b   :  { %v1330_v14 = vsub.f32 1.5, %v1329_v58 }
 0x13c   :  { %v3499_v3 = vpop.f32.mrf.mxu1  ;;  %v3544_v5 = vpop.xlane.xlu2 %1091  ;;  %v1320_v19 = vsub.f32 1.5, %v1319_v1 }
 0x13d   :  { %v540_v9 = vmul.f32 %v3499_v3, %v3499_v3  ;;  %v479_v26 = vsel %vm98_vm0, %v3499_v3, 0.0 }
 0x13e   :  { %v1321_v33 = vmul.f32 %v3530_v27, %v1320_v19  ;;  %v1205_v19 = vmul.f32 %v3537_v35, %v3417_v47 }
 0x13f   :  { %v566_v15 = vsel %vm98_vm0, %v540_v9, 0.0  ;;  %v1236_v9 = vsub.f32 %v1204_v53, %v1220_v52 }
 0x140   :  { %567 = vadd.xlane.f32.xlu2 %v566_v15  ;;  %v1325_v63 = vsel %vm1324_vm13, %v3530_v27, %v1321_v33 }
 0x141   :  { %480 = vadd.xlane.f32.xlu0 %v479_v26  ;;  %v1252_v25 = vmax.f32 %v1236_v9, 0.0  ;;  %v1510_v26 = vmax.f32 %v1494_v11, 0.0  ;;  %v1458_v52 = vmul.f32 %v1325_v63, %v1266_v43 }
 0x143   :  { %v2793_v32 = vpack.i.bf16 %v1511_v17, %v1510_v26  ;;  %v3595_v39 = vadd.f32 1e-05, %v1252_v25  ;;  %v1477_v58 = vmul.f32 %v3552_v42, %v1458_v52 }
 0x144   :  { %v3519_v24 = vpop.f32.mrf.mxu1  ;;  %v3571_v4 = vpop.xlane.xlu0 %1094 }
 0x145   :  { %4739 = vst [vmem:[#allocation8_spill] sm:$0xff] %v3519_v24  ;;  %v482_v13 = vsel %vm98_vm0, %v3519_v24, 0.0  ;;  %v541_v10 = vmul.f32 %v3519_v24, %v3519_v24  ;;  %2887 = vrsqrt.f32 %v3595_v39  ;;  %v1496_v17 = vadd.f32 %v3566_v55, %v1477_v58 }
 0x146   :  { %483 = vadd.xlane.f32.xlu1 %v482_v13  ;;  %v3573_v7 = vpop.xlane.xlu2 %1174  ;;  %v1331_v13 = vmul.f32 %v3513_v21, %v1330_v14  ;;  %vm1342_vm14 = vweird.f32 %v3595_v39 }
 0x147   :  { %v569_v37 = vsel %vm98_vm0, %v541_v10, 0.0 }
 0x148   :  { %570 = vadd.xlane.f32.xlu2 %v569_v37  ;;  %v1335_v2 = vsel %vm1334_vm12, %v3513_v21, %v1331_v13 }
 0x149   :  { %v1459_v51 = vmul.f32 %v1335_v2, %v1267_v36 }
 0x14b   :  { %v1478_v34 = vmul.f32 %v3552_v42, %v1459_v51  ;;  %v3614_v27 = vpop.eup %2887 }
 0x14c   :  { %v3555_v49 = vpop.f32.mrf.mxu1  ;;  %v1337_v11 = vmul.f32 %v3614_v27, %v3595_v39  ;;  %vm1343_vm15 = vweird.f32 %v3614_v27 }
 0x14d   :  { %v485_v62 = vsel %vm98_vm0, %v3555_v49, 0.0  ;;  %v542_v15 = vmul.f32 %v3555_v49, %v3555_v49  ;;  %v1497_v9 = vadd.f32 %v3566_v55, %v1478_v34  ;;  %vm3649_vm3 = vmor %vm1342_vm14, %vm1343_vm15 }
 0x14e   :  { %v3591_v37 = vpop.xlane.xlu0 %1177 }
 0x14f   :  { %v572_v10 = vsel %vm98_vm0, %v542_v15, 0.0 }
 0x150   :  { %486 = vadd.xlane.f32.xlu2 %v485_v62 }
 0x154   :  { %v3578_v48 = vpop.f32.mrf.mxu1  ;;  %v3589_v30 = vpop.xlane.xlu2 %1100 }
 0x155   :  { %v488_v29 = vsel %vm98_vm0, %v3578_v48, 0.0  ;;  %v543_v38 = vmul.f32 %v3578_v48, %v3578_v48  ;;  %2794 = vrot.lane.b32.xlu0 %v2793_v32, %s3014_s25  ;;  %v1338_v32 = vmul.f32 %v3614_v27, %v1337_v11 }
 0x156   :  { %489 = vadd.xlane.f32.xlu1 %v488_v29 }
 0x157   :  { %v575_v28 = vsel %vm98_vm0, %v543_v38, 0.0  ;;  %v1512_v38 = vmax.f32 %v1496_v17, 0.0  ;;  %v1339_v43 = vmul.f32 0.5, %v1338_v32  ;;  %v1268_v32 = vsub.f32 %v3311_v44, %v3547_v59 }
 0x158   :  { %573 = vadd.xlane.f32.xlu2 %v572_v10  ;;  %v1513_v10 = vmax.f32 %v1497_v9, 0.0 }
 0x15c   :  { %v1104_v53 = vpop.xlane.xlu2 %1103  ;;  %v3608_v21 = vpop.f32.mrf.mxu1 }
 0x15d   :  { %v3611_v54 = vmul.f32 %v1104_v53, %v3417_v47  ;;  %v491_v62 = vsel %vm98_vm0, %v3608_v21, 0.0  ;;  %v544_v26 = vmul.f32 %v3608_v21, %v3608_v21 }
 0x15e   :  { %576 = vadd.xlane.f32.xlu1 %v575_v28  ;;  %v1184_v20 = vpop.xlane.xlu0 %1183  ;;  %v2798_v28 = vpack.i.bf16 %v1513_v10, %v1512_v38 }
 0x15f   :  { %v1226_v18 = vmul.f32 %v3611_v54, %v3611_v54  ;;  %v1210_v22 = vmul.f32 %v1184_v20, %v3417_v47  ;;  %v578_v36 = vsel %vm98_vm0, %v544_v26, 0.0 }
 0x160   :  { %v1089_v1 = vpop.xlane.xlu1 %1088 }
 0x161   :  { %v1242_v0 = vsub.f32 %v1210_v22, %v1226_v18  ;;  %v3626_v14 = vmul.f32 %v1089_v1, %v3417_v47  ;;  %v1340_v18 = vsub.f32 1.5, %v1339_v43  ;;  %v1149_v43 = vmul.f32 %v3419_v50, %v3419_v50 }
 0x163   :  { %v1258_v15 = vmax.f32 %v1242_v0, 0.0  ;;  %v1221_v29 = vmul.f32 %v3626_v14, %v3626_v14  ;;  %v1341_v11 = vmul.f32 %v3614_v27, %v1340_v18  ;;  %v1269_v44 = vsub.f32 %v3324_v60, %v3626_v14 }
 0x164   :  { %v1107_v25 = vpop.xlane.xlu2 %1106  ;;  %v1191_v18 = vsel %vm98_vm0, %v1149_v43, 0.0  ;;  %v3677_v60 = vmul.f32 %v3544_v5, %v3417_v47 }
 0x165   :  { %v1290_v13 = vadd.f32 1e-05, %v1258_v15  ;;  %v1237_v33 = vsub.f32 %v1205_v19, %v1221_v29  ;;  %v3638_v63 = vmul.f32 %v1107_v25, %v3417_v47  ;;  %v1345_v26 = vsel %vm3649_vm3, %v3614_v27, %v1341_v11 }
 0x166   :  { %492 = vadd.xlane.f32.xlu1 %v491_v62 }
 0x167   :  { %2889 = vrsqrt.f32 %v1290_v13  ;;  %v1253_v2 = vmax.f32 %v1237_v33, 0.0  ;;  %v1227_v52 = vmul.f32 %v3638_v63, %v3638_v63  ;;  %vm1402_vm1 = vweird.f32 %v1290_v13 }
 0x168   :  { %v1172_v35 = vpop.xlane.xlu1 %1171  ;;  %v1274_v33 = vsub.f32 %v3373_v57, %v3611_v54 }
 0x169   :  { %v1285_v51 = vadd.f32 1e-05, %v1253_v2  ;;  %v1206_v14 = vmul.f32 %v1172_v35, %v3417_v47 }
 0x16b   :  { %2891 = vrsqrt.f32 %v1285_v51  ;;  %vm1352_vm6 = vweird.f32 %v1285_v51 }
 0x16c   :  { %v1187_v53 = vpop.xlane.xlu2 %1186 }
 0x16d   :  { %v2890_v34 = vpop.eup %2889  ;;  %v1211_v20 = vmul.f32 %v1187_v53, %v3417_v47 }
 0x16e   :  { %579 = vadd.xlane.f32.xlu1 %v578_v36  ;;  %v1397_v22 = vmul.f32 %v2890_v34, %v1290_v13  ;;  %vm1403_vm2 = vweird.f32 %v2890_v34 }
 0x16f   :  { %v1243_v58 = vsub.f32 %v1211_v20, %v1227_v52  ;;  %vm1404_vm4 = vmor %vm1402_vm1, %vm1403_vm2 }
 0x170   :  { %2799 = vrot.lane.b32.xlu2 %v2798_v28, %s3014_s25  ;;  %v1398_v62 = vmul.f32 %v2890_v34, %v1397_v22  ;;  %v3646_v1 = vpop.xlane.xlu1 %1097  ;;  %v1460_v28 = vmul.f32 %v1345_v26, %v1268_v32  ;;  %v3670_v22 = vmul.f32 %v3571_v4, %v3417_v47 }
 0x171   :  { %v1259_v0 = vmax.f32 %v1243_v58, 0.0  ;;  %v2892_v9 = vpop.eup %2891  ;;  %v3672_v58 = vpop.f32.mrf.mxu2 }
 0x172   :  { %v1399_v15 = vmul.f32 0.5, %v1398_v62  ;;  %v1347_v19 = vmul.f32 %v2892_v9, %v1285_v51  ;;  %vm1353_vm5 = vweird.f32 %v2892_v9  ;;  %v1479_v57 = vmul.f32 %v3552_v42, %v1460_v28  ;;  %4742 = vst [vmem:[#allocation9_spill] sm:$0xff] %v3672_v58 }
 0x173   :  { %v1291_v29 = vadd.f32 1e-05, %v1259_v0  ;;  %vm1354_vm7 = vmor %vm1352_vm6, %vm1353_vm5  ;;  %v1223_v17 = vmul.f32 %v3670_v22, %v3670_v22  ;;  %v1114_v35 = vsel %vm98_vm0, %v3672_v58, 0.0 }
 0x174   :  { %v1400_v25 = vsub.f32 1.5, %v1399_v15  ;;  %v1348_v39 = vmul.f32 %v2892_v9, %v1347_v19  ;;  %v1222_v15 = vmul.f32 %v3677_v60, %v3677_v60  ;;  %v1207_v19 = vmul.f32 %v3573_v7, %v3417_v47 }
 0x175   :  { %2893 = vrsqrt.f32 %v1291_v29  ;;  %vm1412_vm8 = vweird.f32 %v1291_v29 }
 0x176   :  { %v1401_v10 = vmul.f32 %v2890_v34, %v1400_v25  ;;  %v1349_v13 = vmul.f32 0.5, %v1348_v39  ;;  %v1238_v25 = vsub.f32 %v1206_v14, %v1222_v15  ;;  %v1239_v32 = vsub.f32 %v1207_v19, %v1223_v17  ;;  %v3736_v19 = vpop.permute.xlu0 %2789 }
 0x178   :  { %v1405_v38 = vsel %vm1404_vm4, %v2890_v34, %v1401_v10  ;;  %v1350_v2 = vsub.f32 1.5, %v1349_v13  ;;  %v3660_v36 = vpop.xlane.xlu1 %1180  ;;  %v1255_v43 = vmax.f32 %v1239_v32, 0.0 }
 0x179   :  { %v1466_v52 = vmul.f32 %v1405_v38, %v1274_v33  ;;  %v1254_v38 = vmax.f32 %v1238_v25, 0.0  ;;  %v2716_v25 = vld [vmem:[%s4698_s13 + $0x28] sm:$0xff] }
 0x17a   :  { %v1351_v27 = vmul.f32 %v2892_v9, %v1350_v2  ;;  %v3697_v2 = vpop.f32.mrf.mxu2  ;;  %1802 = vmatpush.bf16.msra.mxu3 %v2716_v25 }
 0x17b   :  { %v2894_v53 = vpop.eup %2893  ;;  %4743 = vst [vmem:[#allocation10_spill] sm:$0xff] %v3697_v2  ;;  %v1485_v28 = vmul.f32 %v3552_v42, %v1466_v52  ;;  %v1148_v52 = vmul.f32 %v3411_v41, %v3411_v41 }
 0x17c   :  { %v1407_v59 = vmul.f32 %v2894_v53, %v1291_v29  ;;  %v1355_v20 = vsel %vm1354_vm7, %v2892_v9, %v1351_v27  ;;  %vm1413_vm9 = vweird.f32 %v2894_v53  ;;  %v1498_v9 = vadd.f32 %v3566_v55, %v1479_v57 }
 0x17d   :  { %v1461_v54 = vmul.f32 %v1355_v20, %v1269_v44  ;;  %vm1414_vm10 = vmor %vm1412_vm8, %vm1413_vm9  ;;  %v1275_v29 = vsub.f32 %v3384_v6, %v3638_v63  ;;  %v3703_v63 = vmul.f32 %v3646_v1, %v3417_v47  ;;  %v3707_v27 = vadd.f32 1e-05, %v1254_v38 }
 0x17e   :  { %v1408_v34 = vmul.f32 %v2894_v53, %v1407_v59  ;;  %v1514_v39 = vmax.f32 %v1498_v9, 0.0  ;;  %v1504_v44 = vadd.f32 %v3566_v55, %v1485_v28  ;;  %v3710_v59 = vadd.f32 1e-05, %v1255_v43 }
 0x17f   :  { %1192 = vadd.xlane.f32.xlu0 %v1191_v18  ;;  %v1480_v51 = vmul.f32 %v3552_v42, %v1461_v54  ;;  %v3717_v57 = vmul.f32 %v3589_v30, %v3417_v47  ;;  %v1224_v1 = vmul.f32 %v3703_v63, %v3703_v63  ;;  %v1150_v54 = vmul.f32 %v3672_v58, %v3672_v58 }
 0x180   :  { %v1409_v62 = vmul.f32 0.5, %v1408_v34  ;;  %v3680_v0 = vpop.xlane.xlu1 %1109  ;;  %v3723_v34 = vpop.f32.mrf.mxu1  ;;  %2895 = vrsqrt.f32 %v3707_v27  ;;  %v1209_v18 = vmul.f32 %v3660_v36, %v3417_v47  ;;  %v1208_v30 = vmul.f32 %v3591_v37, %v3417_v47 }
 0x181   :  { %v1499_v11 = vadd.f32 %v3566_v55, %v1480_v51  ;;  %2897 = vrsqrt.f32 %v3710_v59  ;;  %v1225_v9 = vmul.f32 %v3717_v57, %v3717_v57  ;;  %v1194_v36 = vsel %vm98_vm0, %v1150_v54, 0.0 }
 0x182   :  { %v1410_v4 = vsub.f32 1.5, %v1409_v62  ;;  %v1520_v62 = vmax.f32 %v1504_v44, 0.0  ;;  %v1240_v17 = vsub.f32 %v1208_v30, %v1224_v1  ;;  %vm1372_vm11 = vweird.f32 %v3710_v59 }
 0x183   :  { %v1515_v26 = vmax.f32 %v1499_v11, 0.0  ;;  %v1188_v11 = vsel %vm98_vm0, %v1148_v52, 0.0  ;;  %v2715_v52 = vld [vmem:[%s4698_s13 + $0x20] sm:$0xff]  ;;  %vm1362_vm15 = vweird.f32 %v3707_v27 }
 0x184   :  { %v1411_v5 = vmul.f32 %v2894_v53, %v1410_v4  ;;  %1803 = vmatpush.bf16.msra.mxu3 %v2715_v52 }
 0x185   :  { %v2803_v13 = vpack.i.bf16 %v1515_v26, %v1514_v39 }
 0x186   :  { %v1415_v10 = vsel %vm1414_vm10, %v2894_v53, %v1411_v5  ;;  %v1117_v53 = vsel %vm98_vm0, %v3697_v2, 0.0  ;;  %v1241_v5 = vsub.f32 %v1209_v18, %v1225_v9  ;;  %v3742_v37 = vpop.eup %2895 }
 0x187   :  { %1115 = vadd.xlane.f32.xlu0 %v1114_v35  ;;  %v1467_v33 = vmul.f32 %v1415_v10, %v1275_v29  ;;  %2804 = vrot.lane.b32.xlu1 %v2803_v13, %s3014_s25  ;;  %v1256_v29 = vmax.f32 %v1240_v17, 0.0  ;;  %v3747_v39 = vpop.eup %2897  ;;  %v1357_v13 = vmul.f32 %v3742_v37, %v3707_v27  ;;  %vm1363_vm13 = vweird.f32 %v3742_v37 }
 0x188   :  { %v3695_v7 = vpop.xlane.xlu1 %1112  ;;  %v1257_v26 = vmax.f32 %v1241_v5, 0.0  ;;  %v3757_v28 = vpop.f32.mrf.mxu1  ;;  %v1367_v43 = vmul.f32 %v3747_v39, %v3710_v59  ;;  %vm1373_vm12 = vweird.f32 %v3747_v39  ;;  %vm3847_vm1 = vmor %vm1362_vm15, %vm1363_vm13 }
 0x189   :  { %v1486_v6 = vmul.f32 %v3552_v42, %v1467_v33  ;;  %4744 = vst [vmem:[#allocation11_spill] sm:$0xff] %v3757_v28  ;;  %v1358_v18 = vmul.f32 %v3742_v37, %v1357_v13  ;;  %vm3833_vm14 = vmor %vm1372_vm11, %vm1373_vm12 }
 0x18a   :  { %v1368_v9 = vmul.f32 %v3747_v39, %v1367_v43 }
 0x18b   :  { %v1505_v20 = vadd.f32 %v3566_v55, %v1486_v6  ;;  %v3761_v6 = vadd.f32 1e-05, %v1256_v29  ;;  %v1359_v5 = vmul.f32 0.5, %v1358_v18  ;;  %v545_v29 = vmul.f32 %v3723_v34, %v3723_v34 }
 0x18d   :  { %v1521_v14 = vmax.f32 %v1505_v20, 0.0  ;;  %v3766_v20 = vadd.f32 1e-05, %v1257_v26  ;;  %2899 = vrsqrt.f32 %v3761_v6  ;;  %v1369_v26 = vmul.f32 0.5, %v1368_v9 }
 0x18e   :  { %vm1382_vm10 = vweird.f32 %v3761_v6 }
 0x18f   :  { %1118 = vadd.xlane.f32.xlu0 %v1117_v53  ;;  %v3734_v15 = vpack.i.bf16 %v1521_v14, %v1520_v62  ;;  %v497_v14 = vsel %vm98_vm0, %v3757_v28, 0.0  ;;  %2901 = vrsqrt.f32 %v3766_v20  ;;  %v1370_v9 = vsub.f32 1.5, %v1369_v26 }
 0x190   :  { %v466_v51 = vpop.xlane.xlu1 %465  ;;  %v469_v4 = vpop.xlane.xlu2 %468  ;;  %vm1392_vm12 = vweird.f32 %v3766_v20 }
 0x191   :  { %v3740_v35 = vmul.f32 %v3417_v47, %v469_v4  ;;  %v3750_v10 = vmul.f32 %v3417_v47, %v466_v51 }
 0x193   :  { %v616_v33 = vmul.f32 %v3740_v35, %v3740_v35  ;;  %v615_v1 = vmul.f32 %v3750_v10, %v3750_v10 }
 0x197   :  { %1195 = vadd.xlane.f32.xlu0 %v1194_v36  ;;  %v2754_v36 = vld [vmem:[%s4734_s27 + $0x10] sm:$0xff]  }
 0x198   :  { %v556_v32 = vpop.xlane.xlu1 %555  ;;  %v2731_v13 = vunpack.c.l.bf16 %v2754_v36 }
 0x199   :  { %1189 = vadd.xlane.f32.xlu2 %v1188_v11  ;;  %v600_v38 = vmul.f32 %v556_v32, %v3417_v47  ;;  %v2714_v11 = vld [vmem:[%s4698_s13 + $0x18] sm:$0xff] }
 0x19a   :  { %1804 = vmatpush.bf16.msra.mxu3 %v2714_v11 }
 0x19b   :  { %v632_v53 = vsub.f32 %v600_v38, %v616_v33  ;;  %v559_v51 = vpop.xlane.xlu2 %558  ;;  %v2732_v33 = vunpack.c.h.bf16 %v2754_v36  ;;  %v2713_v38 = vld [vmem:[%s4698_s13 + $0x10] sm:$0xff]  ;;  %v2712_v36 = vld [vmem:[%s4698_s13 + $0x8] sm:$0xff] }
 0x19c   :  { %v553_v44 = vpop.xlane.xlu0 %552 }
 0x19d   :  { %v599_v54 = vmul.f32 %v553_v44, %v3417_v47  ;;  %v648_v62 = vmax.f32 %v632_v53, 0.0  ;;  %v3797_v53 = vpop.eup %2899  ;;  %v1360_v44 = vsub.f32 1.5, %v1359_v5  ;;  %v2808_v11 = vpack.i.bf16 %v2732_v33, %v2731_v13 }
 0x19e   :  { %1805 = vmatpush.bf16.msra.mxu3 %v2713_v38  ;;  %v3802_v18 = vpop.eup %2901  ;;  %vm1383_vm7 = vweird.f32 %v3797_v53 }
 0x19f   :  { %v631_v30 = vsub.f32 %v599_v54, %v615_v1  ;;  %498 = vadd.xlane.f32.xlu0 %v497_v14  ;;  %v3776_v4 = vadd.f32 1e-05, %v648_v62  ;;  %v581_v54 = vsel %vm98_vm0, %v545_v29, 0.0  ;;  %v601_v62 = vmul.f32 %v559_v51, %v3417_v47  ;;  %vm3930_vm11 = vmor %vm1382_vm10, %vm1383_vm7 }
 0x1a0   :  { %v1361_v26 = vmul.f32 %v3742_v37, %v1360_v44  ;;  %v1387_v33 = vmul.f32 %v3802_v18, %v3766_v20  ;;  %vm1393_vm9 = vweird.f32 %v3802_v18 }
 0x1a1   :  { %v647_v17 = vmax.f32 %v631_v30, 0.0  ;;  %2903 = vrsqrt.f32 %v3776_v4  ;;  %v475_v52 = vpop.xlane.xlu1 %474  ;;  %vm711_vm4 = vweird.f32 %v3776_v4  ;;  %vm3938_vm13 = vmor %vm1392_vm12, %vm1393_vm9 }
 0x1a2   :  { %v3819_v5 = vmul.f32 %v3417_v47, %v475_v52  ;;  %1806 = vmatpush.bf16.msra.mxu3 %v2712_v36  ;;  %v1371_v52 = vmul.f32 %v3747_v39, %v1370_v9  ;;  %v2711_v9 = vld [vmem:[%s4698_s13] sm:$0xff]  ;;  %v1388_v41 = vmul.f32 %v3802_v18, %v1387_v33  ;;  %s4768_s13 = sld [smem:[#allocation12_spill]] }
 0x1a3   :  { %v3788_v25 = vadd.f32 1e-05, %v647_v17  ;;  %v546_v17 = vmul.f32 %v3757_v28, %v3757_v28 }
 0x1a4   :  { %v472_v32 = vpop.xlane.xlu0 %471  ;;  %v618_v27 = vmul.f32 %v3819_v5, %v3819_v5 }
 0x1a5   :  { %2905 = vrsqrt.f32 %v3788_v25  ;;  %v3795_v43 = vmul.f32 %v3417_v47, %v472_v32  ;;  %v1377_v32 = vmul.f32 %v3797_v53, %v3761_v6  ;;  %v584_v36 = vsel %vm98_vm0, %v546_v17, 0.0 }
 0x1a6   :  { %v1365_v17 = vsel %vm3847_vm1, %v3742_v37, %v1361_v26  ;;  %1807 = vmatpush.bf16.msra.mxu3 %v2711_v9  ;;  %v1375_v37 = vsel %vm3833_vm14, %v3747_v39, %v1371_v52  ;;  %vm701_vm6 = vweird.f32 %v3788_v25 }
 0x1a7   :  { %v617_v14 = vmul.f32 %v3795_v43, %v3795_v43  ;;  %582 = vadd.xlane.f32.xlu0 %v581_v54  ;;  %v3807_v30 = vpop.eup %2903  ;;  %v1378_v28 = vmul.f32 %v3797_v53, %v1377_v32  ;;  %v1271_v32 = vsub.f32 %v3342_v16, %v3670_v22 }
 0x1a8   :  { %v706_v51 = vmul.f32 %v3807_v30, %v3776_v4  ;;  %vm712_vm2 = vweird.f32 %v3807_v30 }
 0x1a9   :  { %v3799_v1 = vpop.xlane.xlu2 %477  ;;  %v633_v29 = vsub.f32 %v601_v62, %v617_v14  ;;  %vm3893_vm5 = vmor %vm711_vm4, %vm712_vm2 }
 0x1aa   :  { %v707_v38 = vmul.f32 %v3807_v30, %v706_v51 }
 0x1ab   :  { %v3825_v13 = vpop.eup %2905  ;;  %v649_v54 = vmax.f32 %v633_v29, 0.0 }
 0x1ac   :  { %v696_v62 = vmul.f32 %v3825_v13, %v3788_v25  ;;  %v562_v14 = vpop.xlane.xlu0 %561  ;;  %v708_v51 = vmul.f32 0.5, %v707_v38  ;;  %v1151_v38 = vmul.f32 %v3697_v2, %v3697_v2  ;;  %v1379_v2 = vmul.f32 0.5, %v1378_v28 }
 0x1ad   :  { %v3853_v29 = vadd.f32 1e-05, %v649_v54  ;;  %v1270_v54 = vsub.f32 %v3335_v8, %v3677_v60  ;;  %v1389_v60 = vmul.f32 0.5, %v1388_v41  ;;  %vm702_vm3 = vweird.f32 %v3825_v13 }
 0x1ae   :  { %v697_v58 = vmul.f32 %v3825_v13, %v696_v62  ;;  %v709_v62 = vsub.f32 1.5, %v708_v51  ;;  %v1197_v8 = vsel %vm98_vm0, %v1151_v38, 0.0  ;;  %v1380_v22 = vsub.f32 1.5, %v1379_v2  ;;  %vm3903_vm8 = vmor %vm701_vm6, %vm702_vm3 }
 0x1af   :  { %2907 = vrsqrt.f32 %v3853_v29  ;;  %585 = vadd.xlane.f32.xlu0 %v584_v36  ;;  %v1462_v9 = vmul.f32 %v1365_v17, %v1270_v54  ;;  %v1463_v36 = vmul.f32 %v1375_v37, %v1271_v32  ;;  %v1390_v52 = vsub.f32 1.5, %v1389_v60 }
 0x1b0   :  { %v698_v26 = vmul.f32 0.5, %v697_v58  ;;  %v710_v58 = vmul.f32 %v3807_v30, %v709_v62  ;;  %v1381_v38 = vmul.f32 %v3797_v53, %v1380_v22  ;;  %v664_v54 = vsub.f32 %v3432_v61, %v3740_v35  ;;  %v3923_v61 = vld [vmem:[%s4693_s8] ss:$0 sm:$0xff] }
 0x1b1   :  { %2809 = vrot.lane.b32.xlu2 %v2808_v11, %s3012_s7  ;;  %v602_v11 = vmul.f32 %v562_v14, %v3417_v47  ;;  %1198 = vadd.xlane.f32.xlu1 %v1197_v8  ;;  %v1481_v16 = vmul.f32 %v3552_v42, %v1462_v9  ;;  %v1482_v51 = vmul.f32 %v3552_v42, %v1463_v36  ;;  %vm721_vm15 = vweird.f32 %v3853_v29 }
 0x1b2   :  { %v699_v50 = vsub.f32 1.5, %v698_v26  ;;  %v714_v2 = vsel %vm3893_vm5, %v3807_v30, %v710_v58  ;;  %v1391_v26 = vmul.f32 %v3802_v18, %v1390_v52  ;;  %v663_v30 = vsub.f32 %v3415_v46, %v3750_v10 }
 0x1b3   :  { %v3861_v24 = vpop.xlane.xlu2 %567  ;;  %v634_v14 = vsub.f32 %v602_v11, %v618_v27  ;;  %v3877_v27 = vpop.xlane.xlu1 %564  ;;  %v1500_v4 = vadd.f32 %v3566_v55, %v1481_v16  ;;  %v1501_v32 = vadd.f32 %v3566_v55, %v1482_v51  ;;  %v856_v62 = vmul.f32 %v714_v2, %v664_v54 }
 0x1b4   :  { %v700_v39 = vmul.f32 %v3825_v13, %v699_v50  ;;  %v1385_v6 = vsel %vm3930_vm11, %v3797_v53, %v1381_v38  ;;  %v1273_v58 = vsub.f32 %v3361_v45, %v3717_v57  ;;  %v1272_v16 = vsub.f32 %v3353_v31, %v3703_v63  ;;  %v3949_v22 = vpop.xlane.xlu0 %480  ;;  %v3954_v53 = vld [vmem:[%s4694_s9] ss:$0 sm:$0xff]  ;;  %v2755_v31 = vld [vmem:[%s4734_s27 + $0x18] sm:$0xff]  }
 0x1b5   :  { %v650_v59 = vmax.f32 %v634_v14, 0.0  ;;  %v3879_v44 = vpop.eup %2907  ;;  %v1516_v10 = vmax.f32 %v1500_v4, 0.0  ;;  %v1395_v20 = vsel %vm3938_vm13, %v3802_v18, %v1391_v26  ;;  %v875_v57 = vmul.f32 %v3923_v61, %v856_v62 }
 0x1b6   :  { %v716_v41 = vmul.f32 %v3879_v44, %v3853_v29  ;;  %v704_v25 = vsel %vm3903_vm8, %v3825_v13, %v700_v39  ;;  %v1517_v39 = vmax.f32 %v1501_v32, 0.0  ;;  %vm722_vm14 = vweird.f32 %v3879_v44 }
 0x1b7   :  { %v3875_v33 = vadd.f32 1e-05, %v650_v59  ;;  %v855_v46 = vmul.f32 %v704_v25, %v663_v30  ;;  %v1464_v63 = vmul.f32 %v1385_v6, %v1272_v16  ;;  %v1465_v11 = vmul.f32 %v1395_v20, %v1273_v58  ;;  %vm3964_vm2 = vmor %vm721_vm15, %vm722_vm14 }
 0x1b8   :  { %v717_v50 = vmul.f32 %v3879_v44, %v716_v41  ;;  %v2813_v18 = vpack.i.bf16 %v1517_v39, %v1516_v10  ;;  %v2735_v2 = vunpack.c.l.bf16 %v2755_v31  ;;  %v2736_v17 = vunpack.c.h.bf16 %v2755_v31 }
 0x1b9   :  { %2909 = vrsqrt.f32 %v3875_v33  ;;  %v874_v52 = vmul.f32 %v3923_v61, %v855_v46  ;;  %vm731_vm3 = vweird.f32 %v3875_v33  ;;  %v894_v25 = vadd.f32 %v3954_v53, %v875_v57 }
 0x1ba   :  { %v718_v14 = vmul.f32 0.5, %v717_v50  ;;  %v1483_v26 = vmul.f32 %v3552_v42, %v1464_v63  ;;  %v666_v30 = vsub.f32 %v3463_v23, %v3819_v5  ;;  %v1484_v62 = vmul.f32 %v3552_v42, %v1465_v11 }
 0x1bb   :  { %v3889_v28 = vpop.xlane.xlu2 %570  ;;  %v3926_v59 = vpop.xlane.xlu1 %483  ;;  %v2818_v46 = vpack.i.bf16 %v2736_v17, %v2735_v2  ;;  %vm1702_vm5 = vcmask 523264   ;;  %v910_v6 = vmax.f32 %v894_v25, 0.0  ;;  %v2786_v42 = vunpack.i.l.bf16 %v3606_v56 }
 0x1bc   :  { %v719_v35 = vsub.f32 1.5, %v718_v14  ;;  %v665_v14 = vsub.f32 %v3443_v12, %v3795_v43  ;;  %v1503_v58 = vadd.f32 %v3566_v55, %v1484_v62  ;;  %vm1775_vm6 = vcmask 785408  }
 0x1bd   :  { %v4006_v11 = vmul.f32 %v3417_v47, %v3949_v22 }
 0x1be   :  { %v720_v41 = vmul.f32 %v3879_v44, %v719_v35  ;;  %v2787_v35 = vunpack.i.h.bf16 %v3606_v56 }
 0x1bf   :  { %v2910_v37 = vpop.eup %2909 }
 0x1c0   :  { %v726_v13 = vmul.f32 %v2910_v37, %v3875_v33  ;;  %vm732_vm1 = vweird.f32 %v2910_v37  ;;  %v724_v4 = vsel %vm3964_vm2, %v3879_v44, %v720_v41  ;;  %v893_v33 = vadd.f32 %v3954_v53, %v874_v52 }
 0x1c1   :  { %vm733_vm4 = vmor %vm731_vm3, %vm732_vm1 }
 0x1c2   :  { %v727_v60 = vmul.f32 %v2910_v37, %v726_v13  ;;  %v857_v13 = vmul.f32 %v724_v4, %v665_v14  ;;  %v909_v23 = vmax.f32 %v893_v33, 0.0  ;;  %v603_v14 = vmul.f32 %v3877_v27, %v3417_v47 }
 0x1c3   :  { %v487_v36 = vpop.xlane.xlu2 %486  ;;  %2814 = vrot.lane.b32.xlu0 %v2813_v18, %s3014_s25  ;;  %v604_v27 = vmul.f32 %v3861_v24, %v3417_v47 }
 0x1c4   :  { %v728_v45 = vmul.f32 0.5, %v727_v60  ;;  %v3974_v29 = vmul.f32 %v3417_v47, %v487_v36  ;;  %v1502_v36 = vadd.f32 %v3566_v55, %v1483_v26  ;;  %v876_v16 = vmul.f32 %v3923_v61, %v857_v13 }
 0x1c5   :  { %v494_v13 = vsel %vm98_vm0, %v3723_v34, 0.0 }
 0x1c6   :  { %v729_v51 = vsub.f32 1.5, %v728_v45  ;;  %v622_v12 = vmul.f32 %v3974_v29, %v3974_v29  ;;  %v1518_v17 = vmax.f32 %v1502_v36, 0.0  ;;  %v895_v4 = vadd.f32 %v3954_v53, %v876_v16 }
 0x1c7   :  { %v2795_v9 = vpop.permute.xlu0 %2794 }
 0x1c8   :  { %v730_v38 = vmul.f32 %v2910_v37, %v729_v51  ;;  %v2797_v5 = vunpack.i.h.bf16 %v2795_v9  ;;  %v1519_v51 = vmax.f32 %v1503_v58, 0.0 }
 0x1c9   :  { %v490_v54 = vpop.xlane.xlu1 %489 }
 0x1ca   :  { %v734_v32 = vsel %vm733_vm4, %v2910_v37, %v730_v38  ;;  %v3989_v8 = vmul.f32 %v3417_v47, %v490_v54  ;;  %v2796_v37 = vunpack.i.l.bf16 %v2795_v9  ;;  %v1687_v20 = vsel %vm98_vm0, %v910_v6, %v2797_v5  ;;  %2819 = vrot.lane.b32.xlu1 %v2818_v46, %s3012_s7 }
 0x1cb   :  { %v574_v44 = vpop.xlane.xlu2 %573  ;;  %v858_v10 = vmul.f32 %v734_v32, %v666_v30  ;;  %v1704_v56 = vsel %vm1702_vm5, %v1687_v20, %v2787_v35  ;;  %v4012_v38 = vmul.f32 %v3417_v47, %v3799_v1  ;;  %v2823_v26 = vpack.i.bf16 %v1519_v51, %v1518_v17 }
 0x1cc   :  { %v606_v43 = vmul.f32 %v574_v44, %v3417_v47  ;;  %v1686_v39 = vsel %vm98_vm0, %v909_v23, %v2796_v37  ;;  %v623_v55 = vmul.f32 %v3989_v8, %v3989_v8  ;;  %v620_v30 = vmul.f32 %v4006_v11, %v4006_v11 }
 0x1cd   :  { %v1703_v57 = vsel %vm1702_vm5, %v1686_v39, %v2786_v42  ;;  %v877_v31 = vmul.f32 %v3923_v61, %v858_v10  ;;  %v911_v44 = vmax.f32 %v895_v4, 0.0  ;;  %v619_v62 = vmul.f32 %v4012_v38, %v4012_v38 }
 0x1ce   :  { %v638_v60 = vsub.f32 %v606_v43, %v622_v12  ;;  %v1719_v18 = vpack.c.bf16 %v1704_v56, %v1703_v57  ;;  %v4028_v43 = vpop.f32.mrf.mxu1  ;;  %v2792_v6 = vunpack.i.h.bf16 %v3736_v19  ;;  %v2791_v23 = vunpack.i.l.bf16 %v3736_v19 }
 0x1cf   :  { %v896_v54 = vadd.f32 %v3954_v53, %v877_v31  ;;  %v635_v46 = vsub.f32 %v603_v14, %v619_v62  ;;  %v636_v5 = vsub.f32 %v604_v27, %v620_v30  ;;  %v500_v57 = vsel %vm98_vm0, %v4028_v43, 0.0 }
 0x1d0   :  { %v654_v41 = vmax.f32 %v638_v60, 0.0  ;;  %2661 = vmatmul.msk.bf16.vlgmr.msra.gmra.mxu3 %vm1775_vm6, %v1719_v18  ;;  %v670_v17 = vsub.f32 %v3555_v49, %v3974_v29  ;;  %v671_v29 = vsub.f32 %v3578_v48, %v3989_v8 }
 0x1d1   :  { %v577_v45 = vpop.xlane.xlu1 %576  ;;  %v912_v1 = vmax.f32 %v896_v54, 0.0  ;;  %v651_v58 = vmax.f32 %v635_v46, 0.0  ;;  %v652_v20 = vmax.f32 %v636_v5, 0.0  ;;  %v547_v54 = vmul.f32 %v4028_v43, %v4028_v43 }
 0x1d2   :  { %v607_v63 = vmul.f32 %v577_v45, %v3417_v47  ;;  %v686_v52 = vadd.f32 1e-05, %v654_v41  ;;  %2824 = vrot.lane.b32.xlu1 %v2823_v26, %s3014_s25 }
 0x1d3   :  { %v2800_v2 = vpop.permute.xlu2 %2799  ;;  %v4044_v51 = vadd.f32 1e-05, %v652_v20  ;;  %v587_v49 = vsel %vm98_vm0, %v547_v54, 0.0  ;;  %v2756_v54 = vld [vmem:[%s4734_s27 + $0x20] sm:$0xff]  }
 0x1d4   :  { %v639_v50 = vsub.f32 %v607_v63, %v623_v55  ;;  %2911 = vrsqrt.f32 %v686_v52  ;;  %v2802_v22 = vunpack.i.h.bf16 %v2800_v2  ;;  %v2801_v33 = vunpack.i.l.bf16 %v2800_v2 }
 0x1d5   :  { %v4042_v63 = vadd.f32 1e-05, %v651_v58  ;;  %vm771_vm8 = vweird.f32 %v686_v52 }
 0x1d6   :  { %v655_v25 = vmax.f32 %v639_v50, 0.0  ;;  %v1689_v10 = vsel %vm98_vm0, %v912_v1, %v2802_v22  ;;  %v1688_v12 = vsel %vm98_vm0, %v911_v44, %v2801_v33 }
 0x1d7   :  { %v1705_v24 = vsel %vm1702_vm5, %v1688_v12, %v2791_v23  ;;  %v1706_v36 = vsel %vm1702_vm5, %v1689_v10, %v2792_v6  ;;  %vm741_vm3 = vweird.f32 %v4042_v63 }
 0x1d8   :  { %v687_v32 = vadd.f32 1e-05, %v655_v25  ;;  %v1720_v19 = vpack.c.bf16 %v1706_v36, %v1705_v24  ;;  %v4051_v25 = vpop.f32.mrf.mxu1 }
 0x1d9   :  { %v493_v35 = vpop.xlane.xlu1 %492  ;;  %v503_v10 = vsel %vm98_vm0, %v4051_v25, 0.0 }
 0x1da   :  { %2913 = vrsqrt.f32 %v687_v32  ;;  %495 = vadd.xlane.f32.xlu2 %v494_v13  ;;  %v2912_v9 = vpop.eup %2911  ;;  %v4033_v60 = vmul.f32 %v3417_v47, %v493_v35  ;;  %vm781_vm11 = vweird.f32 %v687_v32  ;;  %v548_v35 = vmul.f32 %v4051_v25, %v4051_v25 }
 0x1db   :  { %v766_v37 = vmul.f32 %v2912_v9, %v686_v52  ;;  %vm772_vm7 = vweird.f32 %v2912_v9  ;;  %2915 = vrsqrt.f32 %v4042_v63 }
 0x1dc   :  { %v624_v31 = vmul.f32 %v4033_v60, %v4033_v60  ;;  %vm773_vm9 = vmor %vm771_vm8, %vm772_vm7  ;;  %2917 = vrsqrt.f32 %v4044_v51  ;;  %v590_v46 = vsel %vm98_vm0, %v548_v35, 0.0  ;;  %vm751_vm7 = vweird.f32 %v4044_v51 }
 0x1dd   :  { %v767_v42 = vmul.f32 %v2912_v9, %v766_v37  ;;  %v605_v35 = vmul.f32 %v3889_v28, %v3417_v47 }
 0x1df   :  { %v768_v39 = vmul.f32 0.5, %v767_v42  ;;  %v4083_v42 = vmul.f32 %v3695_v7, %v3417_v47  ;;  %v672_v7 = vsub.f32 %v3608_v21, %v4033_v60 }
 0x1e0   :  { %v2914_v16 = vpop.eup %2913  ;;  %2662 = vmatmul.msk.bf16.gmra.mxu3 %vm1775_vm6, %v1720_v19 }
 0x1e1   :  { %v776_v41 = vmul.f32 %v2914_v16, %v687_v32  ;;  %v580_v45 = vpop.xlane.xlu1 %579  ;;  %v769_v56 = vsub.f32 1.5, %v768_v39  ;;  %vm782_vm10 = vweird.f32 %v2914_v16  ;;  %v4062_v1 = vpop.eup %2915  ;;  %v1229_v58 = vmul.f32 %v4083_v42, %v4083_v42 }
 0x1e2   :  { %v608_v55 = vmul.f32 %v580_v45, %v3417_v47  ;;  %501 = vadd.xlane.f32.xlu2 %v500_v57  ;;  %vm783_vm12 = vmor %vm781_vm11, %vm782_vm10  ;;  %v4066_v13 = vpop.eup %2917  ;;  %v4068_v32 = vpop.f32.mrf.mxu1  ;;  %vm742_vm1 = vweird.f32 %v4062_v1 }
 0x1e3   :  { %v777_v18 = vmul.f32 %v2914_v16, %v776_v41  ;;  %v770_v50 = vmul.f32 %v2912_v9, %v769_v56  ;;  %v746_v48 = vmul.f32 %v4066_v13, %v4044_v51  ;;  %v549_v37 = vmul.f32 %v4068_v32, %v4068_v32  ;;  %vm743_vm4 = vmor %vm741_vm3, %vm742_vm1 }
 0x1e4   :  { %v640_v2 = vsub.f32 %v608_v55, %v624_v31  ;;  %v506_v60 = vsel %vm98_vm0, %v4068_v32, 0.0  ;;  %vm752_vm2 = vweird.f32 %v4066_v13 }
 0x1e5   :  { %v778_v4 = vmul.f32 0.5, %v777_v18  ;;  %v774_v14 = vsel %vm773_vm9, %v2912_v9, %v770_v50  ;;  %v736_v9 = vmul.f32 %v4062_v1, %v4042_v63  ;;  %v747_v23 = vmul.f32 %v4066_v13, %v746_v48  ;;  %vm753_vm8 = vmor %vm751_vm7, %vm752_vm2 }
 0x1e6   :  { %v656_v22 = vmax.f32 %v640_v2, 0.0  ;;  %v4054_v33 = vmul.f32 %v774_v14, %v670_v17  ;;  %v593_v45 = vsel %vm98_vm0, %v549_v37, 0.0  ;;  %v668_v63 = vsub.f32 %v3499_v3, %v4006_v11 }
 0x1e7   :  { %v779_v52 = vsub.f32 1.5, %v778_v4  ;;  %v737_v6 = vmul.f32 %v4062_v1, %v736_v9  ;;  %v748_v39 = vmul.f32 0.5, %v747_v23  ;;  %v4135_v3 = vmul.f32 %v3680_v0, %v3417_v47 }
 0x1e8   :  { %v688_v26 = vadd.f32 1e-05, %v656_v22 }
 0x1e9   :  { %v780_v30 = vmul.f32 %v2914_v16, %v779_v52  ;;  %v749_v50 = vsub.f32 1.5, %v748_v39  ;;  %v4113_v52 = vmul.f32 %v3417_v47, %v3926_v59 }
 0x1ea   :  { %2919 = vrsqrt.f32 %v688_v26  ;;  %588 = vadd.xlane.f32.xlu2 %v587_v49  ;;  %vm791_vm14 = vweird.f32 %v688_v26  ;;  %v4089_v57 = vpop.f32.mrf.mxu1 }
 0x1eb   :  { %v784_v44 = vsel %vm783_vm12, %v2914_v16, %v780_v30  ;;  %v738_v16 = vmul.f32 0.5, %v737_v6  ;;  %v550_v2 = vmul.f32 %v4089_v57, %v4089_v57  ;;  %v750_v14 = vmul.f32 %v4066_v13, %v749_v50 }
 0x1ec   :  { %v4060_v62 = vmul.f32 %v784_v44, %v671_v29  ;;  %v2740_v30 = vunpack.c.h.bf16 %v2756_v54  ;;  %v667_v29 = vsub.f32 %v3482_v40, %v4012_v38  ;;  %v621_v59 = vmul.f32 %v4113_v52, %v4113_v52 }
 0x1ed   :  { %504 = vadd.xlane.f32.xlu0 %v503_v10  ;;  %v739_v31 = vsub.f32 1.5, %v738_v16  ;;  %v596_v22 = vsel %vm98_vm0, %v550_v2, 0.0  ;;  %v754_v44 = vsel %vm753_vm8, %v4066_v13, %v750_v14  ;;  %v1228_v13 = vmul.f32 %v4135_v3, %v4135_v3 }
 0x1ee   :  { %v860_v48 = vmul.f32 %v754_v44, %v668_v63  ;;  %v2759_v63 = vld [vmem:[%s4734_s27 + $0x38] sm:$0xff]  }
 0x1ef   :  { %v740_v21 = vmul.f32 %v4062_v1, %v739_v31 }
 0x1f0   :  { %v2920_v27 = vpop.eup %2919  ;;  %v879_v28 = vmul.f32 %v3923_v61, %v860_v48  ;;  %v2751_v48 = vunpack.c.l.bf16 %v2759_v63 }
 0x1f1   :  { %v786_v8 = vmul.f32 %v2920_v27, %v688_v26  ;;  %vm792_vm13 = vweird.f32 %v2920_v27  ;;  %v2739_v26 = vunpack.c.l.bf16 %v2756_v54  ;;  %v744_v49 = vsel %vm743_vm4, %v4062_v1, %v740_v21 }
 0x1f2   :  { %591 = vadd.xlane.f32.xlu2 %v590_v46  ;;  %v1193_v36 = vpop.xlane.xlu0 %1192  ;;  %vm793_vm15 = vmor %vm791_vm14, %vm792_vm13  ;;  %v859_v9 = vmul.f32 %v744_v49, %v667_v29 }
 0x1f3   :  { %v787_v12 = vmul.f32 %v2920_v27, %v786_v8  ;;  %v1213_v20 = vmul.f32 %v1193_v36, %v3417_v47  ;;  %v637_v8 = vsub.f32 %v605_v35, %v621_v59 }
 0x1f4   :  { %v878_v11 = vmul.f32 %v3923_v61, %v859_v9 }
 0x1f5   :  { %v788_v5 = vmul.f32 0.5, %v787_v12  ;;  %v1245_v19 = vsub.f32 %v1213_v20, %v1229_v58  ;;  %594 = vadd.xlane.f32.xlu0 %v593_v45  ;;  %v653_v10 = vmax.f32 %v637_v8, 0.0  ;;  %v2757_v20 = vld [vmem:[%s4734_s27 + $0x28] sm:$0xff]   ;;  %v2752_v8 = vunpack.c.h.bf16 %v2759_v63  ;;  %v4761_v63 = vld [vmem:[#allocation8_spill] sm:$0xff] }
 0x1f6   :  { %v897_v23 = vadd.f32 %v3954_v53, %v878_v11  ;;  %v2743_v2 = vunpack.c.l.bf16 %v2757_v20 }
 0x1f7   :  { %v789_v24 = vsub.f32 1.5, %v788_v5  ;;  %v1261_v18 = vmax.f32 %v1245_v19, 0.0  ;;  %v4154_v39 = vadd.f32 1e-05, %v653_v10 }
 0x1f8   :  { %v913_v19 = vmax.f32 %v897_v23, 0.0 }
 0x1f9   :  { %v790_v41 = vmul.f32 %v2920_v27, %v789_v24  ;;  %v4097_v17 = vadd.f32 1e-05, %v1261_v18  ;;  %v2805_v0 = vpop.permute.xlu1 %2804  ;;  %v898_v24 = vadd.f32 %v3954_v53, %v879_v28  ;;  %v4759_v28 = vld [vmem:[#allocation7_spill] sm:$0xff]  ;;  %vm761_vm1 = vweird.f32 %v4154_v39 }
 0x1fa   :  { %v1116_v4 = vpop.xlane.xlu0 %1115  ;;  %v2807_v45 = vunpack.i.h.bf16 %v2805_v0 }
 0x1fb   :  { %v794_v56 = vsel %vm793_vm15, %v2920_v27, %v790_v41  ;;  %2921 = vrsqrt.f32 %v4097_v17  ;;  %v2828_v27 = vpack.i.bf16 %v2740_v30, %v2739_v26  ;;  %v4144_v6 = vmul.f32 %v1116_v4, %v3417_v47 }
 0x1fc   :  { %v4093_v55 = vmul.f32 %v794_v56, %v672_v7  ;;  %507 = vadd.xlane.f32.xlu1 %v506_v60  ;;  %v2806_v7 = vunpack.i.l.bf16 %v2805_v0  ;;  %v914_v31 = vmax.f32 %v898_v24, 0.0  ;;  %v2744_v4 = vunpack.c.h.bf16 %v2757_v20 }
 0x1fd   :  { %597 = vadd.xlane.f32.xlu0 %v596_v22  ;;  %v1230_v36 = vmul.f32 %v4144_v6, %v4144_v6  ;;  %vm1432_vm10 = vweird.f32 %v4097_v17 }
 0x1fe   :  { %v1691_v14 = vsel %vm98_vm0, %v914_v31, %v2807_v45  ;;  %v1690_v22 = vsel %vm98_vm0, %v913_v19, %v2806_v7  ;;  %v2838_v44 = vpack.i.bf16 %v2744_v4, %v2743_v2 }
 0x201   :  { %v4126_v51 = vpop.eup %2921 }
 0x202   :  { %v4128_v1 = vpop.xlane.xlu0 %1118  ;;  %v1427_v40 = vmul.f32 %v4126_v51, %v4097_v17  ;;  %vm1433_vm9 = vweird.f32 %v4126_v51  ;;  %v2858_v17 = vpack.i.bf16 %v2752_v8, %v2751_v48 }
 0x203   :  { %vm1434_vm11 = vmor %vm1432_vm10, %vm1433_vm9  ;;  %v4199_v19 = vmul.f32 %v4128_v1, %v3417_v47 }
 0x204   :  { %v1428_v12 = vmul.f32 %v4126_v51, %v1427_v40 }
 0x206   :  { %v1429_v41 = vmul.f32 0.5, %v1428_v12 }
 0x208   :  { %v1430_v60 = vsub.f32 1.5, %v1429_v41 }
 0x20a   :  { %2829 = vrot.lane.b32.xlu2 %v2828_v27, %s3012_s7  ;;  %v1196_v37 = vpop.xlane.xlu0 %1195  ;;  %v1431_v59 = vmul.f32 %v4126_v51, %v1430_v60 }
 0x20b   :  { %v1214_v58 = vmul.f32 %v1196_v37, %v3417_v47 }
 0x20c   :  { %v1190_v38 = vpop.xlane.xlu2 %1189  ;;  %v1435_v40 = vsel %vm1434_vm11, %v4126_v51, %v1431_v59  ;;  %v4760_v51 = vld [vmem:[#allocation6_spill] sm:$0xff]  ;;  %v669_v59 = vsub.f32 %v4761_v63, %v4113_v52  ;;  %v4762_v52 = vld [vmem:[#allocation9_spill] sm:$0xff] }
 0x20d   :  { %v1212_v46 = vmul.f32 %v1190_v38, %v3417_v47  ;;  %v1246_v18 = vsub.f32 %v1214_v58, %v1230_v36  ;;  %v1277_v38 = vsub.f32 %v4759_v28, %v4083_v42  ;;  %v1276_v37 = vsub.f32 %v4760_v51, %v4135_v3  ;;  %v4186_v42 = vld [vmem:[%s4696_s11] ss:$0 sm:$0xff] }
 0x20e   :  { %v4194_v3 = vld [vmem:[%s4697_s12] ss:$0 sm:$0xff] }
 0x20f   :  { %v1244_v5 = vsub.f32 %v1212_v46, %v1228_v13  ;;  %v1262_v49 = vmax.f32 %v1246_v18, 0.0  ;;  %v1469_v10 = vmul.f32 %v1435_v40, %v1277_v38 }
 0x211   :  { %v1260_v16 = vmax.f32 %v1244_v5, 0.0  ;;  %2834 = vrot.lane.b32.xlu0 %v3734_v15, %s3014_s25  ;;  %v4170_v9 = vadd.f32 1e-05, %v1262_v49  ;;  %v1488_v24 = vmul.f32 %v4186_v42, %v1469_v10 }
 0x212   :  { %v4178_v23 = vpop.xlane.xlu0 %498 }
 0x213   :  { %v1292_v56 = vadd.f32 1e-05, %v1260_v16  ;;  %v1507_v7 = vadd.f32 %v4194_v3, %v1488_v24  ;;  %vm1442_vm3 = vweird.f32 %v4170_v9  ;;  %v4241_v63 = vmul.f32 %v3417_v47, %v4178_v23 }
 0x214   :  { %v2810_v50 = vpop.permute.xlu2 %2809 }
 0x215   :  { %2923 = vrsqrt.f32 %v1292_v56  ;;  %v2812_v54 = vunpack.i.h.bf16 %v2810_v50  ;;  %v2811_v21 = vunpack.i.l.bf16 %v2810_v50  ;;  %2839 = vrot.lane.b32.xlu1 %v2838_v44, %s3012_s7  ;;  %vm1422_vm13 = vweird.f32 %v1292_v56 }
 0x216   :  { %2925 = vrsqrt.f32 %v4154_v39  ;;  %v1231_v50 = vmul.f32 %v4199_v19, %v4199_v19  ;;  %v1523_v60 = vmax.f32 %v1507_v7, 0.0 }
 0x217   :  { %v1707_v26 = vsel %vm1702_vm5, %v1690_v22, %v2811_v21  ;;  %v1708_v30 = vsel %vm1702_vm5, %v1691_v14, %v2812_v54  ;;  %2927 = vrsqrt.f32 %v4170_v9 }
 0x218   :  { %v1721_v29 = vpack.c.bf16 %v1708_v30, %v1707_v26 }
 0x21a   :  { %2663 = vmatmul.msk.bf16.gmra.mxu3 %vm1775_vm6, %v1721_v29  ;;  %v4204_v2 = vpop.xlane.xlu0 %582  ;;  %v509_v29 = vsel %vm98_vm0, %v4089_v57, 0.0 }
 0x21b   :  { %v2924_v35 = vpop.eup %2923 }
 0x21c   :  { %v2926_v15 = vpop.eup %2925  ;;  %v1417_v27 = vmul.f32 %v2924_v35, %v1292_v56  ;;  %vm1423_vm12 = vweird.f32 %v2924_v35 }
 0x21d   :  { %v756_v13 = vmul.f32 %v2926_v15, %v4154_v39  ;;  %2859 = vrot.lane.b32.xlu1 %v2858_v17, %s3012_s7  ;;  %vm1424_vm14 = vmor %vm1422_vm13, %vm1423_vm12  ;;  %v2928_v36 = vpop.eup %2927  ;;  %vm762_vm15 = vweird.f32 %v2926_v15 }
 0x21e   :  { %v1418_v11 = vmul.f32 %v2924_v35, %v1417_v27  ;;  %v1437_v41 = vmul.f32 %v2928_v36, %v4170_v9  ;;  %vm763_vm2 = vmor %vm761_vm1, %vm762_vm15  ;;  %vm1443_vm4 = vweird.f32 %v2928_v36 }
 0x21f   :  { %v757_v0 = vmul.f32 %v2926_v15, %v756_v13  ;;  %vm1444_vm7 = vmor %vm1442_vm3, %vm1443_vm4  ;;  %v1278_v13 = vsub.f32 %v4762_v52, %v4144_v6 }
 0x220   :  { %v1419_v46 = vmul.f32 0.5, %v1418_v11  ;;  %v1438_v54 = vmul.f32 %v2928_v36, %v1437_v41  ;;  %v881_v11 = vmul.f32 %v3923_v61, %v4054_v33 }
 0x221   :  { %v758_v16 = vmul.f32 0.5, %v757_v0 }
 0x222   :  { %v1420_v12 = vsub.f32 1.5, %v1419_v46  ;;  %v1439_v30 = vmul.f32 0.5, %v1438_v54  ;;  %v586_v48 = vpop.xlane.xlu0 %585  ;;  %v900_v17 = vadd.f32 %v3954_v53, %v881_v11 }
 0x223   :  { %v759_v56 = vsub.f32 1.5, %v758_v16 }
 0x224   :  { %v1421_v5 = vmul.f32 %v2924_v35, %v1420_v12  ;;  %v1199_v31 = vpop.xlane.xlu1 %1198  ;;  %v2758_v12 = vld [vmem:[%s4734_s27 + $0x30] sm:$0xff]   ;;  %v916_v24 = vmax.f32 %v900_v17, 0.0 }
 0x225   :  { %v1215_v4 = vmul.f32 %v1199_v31, %v3417_v47  ;;  %v760_v22 = vmul.f32 %v2926_v15, %v759_v56  ;;  %v2748_v16 = vunpack.c.h.bf16 %v2758_v12 }
 0x226   :  { %v1425_v58 = vsel %vm1424_vm14, %v2924_v35, %v1421_v5  ;;  %v1440_v35 = vsub.f32 1.5, %v1439_v30 }
 0x227   :  { %v1468_v20 = vmul.f32 %v1425_v58, %v1276_v37  ;;  %v1247_v14 = vsub.f32 %v1215_v4, %v1231_v50  ;;  %v764_v44 = vsel %vm763_vm2, %v2926_v15, %v760_v22  ;;  %v2747_v58 = vunpack.c.l.bf16 %v2758_v12 }
 0x228   :  { %v861_v27 = vmul.f32 %v764_v44, %v669_v59  ;;  %v1441_v39 = vmul.f32 %v2928_v36, %v1440_v35  ;;  %v626_v59 = vmul.f32 %v4241_v63, %v4241_v63  ;;  %v609_v35 = vmul.f32 %v4204_v2, %v3417_v47 }
 0x229   :  { %v1487_v45 = vmul.f32 %v4186_v42, %v1468_v20  ;;  %v1263_v1 = vmax.f32 %v1247_v14, 0.0  ;;  %v4763_v20 = vld [vmem:[#allocation10_spill] sm:$0xff]  ;;  %v2848_v14 = vpack.i.bf16 %v2748_v16, %v2747_v58  ;;  %v882_v2 = vmul.f32 %v3923_v61, %v4060_v62 }
 0x22a   :  { %v880_v40 = vmul.f32 %v3923_v61, %v861_v27  ;;  %v1445_v28 = vsel %vm1444_vm7, %v2928_v36, %v1441_v39  ;;  %v1279_v41 = vsub.f32 %v4763_v20, %v4199_v19 }
 0x22b   :  { %v1506_v18 = vadd.f32 %v4194_v3, %v1487_v45  ;;  %v1295_v49 = vadd.f32 1e-05, %v1263_v1  ;;  %v1470_v0 = vmul.f32 %v1445_v28, %v1278_v13 }
 0x22c   :  { %v899_v46 = vadd.f32 %v3954_v53, %v880_v40 }
 0x22d   :  { %v1522_v21 = vmax.f32 %v1506_v18, 0.0  ;;  %2929 = vrsqrt.f32 %v1295_v49  ;;  %vm1452_vm9 = vweird.f32 %v1295_v49  ;;  %v1489_v56 = vmul.f32 %v4186_v42, %v1470_v0 }
 0x22e   :  { %v915_v37 = vmax.f32 %v899_v46, 0.0  ;;  %v883_v46 = vmul.f32 %v3923_v61, %v4093_v55  ;;  %v901_v0 = vadd.f32 %v3954_v53, %v882_v2 }
 0x22f   :  { %v2843_v26 = vpack.i.bf16 %v1523_v60, %v1522_v21  ;;  %v1508_v19 = vadd.f32 %v4194_v3, %v1489_v56 }
 0x231   :  { %2844 = vrot.lane.b32.xlu0 %v2843_v26, %s3014_s25  ;;  %v1524_v1 = vmax.f32 %v1508_v19, 0.0 }
 0x233   :  { %510 = vadd.xlane.f32.xlu2 %v509_v29  ;;  %v2930_v8 = vpop.eup %2929 }
 0x234   :  { %v1447_v15 = vmul.f32 %v2930_v8, %v1295_v49  ;;  %vm1453_vm8 = vweird.f32 %v2930_v8 }
 0x235   :  { %v2815_v9 = vpop.permute.xlu0 %2814  ;;  %vm1454_vm10 = vmor %vm1452_vm9, %vm1453_vm8 }
 0x236   :  { %v1448_v38 = vmul.f32 %v2930_v8, %v1447_v15  ;;  %v2817_v33 = vunpack.i.h.bf16 %v2815_v9  ;;  %v2816_v51 = vunpack.i.l.bf16 %v2815_v9 }
 0x238   :  { %v1449_v10 = vmul.f32 0.5, %v1448_v38  ;;  %v1693_v18 = vsel %vm98_vm0, %v916_v24, %v2817_v33  ;;  %v1692_v50 = vsel %vm98_vm0, %v915_v37, %v2816_v51  ;;  %v902_v33 = vadd.f32 %v3954_v53, %v883_v46 }
 0x23a   :  { %v1450_v5 = vsub.f32 1.5, %v1449_v10  ;;  %v918_v58 = vmax.f32 %v902_v33, 0.0 }
 0x23c   :  { %v1451_v36 = vmul.f32 %v2930_v8, %v1450_v5  ;;  %v2820_v6 = vpop.permute.xlu1 %2819 }
 0x23d   :  { %v2822_v45 = vunpack.i.h.bf16 %v2820_v6  ;;  %v2821_v7 = vunpack.i.l.bf16 %v2820_v6 }
 0x23e   :  { %v1455_v31 = vsel %vm1454_vm10, %v2930_v8, %v1451_v36  ;;  %v917_v36 = vmax.f32 %v901_v0, 0.0 }
 0x23f   :  { %v1709_v4 = vsel %vm1702_vm5, %v1692_v50, %v2821_v7  ;;  %v1710_v54 = vsel %vm1702_vm5, %v1693_v18, %v2822_v45  ;;  %v1471_v21 = vmul.f32 %v1455_v31, %v1279_v41 }
 0x240   :  { %v1722_v60 = vpack.c.bf16 %v1710_v54, %v1709_v4 }
 0x241   :  { %v1490_v22 = vmul.f32 %v4186_v42, %v1471_v21  ;;  %v610_v42 = vmul.f32 %v586_v48, %v3417_v47 }
 0x242   :  { %2664 = vmatmul.msk.bf16.gmra.mxu3 %vm1775_vm6, %v1722_v60 }
 0x243   :  { %v1509_v26 = vadd.f32 %v4194_v3, %v1490_v22  ;;  %v642_v27 = vsub.f32 %v610_v42, %v626_v59 }
 0x244   :  { %v2825_v5 = vpop.permute.xlu1 %2824 }
 0x245   :  { %v1525_v30 = vmax.f32 %v1509_v26, 0.0  ;;  %v658_v23 = vmax.f32 %v642_v27, 0.0  ;;  %v2827_v37 = vunpack.i.h.bf16 %v2825_v5  ;;  %v2826_v24 = vunpack.i.l.bf16 %v2825_v5 }
 0x247   :  { %v2853_v44 = vpack.i.bf16 %v1525_v30, %v1524_v1  ;;  %v4253_v15 = vadd.f32 1e-05, %v658_v23  ;;  %v1695_v50 = vsel %vm98_vm0, %v918_v58, %v2827_v37  ;;  %v1694_v4 = vsel %vm98_vm0, %v917_v36, %v2826_v24 }
 0x249   :  { %2854 = vrot.lane.b32.xlu0 %v2853_v44, %s3014_s25  ;;  %2931 = vrsqrt.f32 %v4253_v15  ;;  %vm811_vm13 = vweird.f32 %v4253_v15 }
 0x24b   :  { %2849 = vrot.lane.b32.xlu2 %v2848_v14, %s3012_s7 }
 0x24d   :  { %v496_v49 = vpop.xlane.xlu2 %495 }
 0x24e   :  { %v4237_v29 = vmul.f32 %v3417_v47, %v496_v49 }
 0x24f   :  { %v4267_v17 = vpop.eup %2931 }
 0x250   :  { %v625_v3 = vmul.f32 %v4237_v29, %v4237_v29  ;;  %v806_v62 = vmul.f32 %v4267_v17, %v4253_v15  ;;  %vm812_vm11 = vweird.f32 %v4267_v17  ;;  %v673_v15 = vsub.f32 %v3723_v34, %v4237_v29 }
 0x251   :  { %vm813_vm14 = vmor %vm811_vm13, %vm812_vm11 }
 0x252   :  { %v641_v8 = vsub.f32 %v609_v35, %v625_v3  ;;  %v807_v45 = vmul.f32 %v4267_v17, %v806_v62  ;;  %v4764_v62 = vld [vmem:[#allocation11_spill] sm:$0xff] }
 0x253   :  { %v4251_v40 = vpop.f32.mrf.mxu3 }
 0x254   :  { %v657_v11 = vmax.f32 %v641_v8, 0.0  ;;  %v1915_v18 = vmul.f32 %v4251_v40, %v4251_v40  ;;  %v808_v30 = vmul.f32 0.5, %v807_v45 }
 0x255   :  { %v502_v39 = vpop.xlane.xlu2 %501 }
 0x256   :  { %v4255_v48 = vadd.f32 1e-05, %v657_v11  ;;  %v4287_v56 = vmul.f32 %v3417_v47, %v502_v39  ;;  %v1931_v42 = vsel %vm98_vm0, %v1915_v18, 0.0  ;;  %v809_v35 = vsub.f32 1.5, %v808_v30 }
 0x257   :  { %v1851_v11 = vsel %vm98_vm0, %v4251_v40, 0.0 }
 0x258   :  { %2933 = vrsqrt.f32 %v4255_v48  ;;  %v627_v44 = vmul.f32 %v4287_v56, %v4287_v56  ;;  %vm801_vm15 = vweird.f32 %v4255_v48 }
 0x25b   :  { %v4257_v38 = vpop.f32.mrf.mxu3 }
 0x25c   :  { %v1854_v52 = vsel %vm98_vm0, %v4257_v38, 0.0 }
 0x25d   :  { %v589_v28 = vpop.xlane.xlu2 %588  ;;  %1855 = vadd.xlane.f32.xlu1 %v1854_v52  ;;  %v810_v52 = vmul.f32 %v4267_v17, %v809_v35 }
 0x25e   :  { %v4271_v10 = vpop.eup %2933  ;;  %v611_v21 = vmul.f32 %v589_v28, %v3417_v47 }
 0x25f   :  { %v796_v55 = vmul.f32 %v4271_v10, %v4255_v48  ;;  %vm802_vm12 = vweird.f32 %v4271_v10  ;;  %v814_v5 = vsel %vm813_vm14, %v4267_v17, %v810_v52 }
 0x260   :  { %v505_v51 = vpop.xlane.xlu0 %504  ;;  %v643_v3 = vsub.f32 %v611_v21, %v627_v44  ;;  %vm803_vm1 = vmor %vm801_vm15, %vm802_vm12 }
 0x261   :  { %v4282_v16 = vmul.f32 %v3417_v47, %v505_v51  ;;  %v797_v7 = vmul.f32 %v4271_v10, %v796_v55  ;;  %v674_v55 = vsub.f32 %v4764_v62, %v4241_v63 }
 0x262   :  { %v659_v23 = vmax.f32 %v643_v3, 0.0 }
 0x263   :  { %v4269_v9 = vpop.f32.mrf.mxu3  ;;  %v628_v19 = vmul.f32 %v4282_v16, %v4282_v16  ;;  %v798_v49 = vmul.f32 0.5, %v797_v7  ;;  %v866_v37 = vmul.f32 %v814_v5, %v674_v55  ;;  %v675_v5 = vsub.f32 %v4028_v43, %v4287_v56 }
 0x264   :  { %v1857_v12 = vsel %vm98_vm0, %v4269_v9, 0.0  ;;  %v1917_v8 = vmul.f32 %v4269_v9, %v4269_v9  ;;  %v691_v46 = vadd.f32 1e-05, %v659_v23 }
 0x265   :  { %v592_v13 = vpop.xlane.xlu2 %591  ;;  %1858 = vadd.xlane.f32.xlu1 %v1857_v12  ;;  %v799_v27 = vsub.f32 1.5, %v798_v49  ;;  %v1916_v12 = vmul.f32 %v4257_v38, %v4257_v38 }
 0x266   :  { %v612_v22 = vmul.f32 %v592_v13, %v3417_v47  ;;  %v1937_v13 = vsel %vm98_vm0, %v1917_v8, 0.0  ;;  %2935 = vrsqrt.f32 %v691_v46  ;;  %vm821_vm4 = vweird.f32 %v691_v46 }
 0x267   :  { %v800_v2 = vmul.f32 %v4271_v10, %v799_v27  ;;  %v1934_v48 = vsel %vm98_vm0, %v1916_v12, 0.0 }
 0x268   :  { %v644_v59 = vsub.f32 %v612_v22, %v628_v19  ;;  %v595_v39 = vpop.xlane.xlu0 %594 }
 0x269   :  { %v804_v33 = vsel %vm803_vm1, %v4271_v10, %v800_v2  ;;  %v885_v10 = vmul.f32 %v3923_v61, %v866_v37  ;;  %v2981_v37 = vld [vmem:[%s4693_s8] ss:$0 sm:$0xff] }
 0x26a   :  { %v660_v28 = vmax.f32 %v644_v59, 0.0  ;;  %v865_v24 = vmul.f32 %v804_v33, %v673_v15 }
 0x26b   :  { %v4289_v31 = vpop.f32.mrf.mxu3  ;;  %v904_v45 = vadd.f32 %v3954_v53, %v885_v10 }
 0x26c   :  { %v1918_v54 = vmul.f32 %v4289_v31, %v4289_v31  ;;  %v692_v0 = vadd.f32 1e-05, %v660_v28  ;;  %v884_v17 = vmul.f32 %v3923_v61, %v865_v24  ;;  %v1860_v29 = vsel %vm98_vm0, %v4289_v31, 0.0 }
 0x26d   :  { %v2830_v6 = vpop.permute.xlu2 %2829 }
 0x26e   :  { %v2832_v20 = vunpack.i.h.bf16 %v2830_v6  ;;  %v2831_v41 = vunpack.i.l.bf16 %v2830_v6  ;;  %v1940_v26 = vsel %vm98_vm0, %v1918_v54, 0.0  ;;  %2937 = vrsqrt.f32 %v692_v0  ;;  %v2936_v6 = vpop.eup %2935 }
 0x26f   :  { %1941 = vadd.xlane.f32.xlu1 %v1940_v26  ;;  %v508_v36 = vpop.xlane.xlu1 %507  ;;  %vm822_vm2 = vweird.f32 %v2936_v6  ;;  %vm831_vm8 = vweird.f32 %v692_v0 }
 0x270   :  { %v1711_v60 = vsel %vm1702_vm5, %v1694_v4, %v2831_v41  ;;  %v1712_v14 = vsel %vm1702_vm5, %v1695_v50, %v2832_v20  ;;  %v4327_v51 = vpop.xlane.xlu0 %597  ;;  %v4333_v63 = vmul.f32 %v3417_v47, %v508_v36  ;;  %v903_v20 = vadd.f32 %v3954_v53, %v884_v17  ;;  %vm823_vm7 = vmor %vm821_vm4, %vm822_vm2 }
 0x271   :  { %v1723_v1 = vpack.c.bf16 %v1712_v14, %v1711_v60  ;;  %v816_v41 = vmul.f32 %v2936_v6, %v691_v46  ;;  %v613_v4 = vmul.f32 %v595_v39, %v3417_v47  ;;  %v920_v60 = vmax.f32 %v904_v45, 0.0 }
 0x272   :  { %v629_v18 = vmul.f32 %v4333_v63, %v4333_v63  ;;  %v919_v54 = vmax.f32 %v903_v20, 0.0  ;;  %v676_v46 = vsub.f32 %v4051_v25, %v4282_v16 }
 0x273   :  { %2665 = vmatmul.msk.bf16.gmra.mxu3 %vm1775_vm6, %v1723_v1  ;;  %1852 = vadd.xlane.f32.xlu0 %v1851_v11  ;;  %v817_v21 = vmul.f32 %v2936_v6, %v816_v41 }
 0x274   :  { %1932 = vadd.xlane.f32.xlu2 %v1931_v42  ;;  %v2938_v58 = vpop.eup %2937  ;;  %v645_v19 = vsub.f32 %v613_v4, %v629_v18 }
 0x275   :  { %v826_v7 = vmul.f32 %v2938_v58, %v692_v0  ;;  %v818_v3 = vmul.f32 0.5, %v817_v21  ;;  %vm832_vm3 = vweird.f32 %v2938_v58 }
 0x276   :  { %v661_v35 = vmax.f32 %v645_v19, 0.0  ;;  %vm833_vm9 = vmor %vm831_vm8, %vm832_vm3 }
 0x277   :  { %v827_v22 = vmul.f32 %v2938_v58, %v826_v7  ;;  %v819_v27 = vsub.f32 1.5, %v818_v3 }
 0x278   :  { %v4347_v8 = vadd.f32 1e-05, %v661_v35 }
 0x279   :  { %v828_v59 = vmul.f32 0.5, %v827_v22  ;;  %v820_v23 = vmul.f32 %v2936_v6, %v819_v27 }
 0x27a   :  { %2939 = vrsqrt.f32 %v4347_v8  ;;  %vm841_vm11 = vweird.f32 %v4347_v8 }
 0x27b   :  { %1935 = vadd.xlane.f32.xlu0 %v1934_v48  ;;  %v829_v39 = vsub.f32 1.5, %v828_v59  ;;  %v677_v59 = vsub.f32 %v4068_v32, %v4333_v63 }
 0x27c   :  { %1938 = vadd.xlane.f32.xlu2 %v1937_v13  ;;  %v824_v13 = vsel %vm823_vm7, %v2936_v6, %v820_v23  ;;  %v614_v6 = vmul.f32 %v4327_v51, %v3417_v47 }
 0x27d   :  { %v830_v11 = vmul.f32 %v2938_v58, %v829_v39  ;;  %v867_v62 = vmul.f32 %v824_v13, %v675_v5 }
 0x27f   :  { %v834_v12 = vsel %vm833_vm9, %v2938_v58, %v830_v11  ;;  %v886_v36 = vmul.f32 %v2981_v37, %v867_v62 }
 0x280   :  { %v2940_v33 = vpop.eup %2939  ;;  %v868_v55 = vmul.f32 %v834_v12, %v676_v46 }
 0x281   :  { %v836_v15 = vmul.f32 %v2940_v33, %v4347_v8  ;;  %vm842_vm10 = vweird.f32 %v2940_v33 }
 0x282   :  { %v887_v24 = vmul.f32 %v2981_v37, %v868_v55  ;;  %vm843_vm12 = vmor %vm841_vm11, %vm842_vm10 }
 0x283   :  { %v2835_v34 = vpop.permute.xlu0 %2834  ;;  %1861 = vadd.xlane.f32.xlu0 %v1860_v29  ;;  %v837_v17 = vmul.f32 %v2940_v33, %v836_v15  ;;  %v2982_v29 = vld [vmem:[%s4694_s9] ss:$0 sm:$0xff] }
 0x284   :  { %v2837_v61 = vunpack.i.h.bf16 %v2835_v34  ;;  %v2836_v50 = vunpack.i.l.bf16 %v2835_v34  ;;  %v906_v20 = vadd.f32 %v2982_v29, %v887_v24  ;;  %v905_v41 = vadd.f32 %v2982_v29, %v886_v36 }
 0x285   :  { %v838_v7 = vmul.f32 0.5, %v837_v17 }
 0x286   :  { %v1697_v30 = vsel %vm98_vm0, %v920_v60, %v2837_v61  ;;  %v1696_v53 = vsel %vm98_vm0, %v919_v54, %v2836_v50  ;;  %v922_v4 = vmax.f32 %v906_v20, 0.0  ;;  %v921_v54 = vmax.f32 %v905_v41, 0.0  ;;  %v2698_v41 = vld [vmem:[%s4702_s17 + $0x8] sm:$0xff] }
 0x287   :  { %v2840_v14 = vpop.permute.xlu1 %2839  ;;  %v839_v22 = vsub.f32 1.5, %v838_v7  ;;  %108 = vmatpush.bf16.msra.mxu0 %v2698_v41  ;;  %v2697_v7 = vld [vmem:[%s4702_s17] sm:$0xff]  ;;  %s2555_s17 = sshll.u32 %s4708_s23, 4  ;;  %s2556_s17 = int_to_ptr.hbm [resolvable:$true] %s2555_s17 }
 0x288   :  { %v2842_v26 = vunpack.i.h.bf16 %v2840_v14  ;;  %v2841_v1 = vunpack.i.l.bf16 %v2840_v14 }
 0x28a   :  { %v1713_v49 = vsel %vm1702_vm5, %v1696_v53, %v2841_v1  ;;  %v1714_v44 = vsel %vm1702_vm5, %v1697_v30, %v2842_v26 }
 0x28b   :  { %v1724_v42 = vpack.c.bf16 %v1714_v44, %v1713_v49  ;;  %v840_v49 = vmul.f32 %v2940_v33, %v839_v22  ;;  %109 = vmatpush.bf16.msra.mxu0 %v2697_v7 }
 0x28d   :  { %2666 = vmatmul.msk.bf16.gmra.mxu3 %vm1775_vm6, %v1724_v42  ;;  %v844_v42 = vsel %vm843_vm12, %v2940_v33, %v840_v49 }
 0x28e   :  { %v869_v27 = vmul.f32 %v844_v42, %v677_v59 }
 0x28f   :  { %v2860_v33 = vpop.permute.xlu1 %2859 }
 0x290   :  { %v888_v11 = vmul.f32 %v2981_v37, %v869_v27  ;;  %v2862_v63 = vunpack.i.h.bf16 %v2860_v33  ;;  %v2861_v55 = vunpack.i.l.bf16 %v2860_v33 }
 0x292   :  { %v907_v12 = vadd.f32 %v2982_v29, %v888_v11  ;;  %v2717_v11 = vld [vmem:[%s4701_s16] sm:$0xff] }
 0x294   :  { %v923_v62 = vmax.f32 %v907_v12, 0.0 }
 0x29d   :  { %v4350_v28 = vpop.f32.mrf.mxu3 }
 0x29e   :  { %v1863_v52 = vsel %vm98_vm0, %v4350_v28, 0.0  ;;  %v1919_v2 = vmul.f32 %v4350_v28, %v4350_v28 }
 0x29f   :  { %1864 = vadd.xlane.f32.xlu0 %v1863_v52 }
 0x2a0   :  { %v1943_v0 = vsel %vm98_vm0, %v1919_v2, 0.0 }
 0x2a1   :  { %1944 = vadd.xlane.f32.xlu1 %v1943_v0 }
 0x2a3   :  { %v2845_v58 = vpop.permute.xlu0 %2844 }
 0x2a4   :  { %v2847_v18 = vunpack.i.h.bf16 %v2845_v58  ;;  %v2846_v61 = vunpack.i.l.bf16 %v2845_v58 }
 0x2a5   :  { %v4362_v48 = vpop.f32.mrf.mxu3 }
 0x2a6   :  { %v511_v43 = vpop.xlane.xlu2 %510  ;;  %v1866_v25 = vsel %vm98_vm0, %v4362_v48, 0.0  ;;  %v1920_v16 = vmul.f32 %v4362_v48, %v4362_v48  ;;  %v1699_v19 = vsel %vm98_vm0, %v922_v4, %v2847_v18  ;;  %v1698_v26 = vsel %vm98_vm0, %v921_v54, %v2846_v61  ;;  %v80_v61 = vld [vmem:[%s4765_s4] sm:$0xff] }
 0x2a7   :  { %v534_v56 = vmul.f32 %v3417_v47, %v511_v43  ;;  %1867 = vadd.xlane.f32.xlu2 %v1866_v25 }
 0x2a8   :  { %v1946_v10 = vsel %vm98_vm0, %v1920_v16, 0.0 }
 0x2a9   :  { %v630_v34 = vmul.f32 %v534_v56, %v534_v56  ;;  %1947 = vadd.xlane.f32.xlu0 %v1946_v10  ;;  %v678_v2 = vsub.f32 %v4089_v57, %v534_v56 }
 0x2ab   :  { %v646_v45 = vsub.f32 %v614_v6, %v630_v34 }
 0x2ad   :  { %v662_v50 = vmax.f32 %v646_v45, 0.0 }
 0x2ae   :  { %v2850_v21 = vpop.permute.xlu2 %2849 }
 0x2af   :  { %v694_v60 = vadd.f32 1e-05, %v662_v50  ;;  %v2852_v14 = vunpack.i.h.bf16 %v2850_v21  ;;  %v2851_v51 = vunpack.i.l.bf16 %v2850_v21  ;;  %v81_v50 = vpack.c.bf16 %v80_v61, %v80_v61 }
 0x2b1   :  { %2941 = vrsqrt.f32 %v694_v60  ;;  %v1715_v1 = vsel %vm1702_vm5, %v1698_v26, %v2851_v51  ;;  %v1716_v30 = vsel %vm1702_vm5, %v1699_v19, %v2852_v14  ;;  %vm851_vm14 = vweird.f32 %v694_v60  ;;  %2572 = vmatmul.msk.bf16.vlgmr.msra.gmra.mxu0 %vm98_vm0, %v81_v50  ;;  %v4473_v50 = vld [vmem:[%s4699_s14] ss:$0 sm:$0xff] }
 0x2b2   :  { %v1725_v53 = vpack.c.bf16 %v1716_v30, %v1715_v1 }
 0x2b4   :  { %2667 = vmatmul.msk.bf16.gmra.mxu3 %vm1775_vm6, %v1725_v53 }
 0x2b7   :  { %v2942_v44 = vpop.eup %2941 }
 0x2b8   :  { %v846_v3 = vmul.f32 %v2942_v44, %v694_v60  ;;  %vm852_vm13 = vweird.f32 %v2942_v44 }
 0x2b9   :  { %vm853_vm15 = vmor %vm851_vm14, %vm852_vm13 }
 0x2ba   :  { %v847_v35 = vmul.f32 %v2942_v44, %v846_v3 }
 0x2bb   :  { %v2855_v8 = vpop.permute.xlu0 %2854 }
 0x2bc   :  { %v848_v39 = vmul.f32 0.5, %v847_v35  ;;  %v2856_v0 = vunpack.i.l.bf16 %v2855_v8  ;;  %v2857_v24 = vunpack.i.h.bf16 %v2855_v8 }
 0x2be   :  { %v849_v23 = vsub.f32 1.5, %v848_v39  ;;  %v1700_v36 = vsel %vm98_vm0, %v923_v62, %v2856_v0 }
 0x2bf   :  { %v1717_v57 = vsel %vm1702_vm5, %v1700_v36, %v2861_v55 }
 0x2c0   :  { %v850_v52 = vmul.f32 %v2942_v44, %v849_v23 }
 0x2c2   :  { %v854_v13 = vsel %vm853_vm15, %v2942_v44, %v850_v52  ;;  %v2718_v44 = vld [vmem:[%s4701_s16 + $0x8] sm:$0xff] }
 0x2c3   :  { %v870_v5 = vmul.f32 %v854_v13, %v678_v2  ;;  %2359 = vmatpush.bf16.msrb.mxu0 %v2718_v44 }
 0x2c5   :  { %v889_v46 = vmul.f32 %v2981_v37, %v870_v5  ;;  %v4389_v25 = vpop.f32.mrf.mxu3 }
 0x2c6   :  { %v1869_v37 = vsel %vm98_vm0, %v4389_v25, 0.0  ;;  %v1921_v56 = vmul.f32 %v4389_v25, %v4389_v25 }
 0x2c7   :  { %v908_v32 = vadd.f32 %v2982_v29, %v889_v46  ;;  %1870 = vadd.xlane.f32.xlu2 %v1869_v37  ;;  %2360 = vmatpush.bf16.msrb.mxu0 %v2717_v11 }
 0x2c8   :  { %v1949_v10 = vsel %vm98_vm0, %v1921_v56, 0.0 }
 0x2c9   :  { %v924_v15 = vmax.f32 %v908_v32, 0.0  ;;  %1950 = vadd.xlane.f32.xlu0 %v1949_v10 }
 0x2cb   :  { %v1701_v43 = vsel %vm98_vm0, %v924_v15, %v2857_v24 }
 0x2cc   :  { %v1718_v16 = vsel %vm1702_vm5, %v1701_v43, %v2862_v63 }
 0x2cd   :  { %v1726_v17 = vpack.c.bf16 %v1718_v16, %v1717_v57  ;;  %v4399_v6 = vpop.f32.mrf.mxu3 }
 0x2ce   :  { %v1872_v58 = vsel %vm98_vm0, %v4399_v6, 0.0  ;;  %v1922_v34 = vmul.f32 %v4399_v6, %v4399_v6 }
 0x2cf   :  { %2668 = vmatmul.msk.bf16.gmra.mxu3 %vm1775_vm6, %v1726_v17  ;;  %1873 = vadd.xlane.f32.xlu1 %v1872_v58 }
 0x2d0   :  { %v1952_v29 = vsel %vm98_vm0, %v1922_v34, 0.0  ;;  %v1856_v20 = vpop.xlane.xlu1 %1855 }
 0x2d1   :  { %1953 = vadd.xlane.f32.xlu2 %v1952_v29  ;;  %v4429_v26 = vmul.f32 %v1856_v20, %v3417_v47 }
 0x2d3   :  { %v1996_v3 = vmul.f32 %v4429_v26, %v4429_v26 }
 0x2d8   :  { %v1859_v18 = vpop.xlane.xlu1 %1858 }
 0x2d9   :  { %v4416_v4 = vmul.f32 %v1859_v18, %v3417_v47 }
 0x2db   :  { %v1997_v14 = vmul.f32 %v4416_v4, %v4416_v4 }
 0x2e2   :  { %v1942_v5 = vpop.xlane.xlu1 %1941 }
 0x2e3   :  { %v1982_v55 = vmul.f32 %v1942_v5, %v3417_v47 }
 0x2e6   :  { %v1853_v54 = vpop.xlane.xlu0 %1852 }
 0x2e7   :  { %v1933_v45 = vpop.xlane.xlu2 %1932  ;;  %v4420_v21 = vmul.f32 %v1853_v54, %v3417_v47 }
 0x2e8   :  { %v1979_v51 = vmul.f32 %v1933_v45, %v3417_v47 }
 0x2e9   :  { %v1995_v22 = vmul.f32 %v4420_v21, %v4420_v21  ;;  %v2043_v7 = vsub.f32 %v4251_v40, %v4420_v21  ;;  %v4480_v40 = vld [vmem:[%s4700_s15] ss:$0 sm:$0xff] }
 0x2eb   :  { %v2011_v1 = vsub.f32 %v1979_v51, %v1995_v22 }
 0x2ed   :  { %v2027_v53 = vmax.f32 %v2011_v1, 0.0 }
 0x2ee   :  { %v1936_v42 = vpop.xlane.xlu0 %1935 }
 0x2ef   :  { %v1939_v60 = vpop.xlane.xlu2 %1938  ;;  %v2059_v59 = vadd.f32 1e-05, %v2027_v53  ;;  %v1980_v27 = vmul.f32 %v1936_v42, %v3417_v47 }
 0x2f0   :  { %v1981_v19 = vmul.f32 %v1939_v60, %v3417_v47 }
 0x2f1   :  { %2943 = vrsqrt.f32 %v2059_v59  ;;  %v2012_v23 = vsub.f32 %v1980_v27, %v1996_v3  ;;  %vm2081_vm6 = vweird.f32 %v2059_v59 }
 0x2f2   :  { %v2013_v30 = vsub.f32 %v1981_v19, %v1997_v14  ;;  %v2044_v19 = vsub.f32 %v4257_v38, %v4429_v26 }
 0x2f3   :  { %v2028_v13 = vmax.f32 %v2012_v23, 0.0 }
 0x2f4   :  { %v2029_v49 = vmax.f32 %v2013_v30, 0.0 }
 0x2f5   :  { %v2060_v12 = vadd.f32 1e-05, %v2028_v13 }
 0x2f6   :  { %v4436_v35 = vadd.f32 1e-05, %v2029_v49  ;;  %v4439_v39 = vpop.f32.mrf.mxu3  ;;  %v1862_v46 = vpop.xlane.xlu0 %1861 }
 0x2f7   :  { %v1875_v52 = vsel %vm98_vm0, %v4439_v39, 0.0  ;;  %v1923_v2 = vmul.f32 %v4439_v39, %v4439_v39  ;;  %v2944_v0 = vpop.eup %2943  ;;  %v4451_v33 = vmul.f32 %v1862_v46, %v3417_v47  ;;  %vm2091_vm3 = vweird.f32 %v2060_v12 }
 0x2f8   :  { %2945 = vrsqrt.f32 %v4436_v35  ;;  %1876 = vadd.xlane.f32.xlu1 %v1875_v52  ;;  %v2076_v62 = vmul.f32 %v2944_v0, %v2059_v59  ;;  %vm2082_vm5 = vweird.f32 %v2944_v0  ;;  %vm2101_vm8 = vweird.f32 %v4436_v35 }
 0x2f9   :  { %v1955_v8 = vsel %vm98_vm0, %v1923_v2, 0.0  ;;  %2947 = vrsqrt.f32 %v2060_v12  ;;  %v1998_v15 = vmul.f32 %v4451_v33, %v4451_v33  ;;  %vm2083_vm1 = vmor %vm2081_vm6, %vm2082_vm5 }
 0x2fa   :  { %1956 = vadd.xlane.f32.xlu2 %v1955_v8  ;;  %v2077_v24 = vmul.f32 %v2944_v0, %v2076_v62  ;;  %v2045_v8 = vsub.f32 %v4269_v9, %v4416_v4 }
 0x2fb   :  { %v2014_v57 = vsub.f32 %v1982_v55, %v1998_v15  ;;  %v2046_v15 = vsub.f32 %v4289_v31, %v4451_v33 }
 0x2fc   :  { %v2078_v16 = vmul.f32 0.5, %v2077_v24 }
 0x2fd   :  { %v2030_v10 = vmax.f32 %v2014_v57, 0.0 }
 0x2fe   :  { %v4453_v32 = vpop.f32.mrf.mxu3  ;;  %v4455_v63 = vpop.eup %2945  ;;  %v2079_v58 = vsub.f32 1.5, %v2078_v16 }
 0x2ff   :  { %v1878_v36 = vsel %vm98_vm0, %v4453_v32, 0.0  ;;  %v1924_v43 = vmul.f32 %v4453_v32, %v4453_v32  ;;  %v2096_v37 = vmul.f32 %v4455_v63, %v4436_v35  ;;  %v2948_v17 = vpop.eup %2947  ;;  %v2062_v29 = vadd.f32 1e-05, %v2030_v10 }
 0x300   :  { %1879 = vadd.xlane.f32.xlu0 %v1878_v36  ;;  %v2086_v34 = vmul.f32 %v2948_v17, %v2060_v12  ;;  %v2080_v20 = vmul.f32 %v2944_v0, %v2079_v58  ;;  %vm2092_vm2 = vweird.f32 %v2948_v17  ;;  %vm2102_vm7 = vweird.f32 %v4455_v63 }
 0x301   :  { %v1958_v56 = vsel %vm98_vm0, %v1924_v43, 0.0  ;;  %v2097_v41 = vmul.f32 %v4455_v63, %v2096_v37  ;;  %2949 = vrsqrt.f32 %v2062_v29  ;;  %vm2093_vm4 = vmor %vm2091_vm3, %vm2092_vm2  ;;  %vm2111_vm11 = vweird.f32 %v2062_v29 }
 0x302   :  { %1959 = vadd.xlane.f32.xlu1 %v1958_v56  ;;  %v2087_v45 = vmul.f32 %v2948_v17, %v2086_v34  ;;  %v2084_v18 = vsel %vm2083_vm1, %v2944_v0, %v2080_v20  ;;  %vm4497_vm10 = vmor %vm2101_vm8, %vm2102_vm7 }
 0x303   :  { %v2235_v54 = vmul.f32 %v2084_v18, %v2043_v7  ;;  %v2098_v60 = vmul.f32 0.5, %v2097_v41 }
 0x304   :  { %v2088_v61 = vmul.f32 0.5, %v2087_v45 }
 0x305   :  { %v2254_v21 = vmul.f32 %v4473_v50, %v2235_v54  ;;  %v2099_v1 = vsub.f32 1.5, %v2098_v60 }
 0x306   :  { %v2089_v14 = vsub.f32 1.5, %v2088_v61 }
 0x307   :  { %v2950_v22 = vpop.eup %2949  ;;  %v2273_v42 = vadd.f32 %v4480_v40, %v2254_v21  ;;  %v2100_v38 = vmul.f32 %v4455_v63, %v2099_v1 }
 0x308   :  { %v2090_v51 = vmul.f32 %v2948_v17, %v2089_v14  ;;  %v2106_v53 = vmul.f32 %v2950_v22, %v2062_v29  ;;  %vm2112_vm9 = vweird.f32 %v2950_v22 }
 0x309   :  { %v2289_v12 = vmax.f32 %v2273_v42, 0.0  ;;  %v2104_v35 = vsel %vm4497_vm10, %v4455_v63, %v2100_v38  ;;  %vm2113_vm12 = vmor %vm2111_vm11, %vm2112_vm9 }
 0x30a   :  { %v2094_v30 = vsel %vm2093_vm4, %v2948_v17, %v2090_v51  ;;  %v2107_v44 = vmul.f32 %v2950_v22, %v2106_v53  ;;  %v2237_v37 = vmul.f32 %v2104_v35, %v2045_v8 }
 0x30b   :  { %v2236_v49 = vmul.f32 %v2094_v30, %v2044_v19 }
 0x30c   :  { %v2108_v26 = vmul.f32 0.5, %v2107_v44  ;;  %v2256_v34 = vmul.f32 %v4473_v50, %v2237_v37 }
 0x30d   :  { %v2255_v59 = vmul.f32 %v4473_v50, %v2236_v49 }
 0x30e   :  { %v2109_v52 = vsub.f32 1.5, %v2108_v26  ;;  %v2275_v54 = vadd.f32 %v4480_v40, %v2256_v34 }
 0x30f   :  { %v2274_v11 = vadd.f32 %v4480_v40, %v2255_v59 }
 0x310   :  { %v2110_v0 = vmul.f32 %v2950_v22, %v2109_v52  ;;  %v4504_v55 = vpop.f32.mrf.mxu3  ;;  %v2291_v21 = vmax.f32 %v2275_v54, 0.0 }
 0x311   :  { %v2290_v46 = vmax.f32 %v2274_v11, 0.0  ;;  %v1881_v9 = vsel %vm98_vm0, %v4504_v55, 0.0  ;;  %v1925_v24 = vmul.f32 %v4504_v55, %v4504_v55 }
 0x312   :  { %v1865_v3 = vpop.xlane.xlu0 %1864  ;;  %v2114_v36 = vsel %vm2113_vm12, %v2950_v22, %v2110_v0  ;;  %1882 = vadd.xlane.f32.xlu0 %v1881_v9 }
 0x313   :  { %v4488_v27 = vmul.f32 %v1865_v3, %v3417_v47  ;;  %v2305_v4 = vpack.c.bf16 %v2290_v46, %v2289_v12  ;;  %v2238_v63 = vmul.f32 %v2114_v36, %v2046_v15  ;;  %v1961_v57 = vsel %vm98_vm0, %v1925_v24, 0.0 }
 0x314   :  { %v1945_v23 = vpop.xlane.xlu1 %1944  ;;  %1962 = vadd.xlane.f32.xlu1 %v1961_v57 }
 0x315   :  { %v1999_v2 = vmul.f32 %v4488_v27, %v4488_v27  ;;  %v1983_v13 = vmul.f32 %v1945_v23, %v3417_v47  ;;  %2677 = vmatmul.msk.bf16.vlgmr.msrb.gmra.mxu0 %vm98_vm0, %v2305_v4  ;;  %v2257_v33 = vmul.f32 %v4473_v50, %v2238_v63  ;;  %v2047_v38 = vsub.f32 %v4350_v28, %v4488_v27 }
 0x317   :  { %v2015_v62 = vsub.f32 %v1983_v13, %v1999_v2  ;;  %v2276_v7 = vadd.f32 %v4480_v40, %v2257_v33 }
 0x318   :  { %v4518_v29 = vpop.f32.mrf.mxu3 }
 0x319   :  { %v2031_v43 = vmax.f32 %v2015_v62, 0.0  ;;  %v1884_v41 = vsel %vm98_vm0, %v4518_v29, 0.0  ;;  %v1926_v45 = vmul.f32 %v4518_v29, %v4518_v29  ;;  %v2292_v22 = vmax.f32 %v2276_v7, 0.0 }
 0x31a   :  { %v1868_v16 = vpop.xlane.xlu2 %1867  ;;  %1885 = vadd.xlane.f32.xlu2 %v1884_v41 }
 0x31b   :  { %v2063_v56 = vadd.f32 1e-05, %v2031_v43  ;;  %v1904_v31 = vmul.f32 %v1868_v16, %v3417_v47  ;;  %v1964_v61 = vsel %vm98_vm0, %v1926_v45, 0.0  ;;  %v2306_v30 = vpack.c.bf16 %v2292_v22, %v2291_v21 }
 0x31c   :  { %v1948_v17 = vpop.xlane.xlu0 %1947  ;;  %1965 = vadd.xlane.f32.xlu0 %v1964_v61 }
 0x31d   :  { %2951 = vrsqrt.f32 %v2063_v56  ;;  %v2000_v10 = vmul.f32 %v1904_v31, %v1904_v31  ;;  %v1984_v58 = vmul.f32 %v1948_v17, %v3417_v47  ;;  %vm2121_vm14 = vweird.f32 %v2063_v56 }
 0x31e   :  { %v2048_v2 = vsub.f32 %v4362_v48, %v1904_v31 }
 0x31f   :  { %v2016_v20 = vsub.f32 %v1984_v58, %v2000_v10 }
 0x321   :  { %v2032_v18 = vmax.f32 %v2016_v20, 0.0 }
 0x323   :  { %v2952_v60 = vpop.eup %2951  ;;  %v2064_v51 = vadd.f32 1e-05, %v2032_v18 }
 0x324   :  { %v2116_v14 = vmul.f32 %v2952_v60, %v2063_v56  ;;  %vm2122_vm13 = vweird.f32 %v2952_v60 }
 0x325   :  { %2953 = vrsqrt.f32 %v2064_v51  ;;  %2678 = vmatmul.msk.bf16.gmra.mxu0 %vm98_vm0, %v2306_v30  ;;  %vm2123_vm15 = vmor %vm2121_vm14, %vm2122_vm13  ;;  %vm2131_vm6 = vweird.f32 %v2064_v51 }
 0x326   :  { %v2117_v19 = vmul.f32 %v2952_v60, %v2116_v14 }
 0x328   :  { %v2118_v1 = vmul.f32 0.5, %v2117_v19 }
 0x32a   :  { %v2119_v53 = vsub.f32 1.5, %v2118_v1 }
 0x32b   :  { %v2954_v49 = vpop.eup %2953 }
 0x32c   :  { %v2120_v44 = vmul.f32 %v2952_v60, %v2119_v53  ;;  %v2126_v42 = vmul.f32 %v2954_v49, %v2064_v51  ;;  %vm2132_vm5 = vweird.f32 %v2954_v49 }
 0x32d   :  { %vm2133_vm1 = vmor %vm2131_vm6, %vm2132_vm5 }
 0x32e   :  { %v2124_v3 = vsel %vm2123_vm15, %v2952_v60, %v2120_v44  ;;  %v2127_v59 = vmul.f32 %v2954_v49, %v2126_v42 }
 0x32f   :  { %v2239_v23 = vmul.f32 %v2124_v3, %v2047_v38 }
 0x330   :  { %v2128_v26 = vmul.f32 0.5, %v2127_v59 }
 0x331   :  { %v2258_v13 = vmul.f32 %v4473_v50, %v2239_v23 }
 0x332   :  { %v2129_v11 = vsub.f32 1.5, %v2128_v26 }
 0x333   :  { %v2277_v48 = vadd.f32 %v4480_v40, %v2258_v13 }
 0x334   :  { %v2130_v52 = vmul.f32 %v2954_v49, %v2129_v11 }
 0x335   :  { %v2293_v62 = vmax.f32 %v2277_v48, 0.0  ;;  %v111_v48 = vpop.f32.mrf.mxu0 }
 0x336   :  { %v2134_v8 = vsel %vm2133_vm1, %v2954_v49, %v2130_v52  ;;  %115 = vst.msk [vmem:[#allocation2] sm:$0xff] %vm98_vm0, %v111_v48 }
 0x337   :  { %v4532_v12 = vpop.f32.mrf.mxu3  ;;  %v2240_v27 = vmul.f32 %v2134_v8, %v2048_v2 }
 0x338   :  { %v1887_v5 = vsel %vm98_vm0, %v4532_v12, 0.0  ;;  %v1927_v28 = vmul.f32 %v4532_v12, %v4532_v12 }
 0x339   :  { %1888 = vadd.xlane.f32.xlu2 %v1887_v5  ;;  %v2259_v35 = vmul.f32 %v4473_v50, %v2240_v27 }
 0x33a   :  { %v1967_v46 = vsel %vm98_vm0, %v1927_v28, 0.0  ;;  %v1871_v43 = vpop.xlane.xlu2 %1870 }
 0x33b   :  { %1968 = vadd.xlane.f32.xlu0 %v1967_v46  ;;  %v2278_v0 = vadd.f32 %v4480_v40, %v2259_v35  ;;  %v1905_v63 = vmul.f32 %v1871_v43, %v3417_v47 }
 0x33c   :  { %v1951_v16 = vpop.xlane.xlu0 %1950 }
 0x33d   :  { %v2294_v15 = vmax.f32 %v2278_v0, 0.0  ;;  %v2001_v37 = vmul.f32 %v1905_v63, %v1905_v63  ;;  %v1985_v56 = vmul.f32 %v1951_v16, %v3417_v47  ;;  %v2049_v23 = vsub.f32 %v4389_v25, %v1905_v63 }
 0x33f   :  { %v4542_v9 = vpop.f32.mrf.mxu3  ;;  %v2307_v24 = vpack.c.bf16 %v2294_v15, %v2293_v62  ;;  %v2017_v31 = vsub.f32 %v1985_v56, %v2001_v37 }
 0x340   :  { %v1890_v4 = vsel %vm98_vm0, %v4542_v9, 0.0  ;;  %v1928_v36 = vmul.f32 %v4542_v9, %v4542_v9 }
 0x341   :  { %1891 = vadd.xlane.f32.xlu1 %v1890_v4  ;;  %2679 = vmatmul.msk.bf16.gmra.mxu0 %vm98_vm0, %v2307_v24  ;;  %v2033_v33 = vmax.f32 %v2017_v31, 0.0 }
 0x342   :  { %v1970_v57 = vsel %vm98_vm0, %v1928_v36, 0.0  ;;  %v1874_v17 = vpop.xlane.xlu1 %1873 }
 0x343   :  { %1971 = vadd.xlane.f32.xlu2 %v1970_v57  ;;  %v2065_v10 = vadd.f32 1e-05, %v2033_v33  ;;  %v1906_v58 = vmul.f32 %v1874_v17, %v3417_v47  ;;  %v113_v57 = vpop.f32.mrf.mxu0 }
 0x344   :  { %v1954_v34 = vpop.xlane.xlu2 %1953 }
 0x345   :  { %2955 = vrsqrt.f32 %v2065_v10  ;;  %v2002_v20 = vmul.f32 %v1906_v58, %v1906_v58  ;;  %v1986_v41 = vmul.f32 %v1954_v34, %v3417_v47  ;;  %vm2141_vm3 = vweird.f32 %v2065_v10 }
 0x346   :  { %v2050_v8 = vsub.f32 %v4399_v6, %v1906_v58 }
 0x347   :  { %v2018_v45 = vsub.f32 %v1986_v41, %v2002_v20 }
 0x349   :  { %v2034_v7 = vmax.f32 %v2018_v45, 0.0 }
 0x34b   :  { %v2956_v18 = vpop.eup %2955  ;;  %v2066_v60 = vadd.f32 1e-05, %v2034_v7 }
 0x34c   :  { %v2136_v54 = vmul.f32 %v2956_v18, %v2065_v10  ;;  %vm2142_vm2 = vweird.f32 %v2956_v18 }
 0x34d   :  { %2957 = vrsqrt.f32 %v2066_v60  ;;  %vm2143_vm4 = vmor %vm2141_vm3, %vm2142_vm2  ;;  %vm2151_vm8 = vweird.f32 %v2066_v60 }
 0x34e   :  { %v2137_v22 = vmul.f32 %v2956_v18, %v2136_v54 }
 0x350   :  { %v2138_v21 = vmul.f32 0.5, %v2137_v22 }
 0x352   :  { %v4554_v61 = vpop.f32.mrf.mxu3  ;;  %v2139_v1 = vsub.f32 1.5, %v2138_v21 }
 0x353   :  { %v1893_v14 = vsel %vm98_vm0, %v4554_v61, 0.0  ;;  %v1929_v51 = vmul.f32 %v4554_v61, %v4554_v61  ;;  %v2958_v53 = vpop.eup %2957 }
 0x354   :  { %1894 = vadd.xlane.f32.xlu1 %v1893_v14  ;;  %v2140_v49 = vmul.f32 %v2956_v18, %v2139_v1  ;;  %v2146_v3 = vmul.f32 %v2958_v53, %v2066_v60  ;;  %vm2152_vm7 = vweird.f32 %v2958_v53 }
 0x355   :  { %v1973_v19 = vsel %vm98_vm0, %v1929_v51, 0.0  ;;  %vm2153_vm9 = vmor %vm2151_vm8, %vm2152_vm7 }
 0x356   :  { %1974 = vadd.xlane.f32.xlu2 %v1973_v19  ;;  %v2144_v38 = vsel %vm2143_vm4, %v2956_v18, %v2140_v49  ;;  %v2147_v26 = vmul.f32 %v2958_v53, %v2146_v3 }
 0x357   :  { %v2241_v52 = vmul.f32 %v2144_v38, %v2049_v23 }
 0x358   :  { %v2148_v11 = vmul.f32 0.5, %v2147_v26 }
 0x359   :  { %v2260_v5 = vmul.f32 %v4473_v50, %v2241_v52 }
 0x35a   :  { %v4561_v30 = vpop.f32.mrf.mxu3  ;;  %v2149_v2 = vsub.f32 1.5, %v2148_v11 }
 0x35b   :  { %v1930_v44 = vmul.f32 %v4561_v30, %v4561_v30  ;;  %v1896_v42 = vsel %vm98_vm0, %v4561_v30, 0.0  ;;  %v2279_v35 = vadd.f32 %v4480_v40, %v2260_v5 }
 0x35c   :  { %1897 = vadd.xlane.f32.xlu0 %v1896_v42  ;;  %v2150_v13 = vmul.f32 %v2958_v53, %v2149_v2 }
 0x35d   :  { %v1976_v59 = vsel %vm98_vm0, %v1930_v44, 0.0  ;;  %v2295_v62 = vmax.f32 %v2279_v35, 0.0 }
 0x35e   :  { %1977 = vadd.xlane.f32.xlu1 %v1976_v59  ;;  %v2154_v28 = vsel %vm2153_vm9, %v2958_v53, %v2150_v13 }
 0x35f   :  { %v2242_v27 = vmul.f32 %v2154_v28, %v2050_v8 }
 0x361   :  { %v2261_v46 = vmul.f32 %v4473_v50, %v2242_v27 }
 0x363   :  { %v2280_v25 = vadd.f32 %v4480_v40, %v2261_v46 }
 0x365   :  { %v2296_v15 = vmax.f32 %v2280_v25, 0.0 }
 0x367   :  { %v2308_v24 = vpack.c.bf16 %v2296_v15, %v2295_v62 }
 0x369   :  { %2680 = vmatmul.msk.bf16.gmra.mxu0 %vm98_vm0, %v2308_v24 }
 0x36b   :  { %v1877_v0 = vpop.xlane.xlu1 %1876 }
 0x36c   :  { %v1907_v4 = vmul.f32 %v1877_v0, %v3417_v47 }
 0x36d   :  { %v1957_v6 = vpop.xlane.xlu2 %1956 }
 0x36e   :  { %v2003_v36 = vmul.f32 %v1907_v4, %v1907_v4  ;;  %v1987_v43 = vmul.f32 %v1957_v6, %v3417_v47  ;;  %v2051_v21 = vsub.f32 %v4439_v39, %v1907_v4 }
 0x370   :  { %v2019_v63 = vsub.f32 %v1987_v43, %v2003_v36 }
 0x372   :  { %v2035_v16 = vmax.f32 %v2019_v63, 0.0 }
 0x373   :  { %v1880_v37 = vpop.xlane.xlu0 %1879 }
 0x374   :  { %v2067_v56 = vadd.f32 1e-05, %v2035_v16  ;;  %v1908_v31 = vmul.f32 %v1880_v37, %v3417_v47 }
 0x375   :  { %v1960_v33 = vpop.xlane.xlu1 %1959 }
 0x376   :  { %2959 = vrsqrt.f32 %v2067_v56  ;;  %v2004_v17 = vmul.f32 %v1908_v31, %v1908_v31  ;;  %v1988_v10 = vmul.f32 %v1960_v33, %v3417_v47  ;;  %vm2161_vm11 = vweird.f32 %v2067_v56 }
 0x377   :  { %v2052_v23 = vsub.f32 %v4453_v32, %v1908_v31 }
 0x378   :  { %v2020_v58 = vsub.f32 %v1988_v10, %v2004_v17 }
 0x37a   :  { %v2036_v34 = vmax.f32 %v2020_v58, 0.0 }
 0x37c   :  { %v2960_v20 = vpop.eup %2959  ;;  %v2068_v45 = vadd.f32 1e-05, %v2036_v34 }
 0x37d   :  { %v2156_v41 = vmul.f32 %v2960_v20, %v2067_v56  ;;  %vm2162_vm10 = vweird.f32 %v2960_v20 }
 0x37e   :  { %2961 = vrsqrt.f32 %v2068_v45  ;;  %vm2163_vm12 = vmor %vm2161_vm11, %vm2162_vm10  ;;  %vm2171_vm14 = vweird.f32 %v2068_v45 }
 0x37f   :  { %v2157_v7 = vmul.f32 %v2960_v20, %v2156_v41 }
 0x381   :  { %v2158_v18 = vmul.f32 0.5, %v2157_v7 }
 0x383   :  { %v2159_v54 = vsub.f32 1.5, %v2158_v18 }
 0x384   :  { %v2962_v60 = vpop.eup %2961 }
 0x385   :  { %v2160_v14 = vmul.f32 %v2960_v20, %v2159_v54  ;;  %v2166_v51 = vmul.f32 %v2962_v60, %v2068_v45  ;;  %v1883_v53 = vpop.xlane.xlu0 %1882  ;;  %vm2172_vm13 = vweird.f32 %v2962_v60 }
 0x386   :  { %v1909_v49 = vmul.f32 %v1883_v53, %v3417_v47  ;;  %vm2173_vm15 = vmor %vm2171_vm14, %vm2172_vm13 }
 0x387   :  { %v2167_v22 = vmul.f32 %v2962_v60, %v2166_v51  ;;  %v2164_v19 = vsel %vm2163_vm12, %v2960_v20, %v2160_v14  ;;  %v1963_v42 = vpop.xlane.xlu1 %1962 }
 0x388   :  { %v2243_v3 = vmul.f32 %v2164_v19, %v2051_v21  ;;  %v2005_v59 = vmul.f32 %v1909_v49, %v1909_v49  ;;  %v1989_v38 = vmul.f32 %v1963_v42, %v3417_v47  ;;  %v2053_v41 = vsub.f32 %v4504_v55, %v1909_v49 }
 0x389   :  { %v2168_v1 = vmul.f32 0.5, %v2167_v22 }
 0x38a   :  { %v2021_v11 = vsub.f32 %v1989_v38, %v2005_v59  ;;  %v2262_v39 = vmul.f32 %v4473_v50, %v2243_v3 }
 0x38b   :  { %v2169_v44 = vsub.f32 1.5, %v2168_v1 }
 0x38c   :  { %v2037_v2 = vmax.f32 %v2021_v11, 0.0  ;;  %v2281_v35 = vadd.f32 %v4480_v40, %v2262_v39 }
 0x38d   :  { %v2170_v26 = vmul.f32 %v2962_v60, %v2169_v44  ;;  %v1886_v8 = vpop.xlane.xlu2 %1885 }
 0x38e   :  { %v2069_v5 = vadd.f32 1e-05, %v2037_v2  ;;  %v1910_v28 = vmul.f32 %v1886_v8, %v3417_v47  ;;  %v2297_v15 = vmax.f32 %v2281_v35, 0.0 }
 0x38f   :  { %v2174_v52 = vsel %vm2173_vm15, %v2962_v60, %v2170_v26  ;;  %v1966_v46 = vpop.xlane.xlu0 %1965 }
 0x390   :  { %v2244_v13 = vmul.f32 %v2174_v52, %v2052_v23  ;;  %2963 = vrsqrt.f32 %v2069_v5  ;;  %v2006_v48 = vmul.f32 %v1910_v28, %v1910_v28  ;;  %v1990_v32 = vmul.f32 %v1966_v46, %v3417_v47 }
 0x391   :  { %vm2181_vm6 = vweird.f32 %v2069_v5  ;;  %v2054_v1 = vsub.f32 %v4518_v29, %v1910_v28 }
 0x392   :  { %v2263_v27 = vmul.f32 %v4473_v50, %v2244_v13  ;;  %v4588_v25 = vpop.f32.mrf.mxu0  ;;  %v2022_v62 = vsub.f32 %v1990_v32, %v2006_v48 }
 0x394   :  { %v2282_v0 = vadd.f32 %v4480_v40, %v2263_v27  ;;  %v2038_v6 = vmax.f32 %v2022_v62, 0.0 }
 0x396   :  { %v2298_v4 = vmax.f32 %v2282_v0, 0.0  ;;  %v2964_v36 = vpop.eup %2963  ;;  %v2070_v63 = vadd.f32 1e-05, %v2038_v6 }
 0x397   :  { %v2176_v43 = vmul.f32 %v2964_v36, %v2069_v5  ;;  %vm2182_vm5 = vweird.f32 %v2964_v36 }
 0x398   :  { %v2309_v24 = vpack.c.bf16 %v2298_v4, %v2297_v15  ;;  %2965 = vrsqrt.f32 %v2070_v63  ;;  %vm2183_vm1 = vmor %vm2181_vm6, %vm2182_vm5  ;;  %vm2191_vm3 = vweird.f32 %v2070_v63 }
 0x399   :  { %v2177_v16 = vmul.f32 %v2964_v36, %v2176_v43 }
 0x39a   :  { %2681 = vmatmul.msk.bf16.gmra.mxu0 %vm98_vm0, %v2309_v24  ;;  %v4593_v57 = vpop.f32.mrf.mxu0 }
 0x39b   :  { %v2414_v37 = vpack.c.bf16 %v4593_v57, %v4588_v25  ;;  %v2178_v56 = vmul.f32 0.5, %v2177_v16  ;;  %v2720_v25 = vld [vmem:[%s4705_s20 + $0x8] sm:$0xff]  ;;  %v2719_v57 = vld [vmem:[%s4705_s20] sm:$0xff] }
 0x39c   :  { %2503 = vmatpush.bf16.msrb.mxu2 %v2720_v25 }
 0x39d   :  { %v2179_v31 = vsub.f32 1.5, %v2178_v56 }
 0x39e   :  { %v2966_v33 = vpop.eup %2965 }
 0x39f   :  { %v2180_v17 = vmul.f32 %v2964_v36, %v2179_v31  ;;  %v2186_v10 = vmul.f32 %v2966_v33, %v2070_v63  ;;  %vm2192_vm2 = vweird.f32 %v2966_v33 }
 0x3a0   :  { %vm2193_vm4 = vmor %vm2191_vm3, %vm2192_vm2  ;;  %2504 = vmatpush.bf16.msrb.mxu2 %v2719_v57 }
 0x3a1   :  { %v2184_v34 = vsel %vm2183_vm1, %v2964_v36, %v2180_v17  ;;  %v2187_v20 = vmul.f32 %v2966_v33, %v2186_v10 }
 0x3a2   :  { %v4597_v58 = vpop.f32.mrf.mxu0  ;;  %v2245_v18 = vmul.f32 %v2184_v34, %v2053_v41 }
 0x3a3   :  { %v2188_v45 = vmul.f32 0.5, %v2187_v20 }
 0x3a4   :  { %v2264_v53 = vmul.f32 %v4473_v50, %v2245_v18 }
 0x3a5   :  { %v2189_v54 = vsub.f32 1.5, %v2188_v45 }
 0x3a6   :  { %v2283_v26 = vadd.f32 %v4480_v40, %v2264_v53 }
 0x3a7   :  { %v2190_v51 = vmul.f32 %v2966_v33, %v2189_v54 }
 0x3a8   :  { %v2299_v13 = vmax.f32 %v2283_v26, 0.0 }
 0x3a9   :  { %v2194_v49 = vsel %vm2193_vm4, %v2966_v33, %v2190_v51 }
 0x3aa   :  { %v4602_v21 = vpop.f32.mrf.mxu0  ;;  %v2246_v42 = vmul.f32 %v2194_v49, %v2054_v1 }
 0x3ab   :  { %v2415_v55 = vpack.c.bf16 %v4602_v21, %v4597_v58 }
 0x3ac   :  { %v1889_v7 = vpop.xlane.xlu2 %1888  ;;  %v2265_v38 = vmul.f32 %v4473_v50, %v2246_v42 }
 0x3ad   :  { %v1911_v60 = vmul.f32 %v1889_v7, %v3417_v47 }
 0x3ae   :  { %v1969_v14 = vpop.xlane.xlu0 %1968  ;;  %v2284_v29 = vadd.f32 %v4480_v40, %v2265_v38 }
 0x3af   :  { %v2007_v22 = vmul.f32 %v1911_v60, %v1911_v60  ;;  %v1991_v19 = vmul.f32 %v1969_v14, %v3417_v47  ;;  %v2055_v10 = vsub.f32 %v4532_v12, %v1911_v60 }
 0x3b0   :  { %v2300_v8 = vmax.f32 %v2284_v29, 0.0 }
 0x3b1   :  { %v2023_v44 = vsub.f32 %v1991_v19, %v2007_v22 }
 0x3b2   :  { %v2310_v28 = vpack.c.bf16 %v2300_v8, %v2299_v13 }
 0x3b3   :  { %v2039_v3 = vmax.f32 %v2023_v44, 0.0 }
 0x3b4   :  { %v1892_v59 = vpop.xlane.xlu1 %1891  ;;  %2682 = vmatmul.msk.bf16.gmra.mxu0 %vm98_vm0, %v2310_v28 }
 0x3b5   :  { %v2071_v23 = vadd.f32 1e-05, %v2039_v3  ;;  %v1912_v11 = vmul.f32 %v1892_v59, %v3417_v47 }
 0x3b6   :  { %v1972_v52 = vpop.xlane.xlu2 %1971 }
 0x3b7   :  { %2967 = vrsqrt.f32 %v2071_v23  ;;  %v2008_v39 = vmul.f32 %v1912_v11, %v1912_v11  ;;  %v1992_v2 = vmul.f32 %v1972_v52, %v3417_v47  ;;  %vm2201_vm8 = vweird.f32 %v2071_v23 }
 0x3b8   :  { %v2056_v51 = vsub.f32 %v4542_v9, %v1912_v11 }
 0x3b9   :  { %v2024_v5 = vsub.f32 %v1992_v2, %v2008_v39 }
 0x3bb   :  { %v2040_v27 = vmax.f32 %v2024_v5, 0.0 }
 0x3bd   :  { %v2968_v46 = vpop.eup %2967  ;;  %v2072_v48 = vadd.f32 1e-05, %v2040_v27 }
 0x3be   :  { %v2196_v35 = vmul.f32 %v2968_v46, %v2071_v23  ;;  %v4614_v32 = vpop.f32.mrf.mxu0  ;;  %vm2202_vm7 = vweird.f32 %v2968_v46 }
 0x3bf   :  { %2969 = vrsqrt.f32 %v2072_v48  ;;  %vm2203_vm9 = vmor %vm2201_vm8, %vm2202_vm7  ;;  %vm2211_vm11 = vweird.f32 %v2072_v48 }
 0x3c0   :  { %v2197_v0 = vmul.f32 %v2968_v46, %v2196_v35 }
 0x3c2   :  { %v2198_v62 = vmul.f32 0.5, %v2197_v0 }
 0x3c4   :  { %v2199_v15 = vsub.f32 1.5, %v2198_v62 }
 0x3c5   :  { %v2970_v4 = vpop.eup %2969 }
 0x3c6   :  { %v2200_v6 = vmul.f32 %v2968_v46, %v2199_v15  ;;  %v2206_v24 = vmul.f32 %v2970_v4, %v2072_v48  ;;  %v4616_v36 = vpop.f32.mrf.mxu0  ;;  %vm2212_vm10 = vweird.f32 %v2970_v4 }
 0x3c7   :  { %v1895_v43 = vpop.xlane.xlu1 %1894  ;;  %v2416_v63 = vpack.c.bf16 %v4616_v36, %v4614_v32  ;;  %vm2213_vm12 = vmor %vm2211_vm11, %vm2212_vm10 }
 0x3c8   :  { %v1913_v16 = vmul.f32 %v1895_v43, %v3417_v47  ;;  %v2207_v56 = vmul.f32 %v2970_v4, %v2206_v24  ;;  %v2204_v31 = vsel %vm2203_vm9, %v2968_v46, %v2200_v6 }
 0x3c9   :  { %v1975_v17 = vpop.xlane.xlu2 %1974  ;;  %v2247_v7 = vmul.f32 %v2204_v31, %v2055_v10 }
 0x3ca   :  { %v2009_v33 = vmul.f32 %v1913_v16, %v1913_v16  ;;  %v2208_v34 = vmul.f32 0.5, %v2207_v56  ;;  %v1993_v20 = vmul.f32 %v1975_v17, %v3417_v47  ;;  %v2057_v35 = vsub.f32 %v4554_v61, %v1913_v16 }
 0x3cb   :  { %v2266_v12 = vmul.f32 %v4473_v50, %v2247_v7 }
 0x3cc   :  { %v2209_v41 = vsub.f32 1.5, %v2208_v34  ;;  %v2025_v45 = vsub.f32 %v1993_v20, %v2009_v33 }
 0x3cd   :  { %v2285_v59 = vadd.f32 %v4480_v40, %v2266_v12 }
 0x3ce   :  { %v2210_v18 = vmul.f32 %v2970_v4, %v2209_v41  ;;  %v2041_v54 = vmax.f32 %v2025_v45, 0.0 }
 0x3cf   :  { %v1898_v14 = vpop.xlane.xlu0 %1897  ;;  %v2301_v52 = vmax.f32 %v2285_v59, 0.0 }
 0x3d0   :  { %v1914_v22 = vmul.f32 %v1898_v14, %v3417_v47  ;;  %v2214_v19 = vsel %vm2213_vm12, %v2970_v4, %v2210_v18  ;;  %v2073_v1 = vadd.f32 1e-05, %v2041_v54 }
 0x3d1   :  { %v1978_v53 = vpop.xlane.xlu1 %1977  ;;  %v2248_v44 = vmul.f32 %v2214_v19, %v2056_v51 }
 0x3d2   :  { %v2010_v60 = vmul.f32 %v1914_v22, %v1914_v22  ;;  %v1994_v49 = vmul.f32 %v1978_v53, %v3417_v47  ;;  %2971 = vrsqrt.f32 %v2073_v1  ;;  %vm2221_vm14 = vweird.f32 %v2073_v1 }
 0x3d3   :  { %v2267_v3 = vmul.f32 %v4473_v50, %v2248_v44  ;;  %v2058_v6 = vsub.f32 %v4561_v30, %v1914_v22  ;;  %v2403_v53 = vlaneseq  ;;  %v2413_v44 = vld [vmem:[#allocation2] sm:$0xff] }
 0x3d4   :  { %v2026_v42 = vsub.f32 %v1994_v49, %v2010_v60  ;;  %v2872_v60 = vld [vmem:[%s4768_s13] ss:$0 sm:$0xff]  ;;  %v3015_v49 = vmov 1.0|1.0  }
 0x3d5   :  { %v2286_v9 = vadd.f32 %v4480_v40, %v2267_v3  ;;  %v2404_v12 = vshrl.u32 %v2403_v53, 7 }
 0x3d6   :  { %v2042_v38 = vmax.f32 %v2026_v42, 0.0 }
 0x3d7   :  { %v2302_v23 = vmax.f32 %v2286_v9, 0.0  ;;  %vm2409_vm2 = vcmp.eq.s32.totalorder %v2404_v12, %v2872_v60 }
 0x3d8   :  { %v2074_v26 = vadd.f32 1e-05, %v2042_v38  ;;  %v2972_v11 = vpop.eup %2971  ;;  %vm2686_vm3 = vmpackc.low %vm2409_vm2, %vm2409_vm2 }
 0x3d9   :  { %v2216_v29 = vmul.f32 %v2972_v11, %v2073_v1  ;;  %v2311_v39 = vpack.c.bf16 %v2302_v23, %v2301_v52  ;;  %vm2222_vm13 = vweird.f32 %v2972_v11 }
 0x3da   :  { %2973 = vrsqrt.f32 %v2074_v26  ;;  %vm2223_vm15 = vmor %vm2221_vm14, %vm2222_vm13  ;;  %vm2231_vm6 = vweird.f32 %v2074_v26 }
 0x3db   :  { %v2217_v2 = vmul.f32 %v2972_v11, %v2216_v29  ;;  %2683 = vmatmul.msk.bf16.gmra.mxu0 %vm98_vm0, %v2311_v39 }
 0x3dd   :  { %v2218_v13 = vmul.f32 0.5, %v2217_v2 }
 0x3df   :  { %v2219_v5 = vsub.f32 1.5, %v2218_v13 }
 0x3e0   :  { %v2974_v8 = vpop.eup %2973 }
 0x3e1   :  { %v2226_v28 = vmul.f32 %v2974_v8, %v2074_v26  ;;  %v2220_v27 = vmul.f32 %v2972_v11, %v2219_v5  ;;  %vm2232_vm5 = vweird.f32 %v2974_v8 }
 0x3e2   :  { %vm2233_vm1 = vmor %vm2231_vm6, %vm2232_vm5 }
 0x3e3   :  { %v2227_v46 = vmul.f32 %v2974_v8, %v2226_v28  ;;  %v2224_v48 = vsel %vm2223_vm15, %v2972_v11, %v2220_v27  ;;  %v2873_v28 = vld [vmem:[%s4703_s18] ss:$0 sm:$0xff] }
 0x3e4   :  { %v2249_v62 = vmul.f32 %v2224_v48, %v2057_v35  ;;  %v2874_v35 = vld [vmem:[%s4704_s19] ss:$0 sm:$0xff] }
 0x3e5   :  { %v2228_v0 = vmul.f32 0.5, %v2227_v46 }
 0x3e6   :  { %v2268_v24 = vmul.f32 %v4473_v50, %v2249_v62  ;;  %v2377_v31 = vpop.f32.mrf.mxu0 }
 0x3e7   :  { %v2229_v15 = vsub.f32 1.5, %v2228_v0 }
 0x3e8   :  { %v2287_v17 = vadd.f32 %v4480_v40, %v2268_v24 }
 0x3e9   :  { %v2230_v4 = vmul.f32 %v2974_v8, %v2229_v15 }
 0x3ea   :  { %v2303_v16 = vmax.f32 %v2287_v17, 0.0 }
 0x3eb   :  { %v2234_v43 = vsel %vm2233_vm1, %v2974_v8, %v2230_v4 }
 0x3ec   :  { %v2250_v56 = vmul.f32 %v2234_v43, %v2058_v6 }
 0x3ee   :  { %v2269_v33 = vmul.f32 %v4473_v50, %v2250_v56  ;;  %v2379_v20 = vpop.f32.mrf.mxu0 }
 0x3ef   :  { %v2417_v41 = vpack.c.bf16 %v2379_v20, %v2377_v31 }
 0x3f0   :  { %v2288_v61 = vadd.f32 %v4480_v40, %v2269_v33 }
 0x3f2   :  { %v2304_v10 = vmax.f32 %v2288_v61, 0.0 }
 0x3f4   :  { %v2312_v34 = vpack.c.bf16 %v2304_v10, %v2303_v16 }
 0x3f6   :  { %2684 = vmatmul.msk.bf16.gmra.mxu0 %vm98_vm0, %v2312_v34 }
 0x417   :  { %v2382_v30 = vpop.f32.mrf.mxu0 }
 0x41f   :  { %v2384_v45 = vpop.f32.mrf.mxu0 }
 0x420   :  { %v2418_v1 = vpack.c.bf16 %v2384_v45, %v2382_v30 }
 0x431   :  { %v2387_v7 = vpop.f32.mrf.mxu0 }
 0x439   :  { %v2389_v18 = vpop.f32.mrf.mxu0 }
 0x43a   :  { %v2419_v40 = vpack.c.bf16 %v2389_v18, %v2387_v7 }
 0x458   :  { %v2392_v54 = vpop.f32.mrf.mxu0 }
 0x460   :  { %v2394_v14 = vpop.f32.mrf.mxu0 }
 0x461   :  { %v2420_v19 = vpack.c.bf16 %v2394_v14, %v2392_v54 }
 0x473   :  { %v2397_v51 = vpop.f32.mrf.mxu0 }
 0x47b   :  { %v2399_v22 = vpop.f32.mrf.mxu0 }
 0x47c   :  { %v2421_v50 = vpack.c.bf16 %v2399_v22, %v2397_v51  ;;  %v2875_v51 = vld [vmem:[%s4706_s21] ss:$0 sm:$0xff] }
 0x47e   :  { %2422 = vmatpush.bf16.msrb.mxu1 %v2421_v50  ;;  %v2876_v50 = vld [vmem:[%s4707_s22] ss:$0 sm:$0xff] }
 0x482   :  { %2423 = vmatpush.bf16.msrb.mxu1 %v2420_v19 }
 0x486   :  { %2424 = vmatpush.bf16.msrb.mxu1 %v2419_v40 }
 0x48a   :  { %2425 = vmatpush.bf16.msrb.mxu1 %v2418_v1  ;;  %v2983_v1 = vld [vmem:[%s4765_s4] sm:$0xff] }
 0x48e   :  { %2426 = vmatpush.bf16.msrb.mxu1 %v2417_v41 }
 0x492   :  { %2427 = vmatpush.bf16.msrb.mxu1 %v2416_v63 }
 0x496   :  { %2428 = vmatpush.bf16.msrb.mxu1 %v2415_v55 }
 0x49a   :  { %2429 = vmatpush.bf16.msrb.mxu1 %v2414_v37 }
 0x49d   :  { %2687 = vmatmul.msk.bf16.vlgmr.msrb.gmra.mxu1 %vm2686_vm3, %v3015_v49 }
 0x51a   :  { %v2431_v32 = vpop.f32.mrf.mxu1 }
 0x51b   :  { %v2435_v36 = vadd.f32 %v2431_v32, %v2413_v44 }
 0x51d   :  { %2436 = vst.msk [vmem:[#allocation2] sm:$0xff] %vm98_vm0, %v2435_v36 }
 0x522   :  { %v2433_v63 = vpop.f32.mrf.mxu1 }
 0x524   :  { %v2440_v42 = vld [vmem:[#allocation2] sm:$0xff] }
 0x525   :  { %v2443_v3 = vsel %vm98_vm0, %v2440_v42, 0.0  ;;  %v2447_v59 = vmul.f32 %v2440_v42, %v2440_v42 }
 0x526   :  { %2444 = vadd.xlane.f32.xlu0 %v2443_v3 }
 0x527   :  { %v2448_v58 = vsel %vm98_vm0, %v2447_v59, 0.0 }
 0x528   :  { %2449 = vadd.xlane.f32.xlu2 %v2448_v58 }
 0x599   :  { %v2445_v37 = vpop.xlane.xlu0 %2444 }
 0x59a   :  { %v2446_v21 = vmul.f32 %v2445_v37, %v3417_v47 }
 0x59b   :  { %v2450_v55 = vpop.xlane.xlu2 %2449 }
 0x59c   :  { %v2452_v38 = vmul.f32 %v2446_v21, %v2446_v21  ;;  %v2451_v9 = vmul.f32 %v2450_v55, %v3417_v47  ;;  %v2455_v5 = vsub.f32 %v2440_v42, %v2446_v21 }
 0x59e   :  { %v2453_v26 = vsub.f32 %v2451_v9, %v2452_v38 }
 0x5a0   :  { %v2454_v23 = vmax.f32 %v2453_v26, 0.0 }
 0x5a2   :  { %v2456_v11 = vadd.f32 1e-05, %v2454_v23 }
 0x5a4   :  { %2975 = vrsqrt.f32 %v2456_v11  ;;  %vm2463_vm7 = vweird.f32 %v2456_v11 }
 0x5aa   :  { %v2976_v52 = vpop.eup %2975 }
 0x5ab   :  { %v2458_v29 = vmul.f32 %v2976_v52, %v2456_v11  ;;  %vm2464_vm4 = vweird.f32 %v2976_v52 }
 0x5ac   :  { %vm2465_vm8 = vmor %vm2463_vm7, %vm2464_vm4 }
 0x5ad   :  { %v2459_v39 = vmul.f32 %v2976_v52, %v2458_v29 }
 0x5af   :  { %v2460_v2 = vmul.f32 0.5, %v2459_v39 }
 0x5b1   :  { %v2461_v13 = vsub.f32 1.5, %v2460_v2 }
 0x5b3   :  { %v2462_v8 = vmul.f32 %v2976_v52, %v2461_v13 }
 0x5b5   :  { %v2466_v27 = vsel %vm2465_vm8, %v2976_v52, %v2462_v8 }
 0x5b6   :  { %v2467_v46 = vmul.f32 %v2466_v27, %v2455_v5 }
 0x5b8   :  { %v2471_v48 = vmul.f32 %v2873_v28, %v2467_v46 }
 0x5ba   :  { %v2475_v0 = vadd.f32 %v2874_v35, %v2471_v48 }
 0x5bc   :  { %v2476_v62 = vmax.f32 %v2475_v0, 0.0 }
 0x5be   :  { %v2477_v15 = vpack.c.bf16 %v2476_v62, %v2476_v62 }
 0x5c0   :  { %2696 = vmatmul.msk.bf16.vlgmr.msrb.gmra.mxu2 %vm98_vm0, %v2477_v15 }
 0x643   :  { %v2506_v4 = vpop.f32.mrf.mxu2 }
 0x644   :  { %v2512_v6 = vsel %vm98_vm0, %v2506_v4, 0.0  ;;  %v2516_v24 = vmul.f32 %v2506_v4, %v2506_v4 }
 0x645   :  { %2513 = vadd.xlane.f32.xlu1 %v2512_v6 }
 0x646   :  { %v2517_v43 = vsel %vm98_vm0, %v2516_v24, 0.0 }
 0x647   :  { %2518 = vadd.xlane.f32.xlu0 %v2517_v43 }
 0x64b   :  { %v2508_v56 = vpop.f32.mrf.mxu2 }
 0x6b8   :  { %v2514_v31 = vpop.xlane.xlu1 %2513 }
 0x6b9   :  { %v2515_v33 = vmul.f32 %v2514_v31, %v3417_v47 }
 0x6ba   :  { %v2519_v17 = vpop.xlane.xlu0 %2518 }
 0x6bb   :  { %v2521_v61 = vmul.f32 %v2515_v33, %v2515_v33  ;;  %v2520_v16 = vmul.f32 %v2519_v17, %v3417_v47  ;;  %v2524_v14 = vsub.f32 %v2506_v4, %v2515_v33 }
 0x6bd   :  { %v2522_v10 = vsub.f32 %v2520_v16, %v2521_v61 }
 0x6bf   :  { %v2523_v34 = vmax.f32 %v2522_v10, 0.0 }
 0x6c1   :  { %v2525_v20 = vadd.f32 1e-05, %v2523_v34 }
 0x6c3   :  { %2977 = vrsqrt.f32 %v2525_v20  ;;  %vm2532_vm10 = vweird.f32 %v2525_v20 }
 0x6c9   :  { %v2978_v41 = vpop.eup %2977 }
 0x6ca   :  { %v2527_v30 = vmul.f32 %v2978_v41, %v2525_v20  ;;  %vm2533_vm9 = vweird.f32 %v2978_v41 }
 0x6cb   :  { %vm2534_vm11 = vmor %vm2532_vm10, %vm2533_vm9 }
 0x6cc   :  { %v2528_v45 = vmul.f32 %v2978_v41, %v2527_v30 }
 0x6ce   :  { %v2529_v7 = vmul.f32 0.5, %v2528_v45 }
 0x6d0   :  { %v2530_v18 = vsub.f32 1.5, %v2529_v7 }
 0x6d2   :  { %v2531_v54 = vmul.f32 %v2978_v41, %v2530_v18 }
 0x6d4   :  { %v2535_v22 = vsel %vm2534_vm11, %v2978_v41, %v2531_v54 }
 0x6d5   :  { %v2536_v47 = vmul.f32 %v2535_v22, %v2524_v14 }
 0x6d7   :  { %v2540_v19 = vmul.f32 %v2875_v51, %v2536_v47 }
 0x6d9   :  { %v2544_v40 = vadd.f32 %v2876_v50, %v2540_v19 }
 0x6db   :  { %v2546_v53 = vadd.f32 %v2983_v1, %v2544_v40 }
 0x6dd   :  { %2547 = vst.msk [vmem:[#allocation3] sm:$0xff] %vm98_vm0, %v2546_v53 }
 0x6de   :  { %2558 = dma.vmem_to_hbm [thread:$0]  %s2554_s6, 128, %s2556_s17, [#allocation4]  }
 0x6df   :  { %3008 = dma.done.wait [#allocation4], 128  }
 0x6e0   :  { %3009 = vsyncadd [#allocation4], 4294967168 }
 0x6e1   :  { %2563 = vsyncpa [#allocation4], 1 }

</bundles_post_ra>
